<compile_context>
chip_gen: v7x
topology: tpu7x:2x2x1
jax: 0.10.0
libtpu: 0.0.40
codegen_flags: <defaults>
</compile_context>

<pallas_src>
import functools

import jax
import jax.numpy as jnp
from jax.experimental import pallas as pl
from jax.experimental.pallas import tpu as pltpu


# ----------------------------------------------------------------------------
# Fused BiLSTM + FC kernel (built for static T, B, E, H, L, C)
# ----------------------------------------------------------------------------
def _make_bilstm_kernel(T, B, E, H, L, C):
    del E, C  # shapes come from the refs; kept for clarity of the factory signature

    def kernel(*refs):
        # refs = [x] + [w_ih_cat, w_hh_fwd, w_hh_bwd, b_cat] * L + [fc_w_t, fc_b]
        #        + [out] + [act scratch]
        x_ref = refs[0]
        fc_w_ref = refs[1 + 4 * L]
        fc_b_ref = refs[2 + 4 * L]
        out_ref = refs[3 + 4 * L]
        act_ref = refs[4 + 4 * L]          # (T*B, 2H) f32 VMEM scratch (layer handoff)

        f32 = jnp.float32
        bf16 = jnp.bfloat16

        # Hoisted lane-index mask; PyTorch gate order (i, f, g, o) => tanh lanes [2H, 3H).
        lane = jax.lax.broadcasted_iota(jnp.int32, (B, 4 * H), 1)
        tanh_lanes = (lane >= 2 * H) & (lane < 3 * H)

        layer_in = x_ref[...]              # (T*B, D_in) bf16, rows ordered t*B + b
        h_fin = [None, None]               # final hidden of fwd / bwd of current layer

        for layer in range(L):
            base = 1 + 4 * layer
            w_ih_cat = refs[base][...]         # (D_in, 8H) bf16  [fwd gates | bwd gates]
            w_hh = (refs[base + 1][...],       # (H, 4H) bf16 forward
                    refs[base + 2][...])       # (H, 4H) bf16 backward
            b_cat = refs[base + 3][...]        # (1, 8H) f32  (b_ih + b_hh, both dirs)

            # Input projection for both directions and all T steps: ONE MXU matmul,
            # off the serial critical path.
            pre_all = (jnp.dot(layer_in, w_ih_cat, preferred_element_type=f32)
                       + b_cat)                # (T*B, 8H)

            last_layer = layer == L - 1
            for d in range(2):                 # 0 = forward, 1 = backward
                pre = pre_all[:, d * 4 * H:(d + 1) * 4 * H]   # (T*B, 4H), lane-aligned
                whh = w_hh[d]
                h = jnp.zeros((B, H), f32)     # h0 = 0  (matches torch zeros init)
                c = jnp.zeros((B, H), f32)     # c0 = 0
                order = range(T) if d == 0 else range(T - 1, -1, -1)
                for t in order:                # fully unrolled; h/c stay in vregs
                    gates = pre[t * B:(t + 1) * B, :] + jnp.dot(
                        h.astype(bf16), whh, preferred_element_type=f32)   # (B, 4H)
                    act = jnp.where(tanh_lanes, jnp.tanh(gates),
                                    jax.nn.sigmoid(gates))
                    i_g = act[:, 0 * H:1 * H]
                    f_g = act[:, 1 * H:2 * H]
                    g_g = act[:, 2 * H:3 * H]
                    o_g = act[:, 3 * H:4 * H]
                    c = f_g * c + i_g * g_g
                    h = o_g * jnp.tanh(c)
                    if not last_layer:
                        # Stage hidden for the next layer's input (static offsets, VMEM).
                        act_ref[t * B:(t + 1) * B, d * H:(d + 1) * H] = h
                h_fin[d] = h

            if not last_layer:
                layer_in = act_ref[...].astype(bf16)          # (T*B, 2H)

        # torch: cat([out[:, -1, :H], out[:, 0, H:]]) == [h_fwd_final, h_bwd_final].
        # TODO(synk): training-mode Dropout(p=0.5) (RNG mask) not implemented; inference
        # behaviour (identity) is used, matching module.eval() semantics.
        fc_w = fc_w_ref[...]                                  # (2H, C) f32
        logits = (jnp.dot(h_fin[0], fc_w[0:H, :], preferred_element_type=f32)
                  + jnp.dot(h_fin[1], fc_w[H:2 * H, :], preferred_element_type=f32)
                  + fc_b_ref[...])
        out_ref[...] = logits.astype(out_ref.dtype)

    return kernel


def _full_block_spec(shape):
    nd = len(shape)
    return pl.BlockSpec(shape, lambda i, nd=nd: (0,) * nd)


# ----------------------------------------------------------------------------
# Forward pass (matches BiLSTM.forward semantics, inference mode)
# ----------------------------------------------------------------------------
def bilstm_forward(tokens, params, *, hidden_size, num_layers):
    H = hidden_size
    L = num_layers

    # Embedding lookup is a tiny data-dependent gather; done in plain JAX (glue).
    emb = params["embedding"][tokens]                        # (B, T, E) f32
    B, T, E = emb.shape
    x = jnp.transpose(emb, (1, 0, 2)).reshape(T * B, E)      # time-major rows: t*B + b
    x = x.astype(jnp.bfloat16)

    args = [x]
    for layer in range(L):
        p = params["lstm"][layer]
        args += [p["w_ih_cat"], p["w_hh_fwd"], p["w_hh_bwd"], p["b_cat"]]
    args += [params["fc_w_t"], params["fc_b"]]

    C = params["fc_w_t"].shape[1]
    kernel = _make_bilstm_kernel(T=T, B=B, E=E, H=H, L=L, C=C)

    return pl.pallas_call(
        kernel,
        out_shape=jax.ShapeDtypeStruct((B, C), jnp.float32),
        grid=(1,),
        in_specs=[_full_block_spec(a.shape) for a in args],
        out_specs=_full_block_spec((B, C)),
        scratch_shapes=[pltpu.VMEM((T * B, 2 * H), jnp.float32)],
        compiler_params=pltpu.CompilerParams(
            dimension_semantics=("arbitrary",),
        ),
    )(*args)


# ----------------------------------------------------------------------------
# Parameter construction (deterministic, mimics PyTorch default inits)
# ----------------------------------------------------------------------------
def init_params(key, num_embeddings, embedding_dim, hidden_size, num_layers,
                num_classes):
    H = hidden_size
    params = {}
    key, k_emb = jax.random.split(key)
    params["embedding"] = jax.random.normal(
        k_emb, (num_embeddings, embedding_dim), jnp.float32)

    bound = 1.0 / float(H) ** 0.5
    layers = []
    for layer in range(num_layers):
        d_in = embedding_dim if layer == 0 else 2 * H
        per_dir = []
        for _ in range(2):                                   # fwd, bwd
            key, k1, k2, k3, k4 = jax.random.split(key, 5)
            w_ih = jax.random.uniform(k1, (4 * H, d_in), jnp.float32, -bound, bound)
            w_hh = jax.random.uniform(k2, (4 * H, H), jnp.float32, -bound, bound)
            b_ih = jax.random.uniform(k3, (4 * H,), jnp.float32, -bound, bound)
            b_hh = jax.random.uniform(k4, (4 * H,), jnp.float32, -bound, bound)
            per_dir.append((w_ih, w_hh, b_ih + b_hh))
        (wif, whf, bf_), (wib, whb, bb_) = per_dir
        layers.append({
            # Lane-concat both directions' input projections: (d_in, 8H), bf16 for MXU.
            "w_ih_cat": jnp.concatenate([wif.T, wib.T], axis=1).astype(jnp.bfloat16),
            "w_hh_fwd": whf.T.astype(jnp.bfloat16),          # (H, 4H)
            "w_hh_bwd": whb.T.astype(jnp.bfloat16),          # (H, 4H)
            "b_cat": jnp.concatenate([bf_, bb_], axis=0).reshape(1, 8 * H),  # (1,8H) f32
        })
    params["lstm"] = layers

    key, k_w, k_b = jax.random.split(key, 3)
    fc_bound = 1.0 / float(2 * H) ** 0.5
    fc_w = jax.random.uniform(k_w, (num_classes, 2 * H), jnp.float32,
                              -fc_bound, fc_bound)
    fc_b = jax.random.uniform(k_b, (num_classes,), jnp.float32,
                              -fc_bound, fc_bound)
    params["fc_w_t"] = fc_w.T                                # (2H, C) f32
    params["fc_b"] = fc_b.reshape(1, num_classes)            # (1, C)  f32
    return params


# ----------------------------------------------------------------------------
if __name__ == "__main__":
    num_embeddings = 20
    embedding_dim = 16
    hidden_size = 32
    num_layers = 2
    num_classes = 5
    batch = 2
    seq_len = 8

    key = jax.random.PRNGKey(0)
    key, k_tok, k_param = jax.random.split(key, 3)
    tokens = jax.random.randint(k_tok, (batch, seq_len), 0, num_embeddings,
                                dtype=jnp.int32)

    params = init_params(k_param, num_embeddings, embedding_dim, hidden_size,
                         num_layers, num_classes)

    fwd = functools.partial(bilstm_forward, hidden_size=hidden_size,
                            num_layers=num_layers)
    logits = jax.jit(fwd)(tokens, params)
    jax.block_until_ready(logits)

    assert logits.shape == (batch, num_classes), logits.shape
    assert logits.dtype == jnp.float32
    assert bool(jnp.all(jnp.isfinite(logits)))
    print("KERNEL_OK")
</pallas_src>

<mosaic_0001>
module attributes {stable_mosaic.version = 11 : i64} {
  func.func @kernel(%arg0: i32, %arg1: memref<16x16xbf16, #tpu.memory_space<vmem>>, %arg2: memref<16x256xbf16, #tpu.memory_space<vmem>>, %arg3: memref<32x128xbf16, #tpu.memory_space<vmem>>, %arg4: memref<32x128xbf16, #tpu.memory_space<vmem>>, %arg5: memref<1x256xf32, #tpu.memory_space<vmem>>, %arg6: memref<64x256xbf16, #tpu.memory_space<vmem>>, %arg7: memref<32x128xbf16, #tpu.memory_space<vmem>>, %arg8: memref<32x128xbf16, #tpu.memory_space<vmem>>, %arg9: memref<1x256xf32, #tpu.memory_space<vmem>>, %arg10: memref<64x5xf32, #tpu.memory_space<vmem>>, %arg11: memref<1x5xf32, #tpu.memory_space<vmem>>, %arg12: memref<2x5xf32, #tpu.memory_space<vmem>>, %arg13: memref<16x64xf32, #tpu.memory_space<vmem>>) attributes {dimension_semantics = [#tpu.dimension_semantics<arbitrary>], iteration_bounds = array<i64: 1>, scalar_prefetch = 0 : i64, scratch_operands = 1 : i64, tpu.core_type = #tpu.core_type<tc>, window_params = [{pipeline_mode = #tpu.pipeline_mode<synchronous>, transform_indices = @transform_0, window_bounds = array<i64: 16, 16>}, {pipeline_mode = #tpu.pipeline_mode<synchronous>, transform_indices = @transform_1, window_bounds = array<i64: 16, 256>}, {pipeline_mode = #tpu.pipeline_mode<synchronous>, transform_indices = @transform_2, window_bounds = array<i64: 32, 128>}, {pipeline_mode = #tpu.pipeline_mode<synchronous>, transform_indices = @transform_3, window_bounds = array<i64: 32, 128>}, {pipeline_mode = #tpu.pipeline_mode<synchronous>, transform_indices = @transform_4, window_bounds = array<i64: 1, 256>}, {pipeline_mode = #tpu.pipeline_mode<synchronous>, transform_indices = @transform_5, window_bounds = array<i64: 64, 256>}, {pipeline_mode = #tpu.pipeline_mode<synchronous>, transform_indices = @transform_6, window_bounds = array<i64: 32, 128>}, {pipeline_mode = #tpu.pipeline_mode<synchronous>, transform_indices = @transform_7, window_bounds = array<i64: 32, 128>}, {pipeline_mode = #tpu.pipeline_mode<synchronous>, transform_indices = @transform_8, window_bounds = array<i64: 1, 256>}, {pipeline_mode = #tpu.pipeline_mode<synchronous>, transform_indices = @transform_9, window_bounds = array<i64: 64, 5>}, {pipeline_mode = #tpu.pipeline_mode<synchronous>, transform_indices = @transform_10, window_bounds = array<i64: 1, 5>}, {pipeline_mode = #tpu.pipeline_mode<synchronous>, transform_indices = @transform_11, window_bounds = array<i64: 2, 5>}]} {
    %0 = tpu.iota {dimensions = array<i32: 1>} : vector<2x128xi32>
    %c64_i32 = arith.constant 64 : i32
    %1 = vector.broadcast %c64_i32 : i32 to vector<2x128xi32>
    %2 = arith.cmpi sge, %0, %1 : vector<2x128xi32>
    %c96_i32 = arith.constant 96 : i32
    %3 = vector.broadcast %c96_i32 : i32 to vector<2x128xi32>
    %4 = arith.cmpi slt, %0, %3 : vector<2x128xi32>
    %5 = arith.andi %2, %4 : vector<2x128xi1>
    %c0 = arith.constant 0 : index
    %c0_0 = arith.constant 0 : index
    %6 = vector.load %arg1[%c0, %c0_0] : memref<16x16xbf16, #tpu.memory_space<vmem>>, vector<16x16xbf16>
    %c0_1 = arith.constant 0 : index
    %c0_2 = arith.constant 0 : index
    %7 = vector.load %arg2[%c0_1, %c0_2] : memref<16x256xbf16, #tpu.memory_space<vmem>>, vector<16x256xbf16>
    %c0_3 = arith.constant 0 : index
    %c0_4 = arith.constant 0 : index
    %8 = vector.load %arg3[%c0_3, %c0_4] : memref<32x128xbf16, #tpu.memory_space<vmem>>, vector<32x128xbf16>
    %c0_5 = arith.constant 0 : index
    %c0_6 = arith.constant 0 : index
    %9 = vector.load %arg4[%c0_5, %c0_6] : memref<32x128xbf16, #tpu.memory_space<vmem>>, vector<32x128xbf16>
    %c0_7 = arith.constant 0 : index
    %c0_8 = arith.constant 0 : index
    %10 = vector.load %arg5[%c0_7, %c0_8] : memref<1x256xf32, #tpu.memory_space<vmem>>, vector<1x256xf32>
    %cst = arith.constant dense<0.000000e+00> : vector<16x256xf32>
    %11 = tpu.matmul %6, %7, %cst {dimension_numbers = #tpu.dot_dimension_numbers<[1], [0], [0], [1], [0, 0, 1, 1], [], []>} : vector<16x16xbf16>, vector<16x256xbf16>, vector<16x256xf32> -> vector<16x256xf32>
    %12 = vector.broadcast %10 : vector<1x256xf32> to vector<16x256xf32>
    %13 = arith.addf %11, %12 : vector<16x256xf32>
    %14 = vector.extract_strided_slice %13 {offsets = [0, 0], sizes = [16, 128], strides = [1, 1]} : vector<16x256xf32> to vector<16x128xf32>
    %cst_9 = arith.constant 0.000000e+00 : f32
    %15 = vector.broadcast %cst_9 : f32 to vector<2x32xf32>
    %cst_10 = arith.constant 0.000000e+00 : f32
    %16 = vector.broadcast %cst_10 : f32 to vector<2x32xf32>
    %17 = vector.extract_strided_slice %14 {offsets = [0, 0], sizes = [2, 128], strides = [1, 1]} : vector<16x128xf32> to vector<2x128xf32>
    %18 = arith.truncf %15 : vector<2x32xf32> to vector<2x32xbf16>
    %cst_11 = arith.constant dense<0.000000e+00> : vector<2x128xf32>
    %19 = tpu.matmul %18, %8, %cst_11 {dimension_numbers = #tpu.dot_dimension_numbers<[1], [0], [0], [1], [0, 0, 1, 1], [], []>} : vector<2x32xbf16>, vector<32x128xbf16>, vector<2x128xf32> -> vector<2x128xf32>
    %20 = arith.addf %17, %19 : vector<2x128xf32>
    %21 = math.tanh %20 : vector<2x128xf32>
    %22 = arith.negf %20 : vector<2x128xf32>
    %23 = math.exp %22 : vector<2x128xf32>
    %cst_12 = arith.constant 1.000000e+00 : f32
    %24 = vector.broadcast %cst_12 : f32 to vector<2x128xf32>
    %25 = arith.addf %24, %23 : vector<2x128xf32>
    %26 = arith.divf %24, %25 : vector<2x128xf32>
    %27 = arith.select %5, %21, %26 : vector<2x128xi1>, vector<2x128xf32>
    %28 = vector.extract_strided_slice %27 {offsets = [0, 0], sizes = [2, 32], strides = [1, 1]} : vector<2x128xf32> to vector<2x32xf32>
    %29 = vector.extract_strided_slice %27 {offsets = [0, 32], sizes = [2, 32], strides = [1, 1]} : vector<2x128xf32> to vector<2x32xf32>
    %30 = vector.extract_strided_slice %27 {offsets = [0, 64], sizes = [2, 32], strides = [1, 1]} : vector<2x128xf32> to vector<2x32xf32>
    %31 = vector.extract_strided_slice %27 {offsets = [0, 96], sizes = [2, 32], strides = [1, 1]} : vector<2x128xf32> to vector<2x32xf32>
    %32 = arith.mulf %29, %16 : vector<2x32xf32>
    %33 = arith.mulf %28, %30 : vector<2x32xf32>
    %34 = arith.addf %32, %33 : vector<2x32xf32>
    %35 = math.tanh %34 : vector<2x32xf32>
    %36 = arith.mulf %31, %35 : vector<2x32xf32>
    %c0_13 = arith.constant 0 : index
    %c0_14 = arith.constant 0 : index
    %37 = vector.load %arg13[%c0_13, %c0_14] : memref<16x64xf32, #tpu.memory_space<vmem>>, vector<2x32xf32>
    tpu.vector_store %arg13[%c0_13, %c0_14], %36 {strides = array<i32>} : memref<16x64xf32, #tpu.memory_space<vmem>>, vector<2x32xf32>,
    %38 = vector.extract_strided_slice %14 {offsets = [2, 0], sizes = [2, 128], strides = [1, 1]} : vector<16x128xf32> to vector<2x128xf32>
    %39 = arith.truncf %36 : vector<2x32xf32> to vector<2x32xbf16>
    %cst_15 = arith.constant dense<0.000000e+00> : vector<2x128xf32>
    %40 = tpu.matmul %39, %8, %cst_15 {dimension_numbers = #tpu.dot_dimension_numbers<[1], [0], [0], [1], [0, 0, 1, 1], [], []>} : vector<2x32xbf16>, vector<32x128xbf16>, vector<2x128xf32> -> vector<2x128xf32>
    %41 = arith.addf %38, %40 : vector<2x128xf32>
    %42 = math.tanh %41 : vector<2x128xf32>
    %43 = arith.negf %41 : vector<2x128xf32>
    %44 = math.exp %43 : vector<2x128xf32>
    %cst_16 = arith.constant 1.000000e+00 : f32
    %45 = vector.broadcast %cst_16 : f32 to vector<2x128xf32>
    %46 = arith.addf %45, %44 : vector<2x128xf32>
    %47 = arith.divf %45, %46 : vector<2x128xf32>
    %48 = arith.select %5, %42, %47 : vector<2x128xi1>, vector<2x128xf32>
    %49 = vector.extract_strided_slice %48 {offsets = [0, 0], sizes = [2, 32], strides = [1, 1]} : vector<2x128xf32> to vector<2x32xf32>
    %50 = vector.extract_strided_slice %48 {offsets = [0, 32], sizes = [2, 32], strides = [1, 1]} : vector<2x128xf32> to vector<2x32xf32>
    %51 = vector.extract_strided_slice %48 {offsets = [0, 64], sizes = [2, 32], strides = [1, 1]} : vector<2x128xf32> to vector<2x32xf32>
    %52 = vector.extract_strided_slice %48 {offsets = [0, 96], sizes = [2, 32], strides = [1, 1]} : vector<2x128xf32> to vector<2x32xf32>
    %53 = arith.mulf %50, %34 : vector<2x32xf32>
    %54 = arith.mulf %49, %51 : vector<2x32xf32>
    %55 = arith.addf %53, %54 : vector<2x32xf32>
    %56 = math.tanh %55 : vector<2x32xf32>
    %57 = arith.mulf %52, %56 : vector<2x32xf32>
    %c2 = arith.constant 2 : index
    %c0_17 = arith.constant 0 : index
    %58 = vector.load %arg13[%c2, %c0_17] : memref<16x64xf32, #tpu.memory_space<vmem>>, vector<2x32xf32>
    tpu.vector_store %arg13[%c2, %c0_17], %57 {strides = array<i32>} : memref<16x64xf32, #tpu.memory_space<vmem>>, vector<2x32xf32>,
    %59 = vector.extract_strided_slice %14 {offsets = [4, 0], sizes = [2, 128], strides = [1, 1]} : vector<16x128xf32> to vector<2x128xf32>
    %60 = arith.truncf %57 : vector<2x32xf32> to vector<2x32xbf16>
    %cst_18 = arith.constant dense<0.000000e+00> : vector<2x128xf32>
    %61 = tpu.matmul %60, %8, %cst_18 {dimension_numbers = #tpu.dot_dimension_numbers<[1], [0], [0], [1], [0, 0, 1, 1], [], []>} : vector<2x32xbf16>, vector<32x128xbf16>, vector<2x128xf32> -> vector<2x128xf32>
    %62 = arith.addf %59, %61 : vector<2x128xf32>
    %63 = math.tanh %62 : vector<2x128xf32>
    %64 = arith.negf %62 : vector<2x128xf32>
    %65 = math.exp %64 : vector<2x128xf32>
    %cst_19 = arith.constant 1.000000e+00 : f32
    %66 = vector.broadcast %cst_19 : f32 to vector<2x128xf32>
    %67 = arith.addf %66, %65 : vector<2x128xf32>
    %68 = arith.divf %66, %67 : vector<2x128xf32>
    %69 = arith.select %5, %63, %68 : vector<2x128xi1>, vector<2x128xf32>
    %70 = vector.extract_strided_slice %69 {offsets = [0, 0], sizes = [2, 32], strides = [1, 1]} : vector<2x128xf32> to vector<2x32xf32>
    %71 = vector.extract_strided_slice %69 {offsets = [0, 32], sizes = [2, 32], strides = [1, 1]} : vector<2x128xf32> to vector<2x32xf32>
    %72 = vector.extract_strided_slice %69 {offsets = [0, 64], sizes = [2, 32], strides = [1, 1]} : vector<2x128xf32> to vector<2x32xf32>
    %73 = vector.extract_strided_slice %69 {offsets = [0, 96], sizes = [2, 32], strides = [1, 1]} : vector<2x128xf32> to vector<2x32xf32>
    %74 = arith.mulf %71, %55 : vector<2x32xf32>
    %75 = arith.mulf %70, %72 : vector<2x32xf32>
    %76 = arith.addf %74, %75 : vector<2x32xf32>
    %77 = math.tanh %76 : vector<2x32xf32>
    %78 = arith.mulf %73, %77 : vector<2x32xf32>
    %c4 = arith.constant 4 : index
    %c0_20 = arith.constant 0 : index
    %79 = vector.load %arg13[%c4, %c0_20] : memref<16x64xf32, #tpu.memory_space<vmem>>, vector<2x32xf32>
    tpu.vector_store %arg13[%c4, %c0_20], %78 {strides = array<i32>} : memref<16x64xf32, #tpu.memory_space<vmem>>, vector<2x32xf32>,
    %80 = vector.extract_strided_slice %14 {offsets = [6, 0], sizes = [2, 128], strides = [1, 1]} : vector<16x128xf32> to vector<2x128xf32>
    %81 = arith.truncf %78 : vector<2x32xf32> to vector<2x32xbf16>
    %cst_21 = arith.constant dense<0.000000e+00> : vector<2x128xf32>
    %82 = tpu.matmul %81, %8, %cst_21 {dimension_numbers = #tpu.dot_dimension_numbers<[1], [0], [0], [1], [0, 0, 1, 1], [], []>} : vector<2x32xbf16>, vector<32x128xbf16>, vector<2x128xf32> -> vector<2x128xf32>
    %83 = arith.addf %80, %82 : vector<2x128xf32>
    %84 = math.tanh %83 : vector<2x128xf32>
    %85 = arith.negf %83 : vector<2x128xf32>
    %86 = math.exp %85 : vector<2x128xf32>
    %cst_22 = arith.constant 1.000000e+00 : f32
    %87 = vector.broadcast %cst_22 : f32 to vector<2x128xf32>
    %88 = arith.addf %87, %86 : vector<2x128xf32>
    %89 = arith.divf %87, %88 : vector<2x128xf32>
    %90 = arith.select %5, %84, %89 : vector<2x128xi1>, vector<2x128xf32>
    %91 = vector.extract_strided_slice %90 {offsets = [0, 0], sizes = [2, 32], strides = [1, 1]} : vector<2x128xf32> to vector<2x32xf32>
    %92 = vector.extract_strided_slice %90 {offsets = [0, 32], sizes = [2, 32], strides = [1, 1]} : vector<2x128xf32> to vector<2x32xf32>
    %93 = vector.extract_strided_slice %90 {offsets = [0, 64], sizes = [2, 32], strides = [1, 1]} : vector<2x128xf32> to vector<2x32xf32>
    %94 = vector.extract_strided_slice %90 {offsets = [0, 96], sizes = [2, 32], strides = [1, 1]} : vector<2x128xf32> to vector<2x32xf32>
    %95 = arith.mulf %92, %76 : vector<2x32xf32>
    %96 = arith.mulf %91, %93 : vector<2x32xf32>
    %97 = arith.addf %95, %96 : vector<2x32xf32>
    %98 = math.tanh %97 : vector<2x32xf32>
    %99 = arith.mulf %94, %98 : vector<2x32xf32>
    %c6 = arith.constant 6 : index
    %c0_23 = arith.constant 0 : index
    %100 = vector.load %arg13[%c6, %c0_23] : memref<16x64xf32, #tpu.memory_space<vmem>>, vector<2x32xf32>
    tpu.vector_store %arg13[%c6, %c0_23], %99 {strides = array<i32>} : memref<16x64xf32, #tpu.memory_space<vmem>>, vector<2x32xf32>,
    %101 = vector.extract_strided_slice %14 {offsets = [8, 0], sizes = [2, 128], strides = [1, 1]} : vector<16x128xf32> to vector<2x128xf32>
    %102 = arith.truncf %99 : vector<2x32xf32> to vector<2x32xbf16>
    %cst_24 = arith.constant dense<0.000000e+00> : vector<2x128xf32>
    %103 = tpu.matmul %102, %8, %cst_24 {dimension_numbers = #tpu.dot_dimension_numbers<[1], [0], [0], [1], [0, 0, 1, 1], [], []>} : vector<2x32xbf16>, vector<32x128xbf16>, vector<2x128xf32> -> vector<2x128xf32>
    %104 = arith.addf %101, %103 : vector<2x128xf32>
    %105 = math.tanh %104 : vector<2x128xf32>
    %106 = arith.negf %104 : vector<2x128xf32>
    %107 = math.exp %106 : vector<2x128xf32>
    %cst_25 = arith.constant 1.000000e+00 : f32
    %108 = vector.broadcast %cst_25 : f32 to vector<2x128xf32>
    %109 = arith.addf %108, %107 : vector<2x128xf32>
    %110 = arith.divf %108, %109 : vector<2x128xf32>
    %111 = arith.select %5, %105, %110 : vector<2x128xi1>, vector<2x128xf32>
    %112 = vector.extract_strided_slice %111 {offsets = [0, 0], sizes = [2, 32], strides = [1, 1]} : vector<2x128xf32> to vector<2x32xf32>
    %113 = vector.extract_strided_slice %111 {offsets = [0, 32], sizes = [2, 32], strides = [1, 1]} : vector<2x128xf32> to vector<2x32xf32>
    %114 = vector.extract_strided_slice %111 {offsets = [0, 64], sizes = [2, 32], strides = [1, 1]} : vector<2x128xf32> to vector<2x32xf32>
    %115 = vector.extract_strided_slice %111 {offsets = [0, 96], sizes = [2, 32], strides = [1, 1]} : vector<2x128xf32> to vector<2x32xf32>
    %116 = arith.mulf %113, %97 : vector<2x32xf32>
    %117 = arith.mulf %112, %114 : vector<2x32xf32>
    %118 = arith.addf %116, %117 : vector<2x32xf32>
    %119 = math.tanh %118 : vector<2x32xf32>
    %120 = arith.mulf %115, %119 : vector<2x32xf32>
    %c8 = arith.constant 8 : index
    %c0_26 = arith.constant 0 : index
    %121 = vector.load %arg13[%c8, %c0_26] : memref<16x64xf32, #tpu.memory_space<vmem>>, vector<2x32xf32>
    tpu.vector_store %arg13[%c8, %c0_26], %120 {strides = array<i32>} : memref<16x64xf32, #tpu.memory_space<vmem>>, vector<2x32xf32>,
    %122 = vector.extract_strided_slice %14 {offsets = [10, 0], sizes = [2, 128], strides = [1, 1]} : vector<16x128xf32> to vector<2x128xf32>
    %123 = arith.truncf %120 : vector<2x32xf32> to vector<2x32xbf16>
    %cst_27 = arith.constant dense<0.000000e+00> : vector<2x128xf32>
    %124 = tpu.matmul %123, %8, %cst_27 {dimension_numbers = #tpu.dot_dimension_numbers<[1], [0], [0], [1], [0, 0, 1, 1], [], []>} : vector<2x32xbf16>, vector<32x128xbf16>, vector<2x128xf32> -> vector<2x128xf32>
    %125 = arith.addf %122, %124 : vector<2x128xf32>
    %126 = math.tanh %125 : vector<2x128xf32>
    %127 = arith.negf %125 : vector<2x128xf32>
    %128 = math.exp %127 : vector<2x128xf32>
    %cst_28 = arith.constant 1.000000e+00 : f32
    %129 = vector.broadcast %cst_28 : f32 to vector<2x128xf32>
    %130 = arith.addf %129, %128 : vector<2x128xf32>
    %131 = arith.divf %129, %130 : vector<2x128xf32>
    %132 = arith.select %5, %126, %131 : vector<2x128xi1>, vector<2x128xf32>
    %133 = vector.extract_strided_slice %132 {offsets = [0, 0], sizes = [2, 32], strides = [1, 1]} : vector<2x128xf32> to vector<2x32xf32>
    %134 = vector.extract_strided_slice %132 {offsets = [0, 32], sizes = [2, 32], strides = [1, 1]} : vector<2x128xf32> to vector<2x32xf32>
    %135 = vector.extract_strided_slice %132 {offsets = [0, 64], sizes = [2, 32], strides = [1, 1]} : vector<2x128xf32> to vector<2x32xf32>
    %136 = vector.extract_strided_slice %132 {offsets = [0, 96], sizes = [2, 32], strides = [1, 1]} : vector<2x128xf32> to vector<2x32xf32>
    %137 = arith.mulf %134, %118 : vector<2x32xf32>
    %138 = arith.mulf %133, %135 : vector<2x32xf32>
    %139 = arith.addf %137, %138 : vector<2x32xf32>
    %140 = math.tanh %139 : vector<2x32xf32>
    %141 = arith.mulf %136, %140 : vector<2x32xf32>
    %c10 = arith.constant 10 : index
    %c0_29 = arith.constant 0 : index
    %142 = vector.load %arg13[%c10, %c0_29] : memref<16x64xf32, #tpu.memory_space<vmem>>, vector<2x32xf32>
    tpu.vector_store %arg13[%c10, %c0_29], %141 {strides = array<i32>} : memref<16x64xf32, #tpu.memory_space<vmem>>, vector<2x32xf32>,
    %143 = vector.extract_strided_slice %14 {offsets = [12, 0], sizes = [2, 128], strides = [1, 1]} : vector<16x128xf32> to vector<2x128xf32>
    %144 = arith.truncf %141 : vector<2x32xf32> to vector<2x32xbf16>
    %cst_30 = arith.constant dense<0.000000e+00> : vector<2x128xf32>
    %145 = tpu.matmul %144, %8, %cst_30 {dimension_numbers = #tpu.dot_dimension_numbers<[1], [0], [0], [1], [0, 0, 1, 1], [], []>} : vector<2x32xbf16>, vector<32x128xbf16>, vector<2x128xf32> -> vector<2x128xf32>
    %146 = arith.addf %143, %145 : vector<2x128xf32>
    %147 = math.tanh %146 : vector<2x128xf32>
    %148 = arith.negf %146 : vector<2x128xf32>
    %149 = math.exp %148 : vector<2x128xf32>
    %cst_31 = arith.constant 1.000000e+00 : f32
    %150 = vector.broadcast %cst_31 : f32 to vector<2x128xf32>
    %151 = arith.addf %150, %149 : vector<2x128xf32>
    %152 = arith.divf %150, %151 : vector<2x128xf32>
    %153 = arith.select %5, %147, %152 : vector<2x128xi1>, vector<2x128xf32>
    %154 = vector.extract_strided_slice %153 {offsets = [0, 0], sizes = [2, 32], strides = [1, 1]} : vector<2x128xf32> to vector<2x32xf32>
    %155 = vector.extract_strided_slice %153 {offsets = [0, 32], sizes = [2, 32], strides = [1, 1]} : vector<2x128xf32> to vector<2x32xf32>
    %156 = vector.extract_strided_slice %153 {offsets = [0, 64], sizes = [2, 32], strides = [1, 1]} : vector<2x128xf32> to vector<2x32xf32>
    %157 = vector.extract_strided_slice %153 {offsets = [0, 96], sizes = [2, 32], strides = [1, 1]} : vector<2x128xf32> to vector<2x32xf32>
    %158 = arith.mulf %155, %139 : vector<2x32xf32>
    %159 = arith.mulf %154, %156 : vector<2x32xf32>
    %160 = arith.addf %158, %159 : vector<2x32xf32>
    %161 = math.tanh %160 : vector<2x32xf32>
    %162 = arith.mulf %157, %161 : vector<2x32xf32>
    %c12 = arith.constant 12 : index
    %c0_32 = arith.constant 0 : index
    %163 = vector.load %arg13[%c12, %c0_32] : memref<16x64xf32, #tpu.memory_space<vmem>>, vector<2x32xf32>
    tpu.vector_store %arg13[%c12, %c0_32], %162 {strides = array<i32>} : memref<16x64xf32, #tpu.memory_space<vmem>>, vector<2x32xf32>,
    %164 = vector.extract_strided_slice %14 {offsets = [14, 0], sizes = [2, 128], strides = [1, 1]} : vector<16x128xf32> to vector<2x128xf32>
    %165 = arith.truncf %162 : vector<2x32xf32> to vector<2x32xbf16>
    %cst_33 = arith.constant dense<0.000000e+00> : vector<2x128xf32>
    %166 = tpu.matmul %165, %8, %cst_33 {dimension_numbers = #tpu.dot_dimension_numbers<[1], [0], [0], [1], [0, 0, 1, 1], [], []>} : vector<2x32xbf16>, vector<32x128xbf16>, vector<2x128xf32> -> vector<2x128xf32>
    %167 = arith.addf %164, %166 : vector<2x128xf32>
    %168 = math.tanh %167 : vector<2x128xf32>
    %169 = arith.negf %167 : vector<2x128xf32>
    %170 = math.exp %169 : vector<2x128xf32>
    %cst_34 = arith.constant 1.000000e+00 : f32
    %171 = vector.broadcast %cst_34 : f32 to vector<2x128xf32>
    %172 = arith.addf %171, %170 : vector<2x128xf32>
    %173 = arith.divf %171, %172 : vector<2x128xf32>
    %174 = arith.select %5, %168, %173 : vector<2x128xi1>, vector<2x128xf32>
    %175 = vector.extract_strided_slice %174 {offsets = [0, 0], sizes = [2, 32], strides = [1, 1]} : vector<2x128xf32> to vector<2x32xf32>
    %176 = vector.extract_strided_slice %174 {offsets = [0, 32], sizes = [2, 32], strides = [1, 1]} : vector<2x128xf32> to vector<2x32xf32>
    %177 = vector.extract_strided_slice %174 {offsets = [0, 64], sizes = [2, 32], strides = [1, 1]} : vector<2x128xf32> to vector<2x32xf32>
    %178 = vector.extract_strided_slice %174 {offsets = [0, 96], sizes = [2, 32], strides = [1, 1]} : vector<2x128xf32> to vector<2x32xf32>
    %179 = arith.mulf %176, %160 : vector<2x32xf32>
    %180 = arith.mulf %175, %177 : vector<2x32xf32>
    %181 = arith.addf %179, %180 : vector<2x32xf32>
    %182 = math.tanh %181 : vector<2x32xf32>
    %183 = arith.mulf %178, %182 : vector<2x32xf32>
    %c14 = arith.constant 14 : index
    %c0_35 = arith.constant 0 : index
    %184 = vector.load %arg13[%c14, %c0_35] : memref<16x64xf32, #tpu.memory_space<vmem>>, vector<2x32xf32>
    tpu.vector_store %arg13[%c14, %c0_35], %183 {strides = array<i32>} : memref<16x64xf32, #tpu.memory_space<vmem>>, vector<2x32xf32>,
    %185 = vector.extract_strided_slice %13 {offsets = [0, 128], sizes = [16, 128], strides = [1, 1]} : vector<16x256xf32> to vector<16x128xf32>
    %cst_36 = arith.constant 0.000000e+00 : f32
    %186 = vector.broadcast %cst_36 : f32 to vector<2x32xf32>
    %cst_37 = arith.constant 0.000000e+00 : f32
    %187 = vector.broadcast %cst_37 : f32 to vector<2x32xf32>
    %188 = vector.extract_strided_slice %185 {offsets = [14, 0], sizes = [2, 128], strides = [1, 1]} : vector<16x128xf32> to vector<2x128xf32>
    %189 = arith.truncf %186 : vector<2x32xf32> to vector<2x32xbf16>
    %cst_38 = arith.constant dense<0.000000e+00> : vector<2x128xf32>
    %190 = tpu.matmul %189, %9, %cst_38 {dimension_numbers = #tpu.dot_dimension_numbers<[1], [0], [0], [1], [0, 0, 1, 1], [], []>} : vector<2x32xbf16>, vector<32x128xbf16>, vector<2x128xf32> -> vector<2x128xf32>
    %191 = arith.addf %188, %190 : vector<2x128xf32>
    %192 = math.tanh %191 : vector<2x128xf32>
    %193 = arith.negf %191 : vector<2x128xf32>
    %194 = math.exp %193 : vector<2x128xf32>
    %cst_39 = arith.constant 1.000000e+00 : f32
    %195 = vector.broadcast %cst_39 : f32 to vector<2x128xf32>
    %196 = arith.addf %195, %194 : vector<2x128xf32>
    %197 = arith.divf %195, %196 : vector<2x128xf32>
    %198 = arith.select %5, %192, %197 : vector<2x128xi1>, vector<2x128xf32>
    %199 = vector.extract_strided_slice %198 {offsets = [0, 0], sizes = [2, 32], strides = [1, 1]} : vector<2x128xf32> to vector<2x32xf32>
    %200 = vector.extract_strided_slice %198 {offsets = [0, 32], sizes = [2, 32], strides = [1, 1]} : vector<2x128xf32> to vector<2x32xf32>
    %201 = vector.extract_strided_slice %198 {offsets = [0, 64], sizes = [2, 32], strides = [1, 1]} : vector<2x128xf32> to vector<2x32xf32>
    %202 = vector.extract_strided_slice %198 {offsets = [0, 96], sizes = [2, 32], strides = [1, 1]} : vector<2x128xf32> to vector<2x32xf32>
    %203 = arith.mulf %200, %187 : vector<2x32xf32>
    %204 = arith.mulf %199, %201 : vector<2x32xf32>
    %205 = arith.addf %203, %204 : vector<2x32xf32>
    %206 = math.tanh %205 : vector<2x32xf32>
    %207 = arith.mulf %202, %206 : vector<2x32xf32>
    %c14_40 = arith.constant 14 : index
    %c32 = arith.constant 32 : index
    %208 = vector.load %arg13[%c14_40, %c32] : memref<16x64xf32, #tpu.memory_space<vmem>>, vector<2x32xf32>
    tpu.vector_store %arg13[%c14_40, %c32], %207 {strides = array<i32>} : memref<16x64xf32, #tpu.memory_space<vmem>>, vector<2x32xf32>,
    %209 = vector.extract_strided_slice %185 {offsets = [12, 0], sizes = [2, 128], strides = [1, 1]} : vector<16x128xf32> to vector<2x128xf32>
    %210 = arith.truncf %207 : vector<2x32xf32> to vector<2x32xbf16>
    %cst_41 = arith.constant dense<0.000000e+00> : vector<2x128xf32>
    %211 = tpu.matmul %210, %9, %cst_41 {dimension_numbers = #tpu.dot_dimension_numbers<[1], [0], [0], [1], [0, 0, 1, 1], [], []>} : vector<2x32xbf16>, vector<32x128xbf16>, vector<2x128xf32> -> vector<2x128xf32>
    %212 = arith.addf %209, %211 : vector<2x128xf32>
    %213 = math.tanh %212 : vector<2x128xf32>
    %214 = arith.negf %212 : vector<2x128xf32>
    %215 = math.exp %214 : vector<2x128xf32>
    %cst_42 = arith.constant 1.000000e+00 : f32
    %216 = vector.broadcast %cst_42 : f32 to vector<2x128xf32>
    %217 = arith.addf %216, %215 : vector<2x128xf32>
    %218 = arith.divf %216, %217 : vector<2x128xf32>
    %219 = arith.select %5, %213, %218 : vector<2x128xi1>, vector<2x128xf32>
    %220 = vector.extract_strided_slice %219 {offsets = [0, 0], sizes = [2, 32], strides = [1, 1]} : vector<2x128xf32> to vector<2x32xf32>
    %221 = vector.extract_strided_slice %219 {offsets = [0, 32], sizes = [2, 32], strides = [1, 1]} : vector<2x128xf32> to vector<2x32xf32>
    %222 = vector.extract_strided_slice %219 {offsets = [0, 64], sizes = [2, 32], strides = [1, 1]} : vector<2x128xf32> to vector<2x32xf32>
    %223 = vector.extract_strided_slice %219 {offsets = [0, 96], sizes = [2, 32], strides = [1, 1]} : vector<2x128xf32> to vector<2x32xf32>
    %224 = arith.mulf %221, %205 : vector<2x32xf32>
    %225 = arith.mulf %220, %222 : vector<2x32xf32>
    %226 = arith.addf %224, %225 : vector<2x32xf32>
    %227 = math.tanh %226 : vector<2x32xf32>
    %228 = arith.mulf %223, %227 : vector<2x32xf32>
    %c12_43 = arith.constant 12 : index
    %c32_44 = arith.constant 32 : index
    %229 = vector.load %arg13[%c12_43, %c32_44] : memref<16x64xf32, #tpu.memory_space<vmem>>, vector<2x32xf32>
    tpu.vector_store %arg13[%c12_43, %c32_44], %228 {strides = array<i32>} : memref<16x64xf32, #tpu.memory_space<vmem>>, vector<2x32xf32>,
    %230 = vector.extract_strided_slice %185 {offsets = [10, 0], sizes = [2, 128], strides = [1, 1]} : vector<16x128xf32> to vector<2x128xf32>
    %231 = arith.truncf %228 : vector<2x32xf32> to vector<2x32xbf16>
    %cst_45 = arith.constant dense<0.000000e+00> : vector<2x128xf32>
    %232 = tpu.matmul %231, %9, %cst_45 {dimension_numbers = #tpu.dot_dimension_numbers<[1], [0], [0], [1], [0, 0, 1, 1], [], []>} : vector<2x32xbf16>, vector<32x128xbf16>, vector<2x128xf32> -> vector<2x128xf32>
    %233 = arith.addf %230, %232 : vector<2x128xf32>
    %234 = math.tanh %233 : vector<2x128xf32>
    %235 = arith.negf %233 : vector<2x128xf32>
    %236 = math.exp %235 : vector<2x128xf32>
    %cst_46 = arith.constant 1.000000e+00 : f32
    %237 = vector.broadcast %cst_46 : f32 to vector<2x128xf32>
    %238 = arith.addf %237, %236 : vector<2x128xf32>
    %239 = arith.divf %237, %238 : vector<2x128xf32>
    %240 = arith.select %5, %234, %239 : vector<2x128xi1>, vector<2x128xf32>
    %241 = vector.extract_strided_slice %240 {offsets = [0, 0], sizes = [2, 32], strides = [1, 1]} : vector<2x128xf32> to vector<2x32xf32>
    %242 = vector.extract_strided_slice %240 {offsets = [0, 32], sizes = [2, 32], strides = [1, 1]} : vector<2x128xf32> to vector<2x32xf32>
    %243 = vector.extract_strided_slice %240 {offsets = [0, 64], sizes = [2, 32], strides = [1, 1]} : vector<2x128xf32> to vector<2x32xf32>
    %244 = vector.extract_strided_slice %240 {offsets = [0, 96], sizes = [2, 32], strides = [1, 1]} : vector<2x128xf32> to vector<2x32xf32>
    %245 = arith.mulf %242, %226 : vector<2x32xf32>
    %246 = arith.mulf %241, %243 : vector<2x32xf32>
    %247 = arith.addf %245, %246 : vector<2x32xf32>
    %248 = math.tanh %247 : vector<2x32xf32>
    %249 = arith.mulf %244, %248 : vector<2x32xf32>
    %c10_47 = arith.constant 10 : index
    %c32_48 = arith.constant 32 : index
    %250 = vector.load %arg13[%c10_47, %c32_48] : memref<16x64xf32, #tpu.memory_space<vmem>>, vector<2x32xf32>
    tpu.vector_store %arg13[%c10_47, %c32_48], %249 {strides = array<i32>} : memref<16x64xf32, #tpu.memory_space<vmem>>, vector<2x32xf32>,
    %251 = vector.extract_strided_slice %185 {offsets = [8, 0], sizes = [2, 128], strides = [1, 1]} : vector<16x128xf32> to vector<2x128xf32>
    %252 = arith.truncf %249 : vector<2x32xf32> to vector<2x32xbf16>
    %cst_49 = arith.constant dense<0.000000e+00> : vector<2x128xf32>
    %253 = tpu.matmul %252, %9, %cst_49 {dimension_numbers = #tpu.dot_dimension_numbers<[1], [0], [0], [1], [0, 0, 1, 1], [], []>} : vector<2x32xbf16>, vector<32x128xbf16>, vector<2x128xf32> -> vector<2x128xf32>
    %254 = arith.addf %251, %253 : vector<2x128xf32>
    %255 = math.tanh %254 : vector<2x128xf32>
    %256 = arith.negf %254 : vector<2x128xf32>
    %257 = math.exp %256 : vector<2x128xf32>
    %cst_50 = arith.constant 1.000000e+00 : f32
    %258 = vector.broadcast %cst_50 : f32 to vector<2x128xf32>
    %259 = arith.addf %258, %257 : vector<2x128xf32>
    %260 = arith.divf %258, %259 : vector<2x128xf32>
    %261 = arith.select %5, %255, %260 : vector<2x128xi1>, vector<2x128xf32>
    %262 = vector.extract_strided_slice %261 {offsets = [0, 0], sizes = [2, 32], strides = [1, 1]} : vector<2x128xf32> to vector<2x32xf32>
    %263 = vector.extract_strided_slice %261 {offsets = [0, 32], sizes = [2, 32], strides = [1, 1]} : vector<2x128xf32> to vector<2x32xf32>
    %264 = vector.extract_strided_slice %261 {offsets = [0, 64], sizes = [2, 32], strides = [1, 1]} : vector<2x128xf32> to vector<2x32xf32>
    %265 = vector.extract_strided_slice %261 {offsets = [0, 96], sizes = [2, 32], strides = [1, 1]} : vector<2x128xf32> to vector<2x32xf32>
    %266 = arith.mulf %263, %247 : vector<2x32xf32>
    %267 = arith.mulf %262, %264 : vector<2x32xf32>
    %268 = arith.addf %266, %267 : vector<2x32xf32>
    %269 = math.tanh %268 : vector<2x32xf32>
    %270 = arith.mulf %265, %269 : vector<2x32xf32>
    %c8_51 = arith.constant 8 : index
    %c32_52 = arith.constant 32 : index
    %271 = vector.load %arg13[%c8_51, %c32_52] : memref<16x64xf32, #tpu.memory_space<vmem>>, vector<2x32xf32>
    tpu.vector_store %arg13[%c8_51, %c32_52], %270 {strides = array<i32>} : memref<16x64xf32, #tpu.memory_space<vmem>>, vector<2x32xf32>,
    %272 = vector.extract_strided_slice %185 {offsets = [6, 0], sizes = [2, 128], strides = [1, 1]} : vector<16x128xf32> to vector<2x128xf32>
    %273 = arith.truncf %270 : vector<2x32xf32> to vector<2x32xbf16>
    %cst_53 = arith.constant dense<0.000000e+00> : vector<2x128xf32>
    %274 = tpu.matmul %273, %9, %cst_53 {dimension_numbers = #tpu.dot_dimension_numbers<[1], [0], [0], [1], [0, 0, 1, 1], [], []>} : vector<2x32xbf16>, vector<32x128xbf16>, vector<2x128xf32> -> vector<2x128xf32>
    %275 = arith.addf %272, %274 : vector<2x128xf32>
    %276 = math.tanh %275 : vector<2x128xf32>
    %277 = arith.negf %275 : vector<2x128xf32>
    %278 = math.exp %277 : vector<2x128xf32>
    %cst_54 = arith.constant 1.000000e+00 : f32
    %279 = vector.broadcast %cst_54 : f32 to vector<2x128xf32>
    %280 = arith.addf %279, %278 : vector<2x128xf32>
    %281 = arith.divf %279, %280 : vector<2x128xf32>
    %282 = arith.select %5, %276, %281 : vector<2x128xi1>, vector<2x128xf32>
    %283 = vector.extract_strided_slice %282 {offsets = [0, 0], sizes = [2, 32], strides = [1, 1]} : vector<2x128xf32> to vector<2x32xf32>
    %284 = vector.extract_strided_slice %282 {offsets = [0, 32], sizes = [2, 32], strides = [1, 1]} : vector<2x128xf32> to vector<2x32xf32>
    %285 = vector.extract_strided_slice %282 {offsets = [0, 64], sizes = [2, 32], strides = [1, 1]} : vector<2x128xf32> to vector<2x32xf32>
    %286 = vector.extract_strided_slice %282 {offsets = [0, 96], sizes = [2, 32], strides = [1, 1]} : vector<2x128xf32> to vector<2x32xf32>
    %287 = arith.mulf %284, %268 : vector<2x32xf32>
    %288 = arith.mulf %283, %285 : vector<2x32xf32>
    %289 = arith.addf %287, %288 : vector<2x32xf32>
    %290 = math.tanh %289 : vector<2x32xf32>
    %291 = arith.mulf %286, %290 : vector<2x32xf32>
    %c6_55 = arith.constant 6 : index
    %c32_56 = arith.constant 32 : index
    %292 = vector.load %arg13[%c6_55, %c32_56] : memref<16x64xf32, #tpu.memory_space<vmem>>, vector<2x32xf32>
    tpu.vector_store %arg13[%c6_55, %c32_56], %291 {strides = array<i32>} : memref<16x64xf32, #tpu.memory_space<vmem>>, vector<2x32xf32>,
    %293 = vector.extract_strided_slice %185 {offsets = [4, 0], sizes = [2, 128], strides = [1, 1]} : vector<16x128xf32> to vector<2x128xf32>
    %294 = arith.truncf %291 : vector<2x32xf32> to vector<2x32xbf16>
    %cst_57 = arith.constant dense<0.000000e+00> : vector<2x128xf32>
    %295 = tpu.matmul %294, %9, %cst_57 {dimension_numbers = #tpu.dot_dimension_numbers<[1], [0], [0], [1], [0, 0, 1, 1], [], []>} : vector<2x32xbf16>, vector<32x128xbf16>, vector<2x128xf32> -> vector<2x128xf32>
    %296 = arith.addf %293, %295 : vector<2x128xf32>
    %297 = math.tanh %296 : vector<2x128xf32>
    %298 = arith.negf %296 : vector<2x128xf32>
    %299 = math.exp %298 : vector<2x128xf32>
    %cst_58 = arith.constant 1.000000e+00 : f32
    %300 = vector.broadcast %cst_58 : f32 to vector<2x128xf32>
    %301 = arith.addf %300, %299 : vector<2x128xf32>
    %302 = arith.divf %300, %301 : vector<2x128xf32>
    %303 = arith.select %5, %297, %302 : vector<2x128xi1>, vector<2x128xf32>
    %304 = vector.extract_strided_slice %303 {offsets = [0, 0], sizes = [2, 32], strides = [1, 1]} : vector<2x128xf32> to vector<2x32xf32>
    %305 = vector.extract_strided_slice %303 {offsets = [0, 32], sizes = [2, 32], strides = [1, 1]} : vector<2x128xf32> to vector<2x32xf32>
    %306 = vector.extract_strided_slice %303 {offsets = [0, 64], sizes = [2, 32], strides = [1, 1]} : vector<2x128xf32> to vector<2x32xf32>
    %307 = vector.extract_strided_slice %303 {offsets = [0, 96], sizes = [2, 32], strides = [1, 1]} : vector<2x128xf32> to vector<2x32xf32>
    %308 = arith.mulf %305, %289 : vector<2x32xf32>
    %309 = arith.mulf %304, %306 : vector<2x32xf32>
    %310 = arith.addf %308, %309 : vector<2x32xf32>
    %311 = math.tanh %310 : vector<2x32xf32>
    %312 = arith.mulf %307, %311 : vector<2x32xf32>
    %c4_59 = arith.constant 4 : index
    %c32_60 = arith.constant 32 : index
    %313 = vector.load %arg13[%c4_59, %c32_60] : memref<16x64xf32, #tpu.memory_space<vmem>>, vector<2x32xf32>
    tpu.vector_store %arg13[%c4_59, %c32_60], %312 {strides = array<i32>} : memref<16x64xf32, #tpu.memory_space<vmem>>, vector<2x32xf32>,
    %314 = vector.extract_strided_slice %185 {offsets = [2, 0], sizes = [2, 128], strides = [1, 1]} : vector<16x128xf32> to vector<2x128xf32>
    %315 = arith.truncf %312 : vector<2x32xf32> to vector<2x32xbf16>
    %cst_61 = arith.constant dense<0.000000e+00> : vector<2x128xf32>
    %316 = tpu.matmul %315, %9, %cst_61 {dimension_numbers = #tpu.dot_dimension_numbers<[1], [0], [0], [1], [0, 0, 1, 1], [], []>} : vector<2x32xbf16>, vector<32x128xbf16>, vector<2x128xf32> -> vector<2x128xf32>
    %317 = arith.addf %314, %316 : vector<2x128xf32>
    %318 = math.tanh %317 : vector<2x128xf32>
    %319 = arith.negf %317 : vector<2x128xf32>
    %320 = math.exp %319 : vector<2x128xf32>
    %cst_62 = arith.constant 1.000000e+00 : f32
    %321 = vector.broadcast %cst_62 : f32 to vector<2x128xf32>
    %322 = arith.addf %321, %320 : vector<2x128xf32>
    %323 = arith.divf %321, %322 : vector<2x128xf32>
    %324 = arith.select %5, %318, %323 : vector<2x128xi1>, vector<2x128xf32>
    %325 = vector.extract_strided_slice %324 {offsets = [0, 0], sizes = [2, 32], strides = [1, 1]} : vector<2x128xf32> to vector<2x32xf32>
    %326 = vector.extract_strided_slice %324 {offsets = [0, 32], sizes = [2, 32], strides = [1, 1]} : vector<2x128xf32> to vector<2x32xf32>
    %327 = vector.extract_strided_slice %324 {offsets = [0, 64], sizes = [2, 32], strides = [1, 1]} : vector<2x128xf32> to vector<2x32xf32>
    %328 = vector.extract_strided_slice %324 {offsets = [0, 96], sizes = [2, 32], strides = [1, 1]} : vector<2x128xf32> to vector<2x32xf32>
    %329 = arith.mulf %326, %310 : vector<2x32xf32>
    %330 = arith.mulf %325, %327 : vector<2x32xf32>
    %331 = arith.addf %329, %330 : vector<2x32xf32>
    %332 = math.tanh %331 : vector<2x32xf32>
    %333 = arith.mulf %328, %332 : vector<2x32xf32>
    %c2_63 = arith.constant 2 : index
    %c32_64 = arith.constant 32 : index
    %334 = vector.load %arg13[%c2_63, %c32_64] : memref<16x64xf32, #tpu.memory_space<vmem>>, vector<2x32xf32>
    tpu.vector_store %arg13[%c2_63, %c32_64], %333 {strides = array<i32>} : memref<16x64xf32, #tpu.memory_space<vmem>>, vector<2x32xf32>,
    %335 = vector.extract_strided_slice %185 {offsets = [0, 0], sizes = [2, 128], strides = [1, 1]} : vector<16x128xf32> to vector<2x128xf32>
    %336 = arith.truncf %333 : vector<2x32xf32> to vector<2x32xbf16>
    %cst_65 = arith.constant dense<0.000000e+00> : vector<2x128xf32>
    %337 = tpu.matmul %336, %9, %cst_65 {dimension_numbers = #tpu.dot_dimension_numbers<[1], [0], [0], [1], [0, 0, 1, 1], [], []>} : vector<2x32xbf16>, vector<32x128xbf16>, vector<2x128xf32> -> vector<2x128xf32>
    %338 = arith.addf %335, %337 : vector<2x128xf32>
    %339 = math.tanh %338 : vector<2x128xf32>
    %340 = arith.negf %338 : vector<2x128xf32>
    %341 = math.exp %340 : vector<2x128xf32>
    %cst_66 = arith.constant 1.000000e+00 : f32
    %342 = vector.broadcast %cst_66 : f32 to vector<2x128xf32>
    %343 = arith.addf %342, %341 : vector<2x128xf32>
    %344 = arith.divf %342, %343 : vector<2x128xf32>
    %345 = arith.select %5, %339, %344 : vector<2x128xi1>, vector<2x128xf32>
    %346 = vector.extract_strided_slice %345 {offsets = [0, 0], sizes = [2, 32], strides = [1, 1]} : vector<2x128xf32> to vector<2x32xf32>
    %347 = vector.extract_strided_slice %345 {offsets = [0, 32], sizes = [2, 32], strides = [1, 1]} : vector<2x128xf32> to vector<2x32xf32>
    %348 = vector.extract_strided_slice %345 {offsets = [0, 64], sizes = [2, 32], strides = [1, 1]} : vector<2x128xf32> to vector<2x32xf32>
    %349 = vector.extract_strided_slice %345 {offsets = [0, 96], sizes = [2, 32], strides = [1, 1]} : vector<2x128xf32> to vector<2x32xf32>
    %350 = arith.mulf %347, %331 : vector<2x32xf32>
    %351 = arith.mulf %346, %348 : vector<2x32xf32>
    %352 = arith.addf %350, %351 : vector<2x32xf32>
    %353 = math.tanh %352 : vector<2x32xf32>
    %354 = arith.mulf %349, %353 : vector<2x32xf32>
    %c0_67 = arith.constant 0 : index
    %c32_68 = arith.constant 32 : index
    %355 = vector.load %arg13[%c0_67, %c32_68] : memref<16x64xf32, #tpu.memory_space<vmem>>, vector<2x32xf32>
    tpu.vector_store %arg13[%c0_67, %c32_68], %354 {strides = array<i32>} : memref<16x64xf32, #tpu.memory_space<vmem>>, vector<2x32xf32>,
    %c0_69 = arith.constant 0 : index
    %c0_70 = arith.constant 0 : index
    %356 = vector.load %arg13[%c0_69, %c0_70] : memref<16x64xf32, #tpu.memory_space<vmem>>, vector<16x64xf32>
    %357 = arith.truncf %356 : vector<16x64xf32> to vector<16x64xbf16>
    %c0_71 = arith.constant 0 : index
    %c0_72 = arith.constant 0 : index
    %358 = vector.load %arg6[%c0_71, %c0_72] : memref<64x256xbf16, #tpu.memory_space<vmem>>, vector<64x256xbf16>
    %c0_73 = arith.constant 0 : index
    %c0_74 = arith.constant 0 : index
    %359 = vector.load %arg7[%c0_73, %c0_74] : memref<32x128xbf16, #tpu.memory_space<vmem>>, vector<32x128xbf16>
    %c0_75 = arith.constant 0 : index
    %c0_76 = arith.constant 0 : index
    %360 = vector.load %arg8[%c0_75, %c0_76] : memref<32x128xbf16, #tpu.memory_space<vmem>>, vector<32x128xbf16>
    %c0_77 = arith.constant 0 : index
    %c0_78 = arith.constant 0 : index
    %361 = vector.load %arg9[%c0_77, %c0_78] : memref<1x256xf32, #tpu.memory_space<vmem>>, vector<1x256xf32>
    %cst_79 = arith.constant dense<0.000000e+00> : vector<16x256xf32>
    %362 = tpu.matmul %357, %358, %cst_79 {dimension_numbers = #tpu.dot_dimension_numbers<[1], [0], [0], [1], [0, 0, 1, 1], [], []>} : vector<16x64xbf16>, vector<64x256xbf16>, vector<16x256xf32> -> vector<16x256xf32>
    %363 = vector.broadcast %361 : vector<1x256xf32> to vector<16x256xf32>
    %364 = arith.addf %362, %363 : vector<16x256xf32>
    %365 = vector.extract_strided_slice %364 {offsets = [0, 0], sizes = [16, 128], strides = [1, 1]} : vector<16x256xf32> to vector<16x128xf32>
    %cst_80 = arith.constant 0.000000e+00 : f32
    %366 = vector.broadcast %cst_80 : f32 to vector<2x32xf32>
    %cst_81 = arith.constant 0.000000e+00 : f32
    %367 = vector.broadcast %cst_81 : f32 to vector<2x32xf32>
    %368 = vector.extract_strided_slice %365 {offsets = [0, 0], sizes = [2, 128], strides = [1, 1]} : vector<16x128xf32> to vector<2x128xf32>
    %369 = arith.truncf %366 : vector<2x32xf32> to vector<2x32xbf16>
    %cst_82 = arith.constant dense<0.000000e+00> : vector<2x128xf32>
    %370 = tpu.matmul %369, %359, %cst_82 {dimension_numbers = #tpu.dot_dimension_numbers<[1], [0], [0], [1], [0, 0, 1, 1], [], []>} : vector<2x32xbf16>, vector<32x128xbf16>, vector<2x128xf32> -> vector<2x128xf32>
    %371 = arith.addf %368, %370 : vector<2x128xf32>
    %372 = math.tanh %371 : vector<2x128xf32>
    %373 = arith.negf %371 : vector<2x128xf32>
    %374 = math.exp %373 : vector<2x128xf32>
    %cst_83 = arith.constant 1.000000e+00 : f32
    %375 = vector.broadcast %cst_83 : f32 to vector<2x128xf32>
    %376 = arith.addf %375, %374 : vector<2x128xf32>
    %377 = arith.divf %375, %376 : vector<2x128xf32>
    %378 = arith.select %5, %372, %377 : vector<2x128xi1>, vector<2x128xf32>
    %379 = vector.extract_strided_slice %378 {offsets = [0, 0], sizes = [2, 32], strides = [1, 1]} : vector<2x128xf32> to vector<2x32xf32>
    %380 = vector.extract_strided_slice %378 {offsets = [0, 32], sizes = [2, 32], strides = [1, 1]} : vector<2x128xf32> to vector<2x32xf32>
    %381 = vector.extract_strided_slice %378 {offsets = [0, 64], sizes = [2, 32], strides = [1, 1]} : vector<2x128xf32> to vector<2x32xf32>
    %382 = vector.extract_strided_slice %378 {offsets = [0, 96], sizes = [2, 32], strides = [1, 1]} : vector<2x128xf32> to vector<2x32xf32>
    %383 = arith.mulf %380, %367 : vector<2x32xf32>
    %384 = arith.mulf %379, %381 : vector<2x32xf32>
    %385 = arith.addf %383, %384 : vector<2x32xf32>
    %386 = math.tanh %385 : vector<2x32xf32>
    %387 = arith.mulf %382, %386 : vector<2x32xf32>
    %388 = vector.extract_strided_slice %365 {offsets = [2, 0], sizes = [2, 128], strides = [1, 1]} : vector<16x128xf32> to vector<2x128xf32>
    %389 = arith.truncf %387 : vector<2x32xf32> to vector<2x32xbf16>
    %cst_84 = arith.constant dense<0.000000e+00> : vector<2x128xf32>
    %390 = tpu.matmul %389, %359, %cst_84 {dimension_numbers = #tpu.dot_dimension_numbers<[1], [0], [0], [1], [0, 0, 1, 1], [], []>} : vector<2x32xbf16>, vector<32x128xbf16>, vector<2x128xf32> -> vector<2x128xf32>
    %391 = arith.addf %388, %390 : vector<2x128xf32>
    %392 = math.tanh %391 : vector<2x128xf32>
    %393 = arith.negf %391 : vector<2x128xf32>
    %394 = math.exp %393 : vector<2x128xf32>
    %cst_85 = arith.constant 1.000000e+00 : f32
    %395 = vector.broadcast %cst_85 : f32 to vector<2x128xf32>
    %396 = arith.addf %395, %394 : vector<2x128xf32>
    %397 = arith.divf %395, %396 : vector<2x128xf32>
    %398 = arith.select %5, %392, %397 : vector<2x128xi1>, vector<2x128xf32>
    %399 = vector.extract_strided_slice %398 {offsets = [0, 0], sizes = [2, 32], strides = [1, 1]} : vector<2x128xf32> to vector<2x32xf32>
    %400 = vector.extract_strided_slice %398 {offsets = [0, 32], sizes = [2, 32], strides = [1, 1]} : vector<2x128xf32> to vector<2x32xf32>
    %401 = vector.extract_strided_slice %398 {offsets = [0, 64], sizes = [2, 32], strides = [1, 1]} : vector<2x128xf32> to vector<2x32xf32>
    %402 = vector.extract_strided_slice %398 {offsets = [0, 96], sizes = [2, 32], strides = [1, 1]} : vector<2x128xf32> to vector<2x32xf32>
    %403 = arith.mulf %400, %385 : vector<2x32xf32>
    %404 = arith.mulf %399, %401 : vector<2x32xf32>
    %405 = arith.addf %403, %404 : vector<2x32xf32>
    %406 = math.tanh %405 : vector<2x32xf32>
    %407 = arith.mulf %402, %406 : vector<2x32xf32>
    %408 = vector.extract_strided_slice %365 {offsets = [4, 0], sizes = [2, 128], strides = [1, 1]} : vector<16x128xf32> to vector<2x128xf32>
    %409 = arith.truncf %407 : vector<2x32xf32> to vector<2x32xbf16>
    %cst_86 = arith.constant dense<0.000000e+00> : vector<2x128xf32>
    %410 = tpu.matmul %409, %359, %cst_86 {dimension_numbers = #tpu.dot_dimension_numbers<[1], [0], [0], [1], [0, 0, 1, 1], [], []>} : vector<2x32xbf16>, vector<32x128xbf16>, vector<2x128xf32> -> vector<2x128xf32>
    %411 = arith.addf %408, %410 : vector<2x128xf32>
    %412 = math.tanh %411 : vector<2x128xf32>
    %413 = arith.negf %411 : vector<2x128xf32>
    %414 = math.exp %413 : vector<2x128xf32>
    %cst_87 = arith.constant 1.000000e+00 : f32
    %415 = vector.broadcast %cst_87 : f32 to vector<2x128xf32>
    %416 = arith.addf %415, %414 : vector<2x128xf32>
    %417 = arith.divf %415, %416 : vector<2x128xf32>
    %418 = arith.select %5, %412, %417 : vector<2x128xi1>, vector<2x128xf32>
    %419 = vector.extract_strided_slice %418 {offsets = [0, 0], sizes = [2, 32], strides = [1, 1]} : vector<2x128xf32> to vector<2x32xf32>
    %420 = vector.extract_strided_slice %418 {offsets = [0, 32], sizes = [2, 32], strides = [1, 1]} : vector<2x128xf32> to vector<2x32xf32>
    %421 = vector.extract_strided_slice %418 {offsets = [0, 64], sizes = [2, 32], strides = [1, 1]} : vector<2x128xf32> to vector<2x32xf32>
    %422 = vector.extract_strided_slice %418 {offsets = [0, 96], sizes = [2, 32], strides = [1, 1]} : vector<2x128xf32> to vector<2x32xf32>
    %423 = arith.mulf %420, %405 : vector<2x32xf32>
    %424 = arith.mulf %419, %421 : vector<2x32xf32>
    %425 = arith.addf %423, %424 : vector<2x32xf32>
    %426 = math.tanh %425 : vector<2x32xf32>
    %427 = arith.mulf %422, %426 : vector<2x32xf32>
    %428 = vector.extract_strided_slice %365 {offsets = [6, 0], sizes = [2, 128], strides = [1, 1]} : vector<16x128xf32> to vector<2x128xf32>
    %429 = arith.truncf %427 : vector<2x32xf32> to vector<2x32xbf16>
    %cst_88 = arith.constant dense<0.000000e+00> : vector<2x128xf32>
    %430 = tpu.matmul %429, %359, %cst_88 {dimension_numbers = #tpu.dot_dimension_numbers<[1], [0], [0], [1], [0, 0, 1, 1], [], []>} : vector<2x32xbf16>, vector<32x128xbf16>, vector<2x128xf32> -> vector<2x128xf32>
    %431 = arith.addf %428, %430 : vector<2x128xf32>
    %432 = math.tanh %431 : vector<2x128xf32>
    %433 = arith.negf %431 : vector<2x128xf32>
    %434 = math.exp %433 : vector<2x128xf32>
    %cst_89 = arith.constant 1.000000e+00 : f32
    %435 = vector.broadcast %cst_89 : f32 to vector<2x128xf32>
    %436 = arith.addf %435, %434 : vector<2x128xf32>
    %437 = arith.divf %435, %436 : vector<2x128xf32>
    %438 = arith.select %5, %432, %437 : vector<2x128xi1>, vector<2x128xf32>
    %439 = vector.extract_strided_slice %438 {offsets = [0, 0], sizes = [2, 32], strides = [1, 1]} : vector<2x128xf32> to vector<2x32xf32>
    %440 = vector.extract_strided_slice %438 {offsets = [0, 32], sizes = [2, 32], strides = [1, 1]} : vector<2x128xf32> to vector<2x32xf32>
    %441 = vector.extract_strided_slice %438 {offsets = [0, 64], sizes = [2, 32], strides = [1, 1]} : vector<2x128xf32> to vector<2x32xf32>
    %442 = vector.extract_strided_slice %438 {offsets = [0, 96], sizes = [2, 32], strides = [1, 1]} : vector<2x128xf32> to vector<2x32xf32>
    %443 = arith.mulf %440, %425 : vector<2x32xf32>
    %444 = arith.mulf %439, %441 : vector<2x32xf32>
    %445 = arith.addf %443, %444 : vector<2x32xf32>
    %446 = math.tanh %445 : vector<2x32xf32>
    %447 = arith.mulf %442, %446 : vector<2x32xf32>
    %448 = vector.extract_strided_slice %365 {offsets = [8, 0], sizes = [2, 128], strides = [1, 1]} : vector<16x128xf32> to vector<2x128xf32>
    %449 = arith.truncf %447 : vector<2x32xf32> to vector<2x32xbf16>
    %cst_90 = arith.constant dense<0.000000e+00> : vector<2x128xf32>
    %450 = tpu.matmul %449, %359, %cst_90 {dimension_numbers = #tpu.dot_dimension_numbers<[1], [0], [0], [1], [0, 0, 1, 1], [], []>} : vector<2x32xbf16>, vector<32x128xbf16>, vector<2x128xf32> -> vector<2x128xf32>
    %451 = arith.addf %448, %450 : vector<2x128xf32>
    %452 = math.tanh %451 : vector<2x128xf32>
    %453 = arith.negf %451 : vector<2x128xf32>
    %454 = math.exp %453 : vector<2x128xf32>
    %cst_91 = arith.constant 1.000000e+00 : f32
    %455 = vector.broadcast %cst_91 : f32 to vector<2x128xf32>
    %456 = arith.addf %455, %454 : vector<2x128xf32>
    %457 = arith.divf %455, %456 : vector<2x128xf32>
    %458 = arith.select %5, %452, %457 : vector<2x128xi1>, vector<2x128xf32>
    %459 = vector.extract_strided_slice %458 {offsets = [0, 0], sizes = [2, 32], strides = [1, 1]} : vector<2x128xf32> to vector<2x32xf32>
    %460 = vector.extract_strided_slice %458 {offsets = [0, 32], sizes = [2, 32], strides = [1, 1]} : vector<2x128xf32> to vector<2x32xf32>
    %461 = vector.extract_strided_slice %458 {offsets = [0, 64], sizes = [2, 32], strides = [1, 1]} : vector<2x128xf32> to vector<2x32xf32>
    %462 = vector.extract_strided_slice %458 {offsets = [0, 96], sizes = [2, 32], strides = [1, 1]} : vector<2x128xf32> to vector<2x32xf32>
    %463 = arith.mulf %460, %445 : vector<2x32xf32>
    %464 = arith.mulf %459, %461 : vector<2x32xf32>
    %465 = arith.addf %463, %464 : vector<2x32xf32>
    %466 = math.tanh %465 : vector<2x32xf32>
    %467 = arith.mulf %462, %466 : vector<2x32xf32>
    %468 = vector.extract_strided_slice %365 {offsets = [10, 0], sizes = [2, 128], strides = [1, 1]} : vector<16x128xf32> to vector<2x128xf32>
    %469 = arith.truncf %467 : vector<2x32xf32> to vector<2x32xbf16>
    %cst_92 = arith.constant dense<0.000000e+00> : vector<2x128xf32>
    %470 = tpu.matmul %469, %359, %cst_92 {dimension_numbers = #tpu.dot_dimension_numbers<[1], [0], [0], [1], [0, 0, 1, 1], [], []>} : vector<2x32xbf16>, vector<32x128xbf16>, vector<2x128xf32> -> vector<2x128xf32>
    %471 = arith.addf %468, %470 : vector<2x128xf32>
    %472 = math.tanh %471 : vector<2x128xf32>
    %473 = arith.negf %471 : vector<2x128xf32>
    %474 = math.exp %473 : vector<2x128xf32>
    %cst_93 = arith.constant 1.000000e+00 : f32
    %475 = vector.broadcast %cst_93 : f32 to vector<2x128xf32>
    %476 = arith.addf %475, %474 : vector<2x128xf32>
    %477 = arith.divf %475, %476 : vector<2x128xf32>
    %478 = arith.select %5, %472, %477 : vector<2x128xi1>, vector<2x128xf32>
    %479 = vector.extract_strided_slice %478 {offsets = [0, 0], sizes = [2, 32], strides = [1, 1]} : vector<2x128xf32> to vector<2x32xf32>
    %480 = vector.extract_strided_slice %478 {offsets = [0, 32], sizes = [2, 32], strides = [1, 1]} : vector<2x128xf32> to vector<2x32xf32>
    %481 = vector.extract_strided_slice %478 {offsets = [0, 64], sizes = [2, 32], strides = [1, 1]} : vector<2x128xf32> to vector<2x32xf32>
    %482 = vector.extract_strided_slice %478 {offsets = [0, 96], sizes = [2, 32], strides = [1, 1]} : vector<2x128xf32> to vector<2x32xf32>
    %483 = arith.mulf %480, %465 : vector<2x32xf32>
    %484 = arith.mulf %479, %481 : vector<2x32xf32>
    %485 = arith.addf %483, %484 : vector<2x32xf32>
    %486 = math.tanh %485 : vector<2x32xf32>
    %487 = arith.mulf %482, %486 : vector<2x32xf32>
    %488 = vector.extract_strided_slice %365 {offsets = [12, 0], sizes = [2, 128], strides = [1, 1]} : vector<16x128xf32> to vector<2x128xf32>
    %489 = arith.truncf %487 : vector<2x32xf32> to vector<2x32xbf16>
    %cst_94 = arith.constant dense<0.000000e+00> : vector<2x128xf32>
    %490 = tpu.matmul %489, %359, %cst_94 {dimension_numbers = #tpu.dot_dimension_numbers<[1], [0], [0], [1], [0, 0, 1, 1], [], []>} : vector<2x32xbf16>, vector<32x128xbf16>, vector<2x128xf32> -> vector<2x128xf32>
    %491 = arith.addf %488, %490 : vector<2x128xf32>
    %492 = math.tanh %491 : vector<2x128xf32>
    %493 = arith.negf %491 : vector<2x128xf32>
    %494 = math.exp %493 : vector<2x128xf32>
    %cst_95 = arith.constant 1.000000e+00 : f32
    %495 = vector.broadcast %cst_95 : f32 to vector<2x128xf32>
    %496 = arith.addf %495, %494 : vector<2x128xf32>
    %497 = arith.divf %495, %496 : vector<2x128xf32>
    %498 = arith.select %5, %492, %497 : vector<2x128xi1>, vector<2x128xf32>
    %499 = vector.extract_strided_slice %498 {offsets = [0, 0], sizes = [2, 32], strides = [1, 1]} : vector<2x128xf32> to vector<2x32xf32>
    %500 = vector.extract_strided_slice %498 {offsets = [0, 32], sizes = [2, 32], strides = [1, 1]} : vector<2x128xf32> to vector<2x32xf32>
    %501 = vector.extract_strided_slice %498 {offsets = [0, 64], sizes = [2, 32], strides = [1, 1]} : vector<2x128xf32> to vector<2x32xf32>
    %502 = vector.extract_strided_slice %498 {offsets = [0, 96], sizes = [2, 32], strides = [1, 1]} : vector<2x128xf32> to vector<2x32xf32>
    %503 = arith.mulf %500, %485 : vector<2x32xf32>
    %504 = arith.mulf %499, %501 : vector<2x32xf32>
    %505 = arith.addf %503, %504 : vector<2x32xf32>
    %506 = math.tanh %505 : vector<2x32xf32>
    %507 = arith.mulf %502, %506 : vector<2x32xf32>
    %508 = vector.extract_strided_slice %365 {offsets = [14, 0], sizes = [2, 128], strides = [1, 1]} : vector<16x128xf32> to vector<2x128xf32>
    %509 = arith.truncf %507 : vector<2x32xf32> to vector<2x32xbf16>
    %cst_96 = arith.constant dense<0.000000e+00> : vector<2x128xf32>
    %510 = tpu.matmul %509, %359, %cst_96 {dimension_numbers = #tpu.dot_dimension_numbers<[1], [0], [0], [1], [0, 0, 1, 1], [], []>} : vector<2x32xbf16>, vector<32x128xbf16>, vector<2x128xf32> -> vector<2x128xf32>
    %511 = arith.addf %508, %510 : vector<2x128xf32>
    %512 = math.tanh %511 : vector<2x128xf32>
    %513 = arith.negf %511 : vector<2x128xf32>
    %514 = math.exp %513 : vector<2x128xf32>
    %cst_97 = arith.constant 1.000000e+00 : f32
    %515 = vector.broadcast %cst_97 : f32 to vector<2x128xf32>
    %516 = arith.addf %515, %514 : vector<2x128xf32>
    %517 = arith.divf %515, %516 : vector<2x128xf32>
    %518 = arith.select %5, %512, %517 : vector<2x128xi1>, vector<2x128xf32>
    %519 = vector.extract_strided_slice %518 {offsets = [0, 0], sizes = [2, 32], strides = [1, 1]} : vector<2x128xf32> to vector<2x32xf32>
    %520 = vector.extract_strided_slice %518 {offsets = [0, 32], sizes = [2, 32], strides = [1, 1]} : vector<2x128xf32> to vector<2x32xf32>
    %521 = vector.extract_strided_slice %518 {offsets = [0, 64], sizes = [2, 32], strides = [1, 1]} : vector<2x128xf32> to vector<2x32xf32>
    %522 = vector.extract_strided_slice %518 {offsets = [0, 96], sizes = [2, 32], strides = [1, 1]} : vector<2x128xf32> to vector<2x32xf32>
    %523 = arith.mulf %520, %505 : vector<2x32xf32>
    %524 = arith.mulf %519, %521 : vector<2x32xf32>
    %525 = arith.addf %523, %524 : vector<2x32xf32>
    %526 = math.tanh %525 : vector<2x32xf32>
    %527 = arith.mulf %522, %526 : vector<2x32xf32>
    %528 = vector.extract_strided_slice %364 {offsets = [0, 128], sizes = [16, 128], strides = [1, 1]} : vector<16x256xf32> to vector<16x128xf32>
    %cst_98 = arith.constant 0.000000e+00 : f32
    %529 = vector.broadcast %cst_98 : f32 to vector<2x32xf32>
    %cst_99 = arith.constant 0.000000e+00 : f32
    %530 = vector.broadcast %cst_99 : f32 to vector<2x32xf32>
    %531 = vector.extract_strided_slice %528 {offsets = [14, 0], sizes = [2, 128], strides = [1, 1]} : vector<16x128xf32> to vector<2x128xf32>
    %532 = arith.truncf %529 : vector<2x32xf32> to vector<2x32xbf16>
    %cst_100 = arith.constant dense<0.000000e+00> : vector<2x128xf32>
    %533 = tpu.matmul %532, %360, %cst_100 {dimension_numbers = #tpu.dot_dimension_numbers<[1], [0], [0], [1], [0, 0, 1, 1], [], []>} : vector<2x32xbf16>, vector<32x128xbf16>, vector<2x128xf32> -> vector<2x128xf32>
    %534 = arith.addf %531, %533 : vector<2x128xf32>
    %535 = math.tanh %534 : vector<2x128xf32>
    %536 = arith.negf %534 : vector<2x128xf32>
    %537 = math.exp %536 : vector<2x128xf32>
    %cst_101 = arith.constant 1.000000e+00 : f32
    %538 = vector.broadcast %cst_101 : f32 to vector<2x128xf32>
    %539 = arith.addf %538, %537 : vector<2x128xf32>
    %540 = arith.divf %538, %539 : vector<2x128xf32>
    %541 = arith.select %5, %535, %540 : vector<2x128xi1>, vector<2x128xf32>
    %542 = vector.extract_strided_slice %541 {offsets = [0, 0], sizes = [2, 32], strides = [1, 1]} : vector<2x128xf32> to vector<2x32xf32>
    %543 = vector.extract_strided_slice %541 {offsets = [0, 32], sizes = [2, 32], strides = [1, 1]} : vector<2x128xf32> to vector<2x32xf32>
    %544 = vector.extract_strided_slice %541 {offsets = [0, 64], sizes = [2, 32], strides = [1, 1]} : vector<2x128xf32> to vector<2x32xf32>
    %545 = vector.extract_strided_slice %541 {offsets = [0, 96], sizes = [2, 32], strides = [1, 1]} : vector<2x128xf32> to vector<2x32xf32>
    %546 = arith.mulf %543, %530 : vector<2x32xf32>
    %547 = arith.mulf %542, %544 : vector<2x32xf32>
    %548 = arith.addf %546, %547 : vector<2x32xf32>
    %549 = math.tanh %548 : vector<2x32xf32>
    %550 = arith.mulf %545, %549 : vector<2x32xf32>
    %551 = vector.extract_strided_slice %528 {offsets = [12, 0], sizes = [2, 128], strides = [1, 1]} : vector<16x128xf32> to vector<2x128xf32>
    %552 = arith.truncf %550 : vector<2x32xf32> to vector<2x32xbf16>
    %cst_102 = arith.constant dense<0.000000e+00> : vector<2x128xf32>
    %553 = tpu.matmul %552, %360, %cst_102 {dimension_numbers = #tpu.dot_dimension_numbers<[1], [0], [0], [1], [0, 0, 1, 1], [], []>} : vector<2x32xbf16>, vector<32x128xbf16>, vector<2x128xf32> -> vector<2x128xf32>
    %554 = arith.addf %551, %553 : vector<2x128xf32>
    %555 = math.tanh %554 : vector<2x128xf32>
    %556 = arith.negf %554 : vector<2x128xf32>
    %557 = math.exp %556 : vector<2x128xf32>
    %cst_103 = arith.constant 1.000000e+00 : f32
    %558 = vector.broadcast %cst_103 : f32 to vector<2x128xf32>
    %559 = arith.addf %558, %557 : vector<2x128xf32>
    %560 = arith.divf %558, %559 : vector<2x128xf32>
    %561 = arith.select %5, %555, %560 : vector<2x128xi1>, vector<2x128xf32>
    %562 = vector.extract_strided_slice %561 {offsets = [0, 0], sizes = [2, 32], strides = [1, 1]} : vector<2x128xf32> to vector<2x32xf32>
    %563 = vector.extract_strided_slice %561 {offsets = [0, 32], sizes = [2, 32], strides = [1, 1]} : vector<2x128xf32> to vector<2x32xf32>
    %564 = vector.extract_strided_slice %561 {offsets = [0, 64], sizes = [2, 32], strides = [1, 1]} : vector<2x128xf32> to vector<2x32xf32>
    %565 = vector.extract_strided_slice %561 {offsets = [0, 96], sizes = [2, 32], strides = [1, 1]} : vector<2x128xf32> to vector<2x32xf32>
    %566 = arith.mulf %563, %548 : vector<2x32xf32>
    %567 = arith.mulf %562, %564 : vector<2x32xf32>
    %568 = arith.addf %566, %567 : vector<2x32xf32>
    %569 = math.tanh %568 : vector<2x32xf32>
    %570 = arith.mulf %565, %569 : vector<2x32xf32>
    %571 = vector.extract_strided_slice %528 {offsets = [10, 0], sizes = [2, 128], strides = [1, 1]} : vector<16x128xf32> to vector<2x128xf32>
    %572 = arith.truncf %570 : vector<2x32xf32> to vector<2x32xbf16>
    %cst_104 = arith.constant dense<0.000000e+00> : vector<2x128xf32>
    %573 = tpu.matmul %572, %360, %cst_104 {dimension_numbers = #tpu.dot_dimension_numbers<[1], [0], [0], [1], [0, 0, 1, 1], [], []>} : vector<2x32xbf16>, vector<32x128xbf16>, vector<2x128xf32> -> vector<2x128xf32>
    %574 = arith.addf %571, %573 : vector<2x128xf32>
    %575 = math.tanh %574 : vector<2x128xf32>
    %576 = arith.negf %574 : vector<2x128xf32>
    %577 = math.exp %576 : vector<2x128xf32>
    %cst_105 = arith.constant 1.000000e+00 : f32
    %578 = vector.broadcast %cst_105 : f32 to vector<2x128xf32>
    %579 = arith.addf %578, %577 : vector<2x128xf32>
    %580 = arith.divf %578, %579 : vector<2x128xf32>
    %581 = arith.select %5, %575, %580 : vector<2x128xi1>, vector<2x128xf32>
    %582 = vector.extract_strided_slice %581 {offsets = [0, 0], sizes = [2, 32], strides = [1, 1]} : vector<2x128xf32> to vector<2x32xf32>
    %583 = vector.extract_strided_slice %581 {offsets = [0, 32], sizes = [2, 32], strides = [1, 1]} : vector<2x128xf32> to vector<2x32xf32>
    %584 = vector.extract_strided_slice %581 {offsets = [0, 64], sizes = [2, 32], strides = [1, 1]} : vector<2x128xf32> to vector<2x32xf32>
    %585 = vector.extract_strided_slice %581 {offsets = [0, 96], sizes = [2, 32], strides = [1, 1]} : vector<2x128xf32> to vector<2x32xf32>
    %586 = arith.mulf %583, %568 : vector<2x32xf32>
    %587 = arith.mulf %582, %584 : vector<2x32xf32>
    %588 = arith.addf %586, %587 : vector<2x32xf32>
    %589 = math.tanh %588 : vector<2x32xf32>
    %590 = arith.mulf %585, %589 : vector<2x32xf32>
    %591 = vector.extract_strided_slice %528 {offsets = [8, 0], sizes = [2, 128], strides = [1, 1]} : vector<16x128xf32> to vector<2x128xf32>
    %592 = arith.truncf %590 : vector<2x32xf32> to vector<2x32xbf16>
    %cst_106 = arith.constant dense<0.000000e+00> : vector<2x128xf32>
    %593 = tpu.matmul %592, %360, %cst_106 {dimension_numbers = #tpu.dot_dimension_numbers<[1], [0], [0], [1], [0, 0, 1, 1], [], []>} : vector<2x32xbf16>, vector<32x128xbf16>, vector<2x128xf32> -> vector<2x128xf32>
    %594 = arith.addf %591, %593 : vector<2x128xf32>
    %595 = math.tanh %594 : vector<2x128xf32>
    %596 = arith.negf %594 : vector<2x128xf32>
    %597 = math.exp %596 : vector<2x128xf32>
    %cst_107 = arith.constant 1.000000e+00 : f32
    %598 = vector.broadcast %cst_107 : f32 to vector<2x128xf32>
    %599 = arith.addf %598, %597 : vector<2x128xf32>
    %600 = arith.divf %598, %599 : vector<2x128xf32>
    %601 = arith.select %5, %595, %600 : vector<2x128xi1>, vector<2x128xf32>
    %602 = vector.extract_strided_slice %601 {offsets = [0, 0], sizes = [2, 32], strides = [1, 1]} : vector<2x128xf32> to vector<2x32xf32>
    %603 = vector.extract_strided_slice %601 {offsets = [0, 32], sizes = [2, 32], strides = [1, 1]} : vector<2x128xf32> to vector<2x32xf32>
    %604 = vector.extract_strided_slice %601 {offsets = [0, 64], sizes = [2, 32], strides = [1, 1]} : vector<2x128xf32> to vector<2x32xf32>
    %605 = vector.extract_strided_slice %601 {offsets = [0, 96], sizes = [2, 32], strides = [1, 1]} : vector<2x128xf32> to vector<2x32xf32>
    %606 = arith.mulf %603, %588 : vector<2x32xf32>
    %607 = arith.mulf %602, %604 : vector<2x32xf32>
    %608 = arith.addf %606, %607 : vector<2x32xf32>
    %609 = math.tanh %608 : vector<2x32xf32>
    %610 = arith.mulf %605, %609 : vector<2x32xf32>
    %611 = vector.extract_strided_slice %528 {offsets = [6, 0], sizes = [2, 128], strides = [1, 1]} : vector<16x128xf32> to vector<2x128xf32>
    %612 = arith.truncf %610 : vector<2x32xf32> to vector<2x32xbf16>
    %cst_108 = arith.constant dense<0.000000e+00> : vector<2x128xf32>
    %613 = tpu.matmul %612, %360, %cst_108 {dimension_numbers = #tpu.dot_dimension_numbers<[1], [0], [0], [1], [0, 0, 1, 1], [], []>} : vector<2x32xbf16>, vector<32x128xbf16>, vector<2x128xf32> -> vector<2x128xf32>
    %614 = arith.addf %611, %613 : vector<2x128xf32>
    %615 = math.tanh %614 : vector<2x128xf32>
    %616 = arith.negf %614 : vector<2x128xf32>
    %617 = math.exp %616 : vector<2x128xf32>
    %cst_109 = arith.constant 1.000000e+00 : f32
    %618 = vector.broadcast %cst_109 : f32 to vector<2x128xf32>
    %619 = arith.addf %618, %617 : vector<2x128xf32>
    %620 = arith.divf %618, %619 : vector<2x128xf32>
    %621 = arith.select %5, %615, %620 : vector<2x128xi1>, vector<2x128xf32>
    %622 = vector.extract_strided_slice %621 {offsets = [0, 0], sizes = [2, 32], strides = [1, 1]} : vector<2x128xf32> to vector<2x32xf32>
    %623 = vector.extract_strided_slice %621 {offsets = [0, 32], sizes = [2, 32], strides = [1, 1]} : vector<2x128xf32> to vector<2x32xf32>
    %624 = vector.extract_strided_slice %621 {offsets = [0, 64], sizes = [2, 32], strides = [1, 1]} : vector<2x128xf32> to vector<2x32xf32>
    %625 = vector.extract_strided_slice %621 {offsets = [0, 96], sizes = [2, 32], strides = [1, 1]} : vector<2x128xf32> to vector<2x32xf32>
    %626 = arith.mulf %623, %608 : vector<2x32xf32>
    %627 = arith.mulf %622, %624 : vector<2x32xf32>
    %628 = arith.addf %626, %627 : vector<2x32xf32>
    %629 = math.tanh %628 : vector<2x32xf32>
    %630 = arith.mulf %625, %629 : vector<2x32xf32>
    %631 = vector.extract_strided_slice %528 {offsets = [4, 0], sizes = [2, 128], strides = [1, 1]} : vector<16x128xf32> to vector<2x128xf32>
    %632 = arith.truncf %630 : vector<2x32xf32> to vector<2x32xbf16>
    %cst_110 = arith.constant dense<0.000000e+00> : vector<2x128xf32>
    %633 = tpu.matmul %632, %360, %cst_110 {dimension_numbers = #tpu.dot_dimension_numbers<[1], [0], [0], [1], [0, 0, 1, 1], [], []>} : vector<2x32xbf16>, vector<32x128xbf16>, vector<2x128xf32> -> vector<2x128xf32>
    %634 = arith.addf %631, %633 : vector<2x128xf32>
    %635 = math.tanh %634 : vector<2x128xf32>
    %636 = arith.negf %634 : vector<2x128xf32>
    %637 = math.exp %636 : vector<2x128xf32>
    %cst_111 = arith.constant 1.000000e+00 : f32
    %638 = vector.broadcast %cst_111 : f32 to vector<2x128xf32>
    %639 = arith.addf %638, %637 : vector<2x128xf32>
    %640 = arith.divf %638, %639 : vector<2x128xf32>
    %641 = arith.select %5, %635, %640 : vector<2x128xi1>, vector<2x128xf32>
    %642 = vector.extract_strided_slice %641 {offsets = [0, 0], sizes = [2, 32], strides = [1, 1]} : vector<2x128xf32> to vector<2x32xf32>
    %643 = vector.extract_strided_slice %641 {offsets = [0, 32], sizes = [2, 32], strides = [1, 1]} : vector<2x128xf32> to vector<2x32xf32>
    %644 = vector.extract_strided_slice %641 {offsets = [0, 64], sizes = [2, 32], strides = [1, 1]} : vector<2x128xf32> to vector<2x32xf32>
    %645 = vector.extract_strided_slice %641 {offsets = [0, 96], sizes = [2, 32], strides = [1, 1]} : vector<2x128xf32> to vector<2x32xf32>
    %646 = arith.mulf %643, %628 : vector<2x32xf32>
    %647 = arith.mulf %642, %644 : vector<2x32xf32>
    %648 = arith.addf %646, %647 : vector<2x32xf32>
    %649 = math.tanh %648 : vector<2x32xf32>
    %650 = arith.mulf %645, %649 : vector<2x32xf32>
    %651 = vector.extract_strided_slice %528 {offsets = [2, 0], sizes = [2, 128], strides = [1, 1]} : vector<16x128xf32> to vector<2x128xf32>
    %652 = arith.truncf %650 : vector<2x32xf32> to vector<2x32xbf16>
    %cst_112 = arith.constant dense<0.000000e+00> : vector<2x128xf32>
    %653 = tpu.matmul %652, %360, %cst_112 {dimension_numbers = #tpu.dot_dimension_numbers<[1], [0], [0], [1], [0, 0, 1, 1], [], []>} : vector<2x32xbf16>, vector<32x128xbf16>, vector<2x128xf32> -> vector<2x128xf32>
    %654 = arith.addf %651, %653 : vector<2x128xf32>
    %655 = math.tanh %654 : vector<2x128xf32>
    %656 = arith.negf %654 : vector<2x128xf32>
    %657 = math.exp %656 : vector<2x128xf32>
    %cst_113 = arith.constant 1.000000e+00 : f32
    %658 = vector.broadcast %cst_113 : f32 to vector<2x128xf32>
    %659 = arith.addf %658, %657 : vector<2x128xf32>
    %660 = arith.divf %658, %659 : vector<2x128xf32>
    %661 = arith.select %5, %655, %660 : vector<2x128xi1>, vector<2x128xf32>
    %662 = vector.extract_strided_slice %661 {offsets = [0, 0], sizes = [2, 32], strides = [1, 1]} : vector<2x128xf32> to vector<2x32xf32>
    %663 = vector.extract_strided_slice %661 {offsets = [0, 32], sizes = [2, 32], strides = [1, 1]} : vector<2x128xf32> to vector<2x32xf32>
    %664 = vector.extract_strided_slice %661 {offsets = [0, 64], sizes = [2, 32], strides = [1, 1]} : vector<2x128xf32> to vector<2x32xf32>
    %665 = vector.extract_strided_slice %661 {offsets = [0, 96], sizes = [2, 32], strides = [1, 1]} : vector<2x128xf32> to vector<2x32xf32>
    %666 = arith.mulf %663, %648 : vector<2x32xf32>
    %667 = arith.mulf %662, %664 : vector<2x32xf32>
    %668 = arith.addf %666, %667 : vector<2x32xf32>
    %669 = math.tanh %668 : vector<2x32xf32>
    %670 = arith.mulf %665, %669 : vector<2x32xf32>
    %671 = vector.extract_strided_slice %528 {offsets = [0, 0], sizes = [2, 128], strides = [1, 1]} : vector<16x128xf32> to vector<2x128xf32>
    %672 = arith.truncf %670 : vector<2x32xf32> to vector<2x32xbf16>
    %cst_114 = arith.constant dense<0.000000e+00> : vector<2x128xf32>
    %673 = tpu.matmul %672, %360, %cst_114 {dimension_numbers = #tpu.dot_dimension_numbers<[1], [0], [0], [1], [0, 0, 1, 1], [], []>} : vector<2x32xbf16>, vector<32x128xbf16>, vector<2x128xf32> -> vector<2x128xf32>
    %674 = arith.addf %671, %673 : vector<2x128xf32>
    %675 = math.tanh %674 : vector<2x128xf32>
    %676 = arith.negf %674 : vector<2x128xf32>
    %677 = math.exp %676 : vector<2x128xf32>
    %cst_115 = arith.constant 1.000000e+00 : f32
    %678 = vector.broadcast %cst_115 : f32 to vector<2x128xf32>
    %679 = arith.addf %678, %677 : vector<2x128xf32>
    %680 = arith.divf %678, %679 : vector<2x128xf32>
    %681 = arith.select %5, %675, %680 : vector<2x128xi1>, vector<2x128xf32>
    %682 = vector.extract_strided_slice %681 {offsets = [0, 0], sizes = [2, 32], strides = [1, 1]} : vector<2x128xf32> to vector<2x32xf32>
    %683 = vector.extract_strided_slice %681 {offsets = [0, 32], sizes = [2, 32], strides = [1, 1]} : vector<2x128xf32> to vector<2x32xf32>
    %684 = vector.extract_strided_slice %681 {offsets = [0, 64], sizes = [2, 32], strides = [1, 1]} : vector<2x128xf32> to vector<2x32xf32>
    %685 = vector.extract_strided_slice %681 {offsets = [0, 96], sizes = [2, 32], strides = [1, 1]} : vector<2x128xf32> to vector<2x32xf32>
    %686 = arith.mulf %683, %668 : vector<2x32xf32>
    %687 = arith.mulf %682, %684 : vector<2x32xf32>
    %688 = arith.addf %686, %687 : vector<2x32xf32>
    %689 = math.tanh %688 : vector<2x32xf32>
    %690 = arith.mulf %685, %689 : vector<2x32xf32>
    %c0_116 = arith.constant 0 : index
    %c0_117 = arith.constant 0 : index
    %691 = vector.load %arg10[%c0_116, %c0_117] : memref<64x5xf32, #tpu.memory_space<vmem>>, vector<64x5xf32>
    %692 = vector.extract_strided_slice %691 {offsets = [0, 0], sizes = [32, 5], strides = [1, 1]} : vector<64x5xf32> to vector<32x5xf32>
    %cst_118 = arith.constant dense<0.000000e+00> : vector<2x5xf32>
    %693 = tpu.matmul %527, %692, %cst_118 {dimension_numbers = #tpu.dot_dimension_numbers<[1], [0], [0], [1], [0, 0, 1, 1], [], []>} : vector<2x32xf32>, vector<32x5xf32>, vector<2x5xf32> -> vector<2x5xf32>
    %694 = vector.extract_strided_slice %691 {offsets = [32, 0], sizes = [32, 5], strides = [1, 1]} : vector<64x5xf32> to vector<32x5xf32>
    %cst_119 = arith.constant dense<0.000000e+00> : vector<2x5xf32>
    %695 = tpu.matmul %690, %694, %cst_119 {dimension_numbers = #tpu.dot_dimension_numbers<[1], [0], [0], [1], [0, 0, 1, 1], [], []>} : vector<2x32xf32>, vector<32x5xf32>, vector<2x5xf32> -> vector<2x5xf32>
    %696 = arith.addf %693, %695 : vector<2x5xf32>
    %c0_120 = arith.constant 0 : index
    %c0_121 = arith.constant 0 : index
    %697 = vector.load %arg11[%c0_120, %c0_121] : memref<1x5xf32, #tpu.memory_space<vmem>>, vector<1x5xf32>
    %698 = vector.broadcast %697 : vector<1x5xf32> to vector<2x5xf32>
    %699 = arith.addf %696, %698 : vector<2x5xf32>
    %c0_122 = arith.constant 0 : index
    %c0_123 = arith.constant 0 : index
    %700 = vector.load %arg12[%c0_122, %c0_123] : memref<2x5xf32, #tpu.memory_space<vmem>>, vector<2x5xf32>
    tpu.vector_store %arg12[%c0_122, %c0_123], %699 {strides = array<i32>} : memref<2x5xf32, #tpu.memory_space<vmem>>, vector<2x5xf32>,
    return
  }
  func.func @transform_0(%arg0: i32) -> (i32, i32) {
    %c0_i32 = arith.constant 0 : i32
    %c0_i32_0 = arith.constant 0 : i32
    %c0_i32_1 = arith.constant 0 : i32
    return %c0_i32, %c0_i32_0 : i32, i32
  }
  func.func @transform_1(%arg0: i32) -> (i32, i32) {
    %c0_i32 = arith.constant 0 : i32
    %c0_i32_0 = arith.constant 0 : i32
    %c0_i32_1 = arith.constant 0 : i32
    return %c0_i32, %c0_i32_0 : i32, i32
  }
  func.func @transform_2(%arg0: i32) -> (i32, i32) {
    %c0_i32 = arith.constant 0 : i32
    %c0_i32_0 = arith.constant 0 : i32
    %c0_i32_1 = arith.constant 0 : i32
    return %c0_i32, %c0_i32_0 : i32, i32
  }
  func.func @transform_3(%arg0: i32) -> (i32, i32) {
    %c0_i32 = arith.constant 0 : i32
    %c0_i32_0 = arith.constant 0 : i32
    %c0_i32_1 = arith.constant 0 : i32
    return %c0_i32, %c0_i32_0 : i32, i32
  }
  func.func @transform_4(%arg0: i32) -> (i32, i32) {
    %c0_i32 = arith.constant 0 : i32
    %c0_i32_0 = arith.constant 0 : i32
    %c0_i32_1 = arith.constant 0 : i32
    return %c0_i32, %c0_i32_0 : i32, i32
  }
  func.func @transform_5(%arg0: i32) -> (i32, i32) {
    %c0_i32 = arith.constant 0 : i32
    %c0_i32_0 = arith.constant 0 : i32
    %c0_i32_1 = arith.constant 0 : i32
    return %c0_i32, %c0_i32_0 : i32, i32
  }
  func.func @transform_6(%arg0: i32) -> (i32, i32) {
    %c0_i32 = arith.constant 0 : i32
    %c0_i32_0 = arith.constant 0 : i32
    %c0_i32_1 = arith.constant 0 : i32
    return %c0_i32, %c0_i32_0 : i32, i32
  }
  func.func @transform_7(%arg0: i32) -> (i32, i32) {
    %c0_i32 = arith.constant 0 : i32
    %c0_i32_0 = arith.constant 0 : i32
    %c0_i32_1 = arith.constant 0 : i32
    return %c0_i32, %c0_i32_0 : i32, i32
  }
  func.func @transform_8(%arg0: i32) -> (i32, i32) {
    %c0_i32 = arith.constant 0 : i32
    %c0_i32_0 = arith.constant 0 : i32
    %c0_i32_1 = arith.constant 0 : i32
    return %c0_i32, %c0_i32_0 : i32, i32
  }
  func.func @transform_9(%arg0: i32) -> (i32, i32) {
    %c0_i32 = arith.constant 0 : i32
    %c0_i32_0 = arith.constant 0 : i32
    %c0_i32_1 = arith.constant 0 : i32
    return %c0_i32, %c0_i32_0 : i32, i32
  }
  func.func @transform_10(%arg0: i32) -> (i32, i32) {
    %c0_i32 = arith.constant 0 : i32
    %c0_i32_0 = arith.constant 0 : i32
    %c0_i32_1 = arith.constant 0 : i32
    return %c0_i32, %c0_i32_0 : i32, i32
  }
  func.func @transform_11(%arg0: i32) -> (i32, i32) {
    %c0_i32 = arith.constant 0 : i32
    %c0_i32_0 = arith.constant 0 : i32
    %c0_i32_1 = arith.constant 0 : i32
    return %c0_i32, %c0_i32_0 : i32, i32
  }
}

</mosaic_0001>

<bundles_post_ra>
// kernel: bilstm_forward.1
= control target key start
LH: loop header
LB: loop body
LE: loop exit
PB: predicated region body
PF: predicated region fallthrough
CT: control target
= control target key end

     0   :  { %v3849_v1 = vmov 0.0   ;;  %v3850_v3 = vmov 0   ;;  %vm84_vm0 = vcmask 130048   ;;  %vm3851_vm1 = vmmov 0   ;;  %s4653_s0 = inlined_call_operand.vmem [shape: bf16[16,16], index: 0, kind: input, shape index: {}]   ;;  %s4654_s1 = inlined_call_operand.vmem [shape: bf16[16,256], index: 1, kind: input, shape index: {}]   ;;  %s4655_s2 = inlined_call_operand.vmem [shape: bf16[32,128], index: 2, kind: input, shape index: {}]   ;;  %s4656_s3 = inlined_call_operand.vmem [shape: bf16[32,128], index: 3, kind: input, shape index: {}]   ;;  %s4657_s4 = inlined_call_operand.vmem [shape: f32[1,256], index: 4, kind: input, shape index: {}]   ;;  %s4658_s5 = inlined_call_operand.vmem [shape: bf16[64,256], index: 5, kind: input, shape index: {}]   ;;  %s4659_s6 = inlined_call_operand.vmem [shape: bf16[32,128], index: 6, kind: input, shape index: {}]   ;;  %s4660_s7 = inlined_call_operand.vmem [shape: bf16[32,128], index: 7, kind: input, shape index: {}]   ;;  %s4661_s8 = inlined_call_operand.vmem [shape: f32[1,256], index: 8, kind: input, shape index: {}]   ;;  %s4662_s9 = inlined_call_operand.vmem [shape: f32[64,5], index: 9, kind: input, shape index: {}]   ;;  %s4663_s10 = inlined_call_operand.vmem [shape: f32[1,5], index: 10, kind: input, shape index: {}]   ;;  %s4664_s11 = inlined_call_operand.hbm [shape: f32[2,5], index: 11, kind: output, shape index: {}]  }
   0x1   :  { %v3545_v0 = vld [vmem:[%s4654_s1 + $0x4] ss:$8 sps:$4 sm:$0xff]   ;;  %3248 = vmatprep.subr.bf16.mxu1 %v3849_v1  ;;  %120 = vmatprep.mubr.bf16.mxu0 %v3850_v3  ;;  %v3548_v4 = vld [vmem:[%s4654_s1] ss:$8 sps:$4 sm:$0xff]  }
   0x2   :  { %v3923_v2 = vld [vmem:[%s4655_s2] sm:$0xff]   ;;  %88 = vmatprep.subr.bf16.mxu0 %v3545_v0  ;;  %v3937_v6 = vld [vmem:[%s4655_s2 + $0x8] sm:$0xff]   ;;  %3252 = vmatprep.mubr.msk.bf16.mxu1 %vm3851_vm1, %v3849_v1 }
   0x3   :  { %3249 = vmatpush3.bf16.msra.mxu1 %v3923_v2  ;;  %v3549_v5 = vld [vmem:[%s4653_s0] sm:$0xff]   ;;  %89 = vmatpush1.bf16.msra.mxu0 %v3548_v4 }
   0x4   :  { %3250 = vmatprep.subr.bf16.mxu1 %v3849_v1  ;;  %3256 = vmatprep.subr.bf16.mxu0 %v3849_v1 }
   0x6   :  { %3061 = vmatmul.mubr.msk.bf16.vlgmr.msra.gmra.mrb[0].mxu0 %vm84_vm0, %v3549_v5 }
   0x7   :  { %3251 = vmatpush3.bf16.msra.mxu1 %v3937_v6  ;;  %3257 = vmatpush3.bf16.msra.mxu0 %v3923_v2 }
   0x8   :  { %3260 = vmatprep.mubr.msk.bf16.mxu0 %vm3851_vm1, %v3849_v1  ;;  %3258 = vmatprep.subr.bf16.mxu0 %v3849_v1 }
   0x9   :  { %3264 = vmatprep.subr.bf16.mxu1 %v3849_v1 }
   0xa   :  { %3253 = vmatmul.mubr.bf16.vlgmr.msra.gmra.mrb[0].mxu1 %v3850_v3 }
   0xb   :  { %3265 = vmatpush3.bf16.msra.mxu1 %v3923_v2  ;;  %3268 = vmatprep.mubr.msk.bf16.mxu1 %vm3851_vm1, %v3849_v1 }
   0xc   :  { %3259 = vmatpush3.bf16.msra.mxu0 %v3937_v6  ;;  %3266 = vmatprep.subr.bf16.mxu1 %v3849_v1 }
   0xd   :  { %16 = vsyncpa [#allocation4], 0  ;;  %3272 = vmatprep.subr.bf16.mxu0 %v3849_v1  ;;  %v40_v7 = vlaneseq  ;;  %v57_v10 = vld [vmem:[%s4657_s4] sm:$0x3]  ;;  %s3852_s2 = smov 64   ;;  %s3853_s4 = smov 32  }
   0xe   :  { %vm143_vm5 = vcmask 261120   ;;  %vm217_vm6 = vcmask 254976   ;;  %vm388_vm7 = vcmask 259076   ;;  %vm302_vm8 = vcmask 257026  }
   0xf   :  { %3267 = vmatpush3.bf16.msra.mxu1 %v3937_v6  ;;  %v3957_v8 = vshrl.u32 %v40_v7, 7  ;;  %v41_v29 = vand.u32 127, %v40_v7  ;;  %vm1069_vm9 = vcmask 519426   ;;  %vm474_vm10 = vcmask 261126  }
  0x10   :  { %3280 = vmatprep.subr.bf16.mxu1 %v3849_v1  ;;  %vm897_vm11 = vcmask 523526   ;;  %vm983_vm12 = vcmask 521476   ;;  %vm1152_vm13 = vcmask 517376   ;;  %vm1561_vm14 = vcmask 523264  }
  0x11   :  { %v61_v9 = vsub.s32 0, %v3957_v8  ;;  %v65_v11 = vsub.s32 1, %v3957_v8  ;;  %vm42_vm2 = vcmp.ge.s32.totalorder %v41_v29, 64  ;;  %vm43_vm3 = vcmp.lt.s32.totalorder %v41_v29, 96 }
  0x12   :  { %vm3980_vm4 = vmand %vm42_vm2, %vm43_vm3  ;;  %vm3042_vm15 = vcmask 33792  }
  0x13   :  { %v62_v12 = vrot.slane %v57_v10, %v61_v9  ;;  %v3968_v13 = vrot.slane %v57_v10, %v65_v11 }
  0xd9   :  { %v122_v14 = vpop.f32.mrb[0].mxu0 }
  0xda   :  { %v3970_v15 = vadd.f32 %v122_v14, %v62_v12  ;;  %v124_v16 = vpop.f32.mrb[1].mxu0 }
  0xdb   :  { %v3973_v17 = vadd.f32 %v124_v16, %v3968_v13  ;;  %v126_v18 = vpop.f32.mrb[2].mxu0 }
  0xdc   :  { %v3975_v19 = vadd.f32 %v126_v18, %v62_v12  ;;  %v3977_v20 = vpop.f32.mrb[3].mxu0 }
  0xdd   :  { %v181_v21 = vpop.f32.mrb[0].mxu1 }
  0xde   :  { %v187_v22 = vadd.f32 %v181_v21, %v3970_v15  ;;  %v3254_v23 = vpop.f32.mrb[1].mxu1 }
  0xdf   :  { %v184_v24 = vpop.f32.mrb[2].mxu1 }
  0xe0   :  { %v3064_v25 = vmul.f32 -1.442695, %v187_v22  ;;  %v3255_v26 = vpop.f32.mrb[3].mxu1 }
  0xe2   :  { %3569 = vpow2.f32 %v3064_v25 }
  0xe3   :  { %3571 = vtanh.f32 %v187_v22 }
  0xec   :  { %v3570_v27 = vpop.eup %3569 }
  0xed   :  { %v192_v28 = vadd.f32 1.0, %v3570_v27  ;;  %v3572_v31 = vpop.eup %3571 }
  0xef   :  { %3573 = vrcp.f32 %v192_v28 }
  0xf9   :  { %v3574_v32 = vpop.eup %3573 }
  0xfa   :  { %v195_v33 = vsel %vm3980_vm4, %v3572_v31, %v3574_v32 }
  0xfb   :  { %198 = vrot.lane.b32.xlu0 %v195_v33, %s3852_s2  ;;  %v196_v36 = vmul.f32 0.0, %v195_v33 }
 0x16d   :  { %v199_v34 = vpop.permute.xlu0 %198 }
 0x16e   :  { %v201_v35 = vmul.f32 %v199_v34, %v195_v33 }
 0x170   :  { %203 = vrot.lane.b32.xlu0 %v201_v35, %s3853_s4 }
 0x1e2   :  { %v204_v37 = vpop.permute.xlu0 %203 }
 0x1e3   :  { %v206_v38 = vadd.f32 %v204_v37, %v196_v36 }
 0x1e5   :  { %3575 = vtanh.f32 %v206_v38  ;;  %v279_v58 = vrot.slane %v206_v38, 6 }
 0x1ef   :  { %v3576_v39 = vpop.eup %3575 }
 0x1f0   :  { %209 = vrot.lane.b32.xlu1 %v3576_v39, %s3852_s2 }
 0x262   :  { %v210_v40 = vpop.permute.xlu1 %209 }
 0x263   :  { %v3989_v41 = vmul.f32 %v210_v40, %v195_v33 }
 0x265   :  { %v219_v42 = vpack.c.bf16 %v3989_v41, %v3989_v41 }
 0x267   :  { %221 = vrot.lane.b32.xlu1 %v219_v42, %s3853_s4 }
 0x2d9   :  { %v222_v43 = vpop.permute.xlu1 %221 }
 0x2da   :  { %3261 = vmatmul.mubr.msk.bf16.vlgmr.msra.gmra.mrb[4].mxu0 %vm143_vm5, %v222_v43 }
 0x2db   :  { %3273 = vmatpush3.bf16.msra.mxu0 %v3923_v2  ;;  %3276 = vmatprep.mubr.msk.bf16.mxu0 %vm3851_vm1, %v3849_v1 }
 0x2dc   :  { %3274 = vmatprep.subr.bf16.mxu0 %v3849_v1 }
 0x2df   :  { %3275 = vmatpush3.bf16.msra.mxu0 %v3937_v6 }
 0x2e0   :  { %3288 = vmatprep.subr.bf16.mxu0 %v3849_v1 }
 0x3ad   :  { %v260_v44 = vpop.f32.mrb[4].mxu0 }
 0x3ae   :  { %v267_v45 = vrot.slane %v260_v44, 6  ;;  %v3262_v46 = vpop.f32.mrb[5].mxu0 }
 0x3af   :  { %v263_v47 = vpop.f32.mrb[6].mxu0 }
 0x3b0   :  { %v269_v48 = vadd.f32 %v267_v45, %v3970_v15  ;;  %v3263_v49 = vpop.f32.mrb[7].mxu0 }
 0x3b2   :  { %v3066_v50 = vmul.f32 -1.442695, %v269_v48 }
 0x3b4   :  { %3577 = vpow2.f32 %v3066_v50 }
 0x3b5   :  { %3579 = vtanh.f32 %v269_v48 }
 0x3be   :  { %v3578_v51 = vpop.eup %3577 }
 0x3bf   :  { %v274_v52 = vadd.f32 1.0, %v3578_v51  ;;  %v3580_v53 = vpop.eup %3579 }
 0x3c1   :  { %3581 = vrcp.f32 %v274_v52 }
 0x3cb   :  { %v3582_v54 = vpop.eup %3581 }
 0x3cc   :  { %v277_v55 = vsel %vm3980_vm4, %v3580_v53, %v3582_v54 }
 0x3cd   :  { %283 = vrot.lane.b32.xlu0 %v277_v55, %s3852_s2  ;;  %v281_v59 = vmul.f32 %v279_v58, %v277_v55 }
 0x43f   :  { %v284_v56 = vpop.permute.xlu0 %283 }
 0x440   :  { %v286_v57 = vmul.f32 %v284_v56, %v277_v55 }
 0x442   :  { %288 = vrot.lane.b32.xlu1 %v286_v57, %s3853_s4 }
 0x4b4   :  { %v289_v60 = vpop.permute.xlu1 %288 }
 0x4b5   :  { %v291_v61 = vadd.f32 %v289_v60, %v281_v59 }
 0x4b7   :  { %3583 = vtanh.f32 %v291_v61  ;;  %v365_v31 = vrot.slane %v291_v61, 6 }
 0x4c1   :  { %v3584_v62 = vpop.eup %3583 }
 0x4c2   :  { %294 = vrot.lane.b32.xlu0 %v3584_v62, %s3852_s2 }
 0x534   :  { %v295_v63 = vpop.permute.xlu0 %294 }
 0x535   :  { %v4007_v0 = vmul.f32 %v295_v63, %v277_v55 }
 0x537   :  { %v304_v4 = vpack.c.bf16 %v4007_v0, %v4007_v0 }
 0x539   :  { %v306_v5 = vrot.slane %v304_v4, 1 }
 0x53b   :  { %307 = vrot.lane.b32.xlu1 %v306_v5, %s3853_s4 }
 0x5ad   :  { %v308_v7 = vpop.permute.xlu1 %307 }
 0x5ae   :  { %3269 = vmatmul.mubr.msk.bf16.vlgmr.msra.gmra.mrb[4].mxu1 %vm143_vm5, %v308_v7 }
 0x5af   :  { %3281 = vmatpush3.bf16.msra.mxu1 %v3923_v2  ;;  %3284 = vmatprep.mubr.msk.bf16.mxu1 %vm3851_vm1, %v3849_v1 }
 0x5b0   :  { %3282 = vmatprep.subr.bf16.mxu1 %v3849_v1 }
 0x5b3   :  { %3283 = vmatpush3.bf16.msra.mxu1 %v3937_v6 }
 0x5b4   :  { %3296 = vmatprep.subr.bf16.mxu1 %v3849_v1 }
 0x681   :  { %v346_v10 = vpop.f32.mrb[4].mxu1 }
 0x682   :  { %v353_v12 = vrot.slane %v346_v10, 4  ;;  %v3270_v14 = vpop.f32.mrb[5].mxu1 }
 0x683   :  { %v349_v16 = vpop.f32.mrb[6].mxu1 }
 0x684   :  { %v355_v18 = vadd.f32 %v353_v12, %v3970_v15  ;;  %v3271_v21 = vpop.f32.mrb[7].mxu1 }
 0x686   :  { %v3068_v22 = vmul.f32 -1.442695, %v355_v18 }
 0x688   :  { %3585 = vpow2.f32 %v3068_v22 }
 0x689   :  { %3587 = vtanh.f32 %v355_v18 }
 0x692   :  { %v3586_v23 = vpop.eup %3585 }
 0x693   :  { %v360_v24 = vadd.f32 1.0, %v3586_v23  ;;  %v3588_v25 = vpop.eup %3587 }
 0x695   :  { %3589 = vrcp.f32 %v360_v24 }
 0x69f   :  { %v3590_v26 = vpop.eup %3589 }
 0x6a0   :  { %v363_v27 = vsel %vm3980_vm4, %v3588_v25, %v3590_v26 }
 0x6a1   :  { %369 = vrot.lane.b32.xlu0 %v363_v27, %s3852_s2  ;;  %v367_v32 = vmul.f32 %v365_v31, %v363_v27 }
 0x713   :  { %v370_v28 = vpop.permute.xlu0 %369 }
 0x714   :  { %v372_v29 = vmul.f32 %v370_v28, %v363_v27 }
 0x716   :  { %374 = vrot.lane.b32.xlu1 %v372_v29, %s3853_s4 }
 0x788   :  { %v375_v33 = vpop.permute.xlu1 %374 }
 0x789   :  { %v377_v34 = vadd.f32 %v375_v33, %v367_v32 }
 0x78b   :  { %3591 = vtanh.f32 %v377_v34  ;;  %v451_v56 = vrot.slane %v377_v34, 6 }
 0x795   :  { %v3592_v35 = vpop.eup %3591 }
 0x796   :  { %380 = vrot.lane.b32.xlu0 %v3592_v35, %s3852_s2 }
 0x808   :  { %v381_v36 = vpop.permute.xlu0 %380 }
 0x809   :  { %v4025_v37 = vmul.f32 %v381_v36, %v363_v27 }
 0x80b   :  { %v390_v38 = vpack.c.bf16 %v4025_v37, %v4025_v37 }
 0x80d   :  { %v392_v39 = vrot.slane %v390_v38, 2 }
 0x80f   :  { %393 = vrot.lane.b32.xlu1 %v392_v39, %s3853_s4 }
 0x881   :  { %v394_v40 = vpop.permute.xlu1 %393 }
 0x882   :  { %3277 = vmatmul.mubr.msk.bf16.vlgmr.msra.gmra.mrb[8].mxu0 %vm143_vm5, %v394_v40 }
 0x883   :  { %3289 = vmatpush3.bf16.msra.mxu0 %v3923_v2  ;;  %3292 = vmatprep.mubr.msk.bf16.mxu0 %vm3851_vm1, %v3849_v1 }
 0x884   :  { %3290 = vmatprep.subr.bf16.mxu0 %v3849_v1 }
 0x887   :  { %3291 = vmatpush3.bf16.msra.mxu0 %v3937_v6 }
 0x888   :  { %3304 = vmatprep.subr.bf16.mxu0 %v3849_v1 }
 0x955   :  { %v432_v42 = vpop.f32.mrb[8].mxu0 }
 0x956   :  { %v439_v43 = vrot.slane %v432_v42, 2  ;;  %v3278_v44 = vpop.f32.mrb[9].mxu0 }
 0x957   :  { %v435_v45 = vpop.f32.mrb[10].mxu0 }
 0x958   :  { %v441_v46 = vadd.f32 %v439_v43, %v3970_v15  ;;  %v3279_v47 = vpop.f32.mrb[11].mxu0 }
 0x95a   :  { %v3070_v48 = vmul.f32 -1.442695, %v441_v46 }
 0x95c   :  { %3593 = vpow2.f32 %v3070_v48 }
 0x95d   :  { %3595 = vtanh.f32 %v441_v46 }
 0x966   :  { %v3594_v49 = vpop.eup %3593 }
 0x967   :  { %v446_v50 = vadd.f32 1.0, %v3594_v49  ;;  %v3596_v51 = vpop.eup %3595 }
 0x969   :  { %3597 = vrcp.f32 %v446_v50 }
 0x973   :  { %v3598_v52 = vpop.eup %3597 }
 0x974   :  { %v449_v53 = vsel %vm3980_vm4, %v3596_v51, %v3598_v52 }
 0x975   :  { %455 = vrot.lane.b32.xlu0 %v449_v53, %s3852_s2  ;;  %v453_v15 = vmul.f32 %v451_v56, %v449_v53 }
 0x9e7   :  { %v456_v54 = vpop.permute.xlu0 %455 }
 0x9e8   :  { %v458_v55 = vmul.f32 %v456_v54, %v449_v53 }
 0x9ea   :  { %460 = vrot.lane.b32.xlu1 %v458_v55, %s3853_s4 }
 0xa5c   :  { %v461_v57 = vpop.permute.xlu1 %460 }
 0xa5d   :  { %v463_v58 = vadd.f32 %v461_v57, %v453_v15 }
 0xa5f   :  { %3599 = vtanh.f32 %v463_v58  ;;  %v534_v27 = vrot.slane %v463_v58, 6 }
 0xa69   :  { %v3600_v59 = vpop.eup %3599 }
 0xa6a   :  { %466 = vrot.lane.b32.xlu0 %v3600_v59, %s3852_s2  ;;  %v4090_v59 = vld [vmem:[%s4656_s3] sm:$0xff]  }
 0xadc   :  { %v467_v60 = vpop.permute.xlu0 %466 }
 0xadd   :  { %v4043_v61 = vmul.f32 %v467_v60, %v449_v53 }
 0xadf   :  { %v476_v62 = vpack.c.bf16 %v4043_v61, %v4043_v61 }
 0xae1   :  { %v478_v63 = vrot.slane %v476_v62, 3  ;;  %v4097_v62 = vld [vmem:[%s4656_s3 + $0x8] sm:$0xff]  }
 0xae3   :  { %479 = vrot.lane.b32.xlu1 %v478_v63, %s3853_s4 }
 0xb55   :  { %v480_v4 = vpop.permute.xlu1 %479 }
 0xb56   :  { %3285 = vmatmul.mubr.msk.bf16.vlgmr.msra.gmra.mrb[8].mxu1 %vm143_vm5, %v480_v4 }
 0xb57   :  { %3297 = vmatpush3.bf16.msra.mxu1 %v3923_v2  ;;  %3300 = vmatprep.mubr.msk.bf16.mxu1 %vm3851_vm1, %v3849_v1 }
 0xb58   :  { %3298 = vmatprep.subr.bf16.mxu1 %v3849_v1 }
 0xb5b   :  { %3299 = vmatpush3.bf16.msra.mxu1 %v3937_v6 }
 0xb5c   :  { %3312 = vmatprep.subr.bf16.mxu1 %v3849_v1 }
 0xc29   :  { %v518_v5 = vpop.f32.mrb[8].mxu1 }
 0xc2a   :  { %v524_v7 = vadd.f32 %v518_v5, %v3975_v19  ;;  %v3286_v10 = vpop.f32.mrb[9].mxu1 }
 0xc2b   :  { %v521_v12 = vpop.f32.mrb[10].mxu1 }
 0xc2c   :  { %v3072_v14 = vmul.f32 -1.442695, %v524_v7  ;;  %v3287_v16 = vpop.f32.mrb[11].mxu1 }
 0xc2e   :  { %3601 = vpow2.f32 %v3072_v14 }
 0xc2f   :  { %3603 = vtanh.f32 %v524_v7 }
 0xc38   :  { %v3602_v18 = vpop.eup %3601 }
 0xc39   :  { %v529_v21 = vadd.f32 1.0, %v3602_v18  ;;  %v3604_v22 = vpop.eup %3603  ;;  %v4114_v18 = vadd.f32 %v3977_v20, %v3968_v13 }
 0xc3b   :  { %3605 = vrcp.f32 %v529_v21 }
 0xc45   :  { %v3606_v23 = vpop.eup %3605 }
 0xc46   :  { %v532_v24 = vsel %vm3980_vm4, %v3604_v22, %v3606_v23 }
 0xc47   :  { %538 = vrot.lane.b32.xlu0 %v532_v24, %s3852_s2  ;;  %v536_v28 = vmul.f32 %v534_v27, %v532_v24 }
 0xcb9   :  { %v539_v25 = vpop.permute.xlu0 %538 }
 0xcba   :  { %v541_v26 = vmul.f32 %v539_v25, %v532_v24 }
 0xcbc   :  { %543 = vrot.lane.b32.xlu1 %v541_v26, %s3853_s4 }
 0xd2e   :  { %v544_v29 = vpop.permute.xlu1 %543 }
 0xd2f   :  { %v546_v31 = vadd.f32 %v544_v29, %v536_v28 }
 0xd31   :  { %3607 = vtanh.f32 %v546_v31  ;;  %v618_v51 = vrot.slane %v546_v31, 6 }
 0xd3b   :  { %v3608_v32 = vpop.eup %3607 }
 0xd3c   :  { %549 = vrot.lane.b32.xlu0 %v3608_v32, %s3852_s2 }
 0xdae   :  { %v550_v33 = vpop.permute.xlu0 %549 }
 0xdaf   :  { %v4061_v34 = vmul.f32 %v550_v33, %v532_v24 }
 0xdb1   :  { %v558_v35 = vpack.c.bf16 %v4061_v34, %v4061_v34 }
 0xdb3   :  { %560 = vrot.lane.b32.xlu1 %v558_v35, %s3853_s4 }
 0xe25   :  { %v561_v36 = vpop.permute.xlu1 %560 }
 0xe26   :  { %3293 = vmatmul.mubr.msk.bf16.vlgmr.msra.gmra.mrb[12].mxu0 %vm143_vm5, %v561_v36 }
 0xe27   :  { %3305 = vmatpush3.bf16.msra.mxu0 %v3923_v2  ;;  %3308 = vmatprep.mubr.msk.bf16.mxu0 %vm3851_vm1, %v3849_v1 }
 0xe28   :  { %3306 = vmatprep.subr.bf16.mxu0 %v3849_v1 }
 0xe2b   :  { %3307 = vmatpush3.bf16.msra.mxu0 %v3937_v6 }
 0xe2c   :  { %3320 = vmatprep.subr.bf16.mxu0 %v3849_v1 }
 0xef9   :  { %v599_v38 = vpop.f32.mrb[12].mxu0 }
 0xefa   :  { %v606_v39 = vrot.slane %v599_v38, 6  ;;  %v3294_v40 = vpop.f32.mrb[13].mxu0 }
 0xefb   :  { %v602_v42 = vpop.f32.mrb[14].mxu0 }
 0xefc   :  { %v608_v43 = vadd.f32 %v606_v39, %v3975_v19  ;;  %v3295_v44 = vpop.f32.mrb[15].mxu0 }
 0xefe   :  { %v3074_v45 = vmul.f32 -1.442695, %v608_v43 }
 0xf00   :  { %3609 = vpow2.f32 %v3074_v45 }
 0xf01   :  { %3611 = vtanh.f32 %v608_v43 }
 0xf0a   :  { %v3610_v46 = vpop.eup %3609 }
 0xf0b   :  { %v613_v2 = vadd.f32 1.0, %v3610_v46  ;;  %v3612_v47 = vpop.eup %3611 }
 0xf0d   :  { %3613 = vrcp.f32 %v613_v2 }
 0xf17   :  { %v3614_v48 = vpop.eup %3613 }
 0xf18   :  { %v616_v6 = vsel %vm3980_vm4, %v3612_v47, %v3614_v48 }
 0xf19   :  { %622 = vrot.lane.b32.xlu0 %v616_v6, %s3852_s2  ;;  %v620_v52 = vmul.f32 %v618_v51, %v616_v6 }
 0xf8b   :  { %v623_v49 = vpop.permute.xlu0 %622 }
 0xf8c   :  { %v625_v50 = vmul.f32 %v623_v49, %v616_v6 }
 0xf8e   :  { %627 = vrot.lane.b32.xlu1 %v625_v50, %s3853_s4 }
0x1000   :  { %v628_v53 = vpop.permute.xlu1 %627 }
0x1001   :  { %v4078_v54 = vadd.f32 %v628_v53, %v620_v52 }
0x1003   :  { %3615 = vtanh.f32 %v4078_v54  ;;  %v703_v43 = vrot.slane %v4078_v54, 6 }
0x100d   :  { %v3616_v55 = vpop.eup %3615 }
0x100e   :  { %633 = vrot.lane.b32.xlu0 %v3616_v55, %s3852_s2 }
0x1080   :  { %v634_v56 = vpop.permute.xlu0 %633 }
0x1081   :  { %v4082_v15 = vmul.f32 %v634_v56, %v616_v6 }
0x1083   :  { %v642_v57 = vpack.c.bf16 %v4082_v15, %v4082_v15 }
0x1085   :  { %v644_v58 = vrot.slane %v642_v57, 1 }
0x1087   :  { %645 = vrot.lane.b32.xlu1 %v644_v58, %s3853_s4 }
0x10f9   :  { %v646_v60 = vpop.permute.xlu1 %645 }
0x10fa   :  { %3301 = vmatmul.mubr.msk.bf16.vlgmr.msra.gmra.mrb[12].mxu1 %vm143_vm5, %v646_v60 }
0x10fb   :  { %3313 = vmatpush3.bf16.msra.mxu1 %v4090_v59  ;;  %3316 = vmatprep.mubr.msk.bf16.mxu1 %vm3851_vm1, %v3849_v1 }
0x10fc   :  { %3314 = vmatprep.subr.bf16.mxu1 %v3849_v1 }
0x10ff   :  { %3315 = vmatpush3.bf16.msra.mxu1 %v4097_v62 }
0x1100   :  { %3328 = vmatprep.subr.bf16.mxu1 %v3849_v1 }
0x1102   :  { %3317 = vmatmul.mubr.bf16.vlgmr.msra.gmra.mrb[16].mxu1 %v3850_v3 }
0x1103   :  { %3329 = vmatpush3.bf16.msra.mxu1 %v4090_v59  ;;  %3332 = vmatprep.mubr.msk.bf16.mxu1 %vm3851_vm1, %v3849_v1 }
0x1104   :  { %3330 = vmatprep.subr.bf16.mxu1 %v3849_v1 }
0x1107   :  { %3331 = vmatpush3.bf16.msra.mxu1 %v4097_v62 }
0x1108   :  { %3344 = vmatprep.subr.bf16.mxu1 %v3849_v1 }
0x11cd   :  { %v684_v63 = vpop.f32.mrb[12].mxu1 }
0x11ce   :  { %v691_v4 = vrot.slane %v684_v63, 4  ;;  %v3302_v5 = vpop.f32.mrb[13].mxu1 }
0x11cf   :  { %v687_v7 = vpop.f32.mrb[14].mxu1 }
0x11d0   :  { %v693_v10 = vadd.f32 %v691_v4, %v3975_v19  ;;  %v3303_v12 = vpop.f32.mrb[15].mxu1 }
0x11d2   :  { %v3076_v14 = vmul.f32 -1.442695, %v693_v10 }
0x11d4   :  { %3617 = vpow2.f32 %v3076_v14 }
0x11d5   :  { %v858_v16 = vpop.f32.mrb[16].mxu1 }
0x11d6   :  { %v865_v21 = vrot.slane %v858_v16, 2  ;;  %v3318_v22 = vpop.f32.mrb[17].mxu1 }
0x11d7   :  { %v861_v23 = vpop.f32.mrb[18].mxu1 }
0x11d8   :  { %v867_v24 = vadd.f32 %v865_v21, %v4114_v18  ;;  %v3319_v25 = vpop.f32.mrb[19].mxu1 }
0x11da   :  { %v3081_v26 = vmul.f32 -1.442695, %v867_v24 }
0x11dc   :  { %3619 = vpow2.f32 %v3081_v26 }
0x11dd   :  { %3621 = vtanh.f32 %v693_v10 }
0x11de   :  { %v3618_v27 = vpop.eup %3617 }
0x11df   :  { %v698_v28 = vadd.f32 1.0, %v3618_v27 }
0x11e1   :  { %3623 = vrcp.f32 %v698_v28 }
0x11e2   :  { %3625 = vtanh.f32 %v867_v24 }
0x11e6   :  { %v3620_v29 = vpop.eup %3619 }
0x11e7   :  { %v872_v31 = vadd.f32 1.0, %v3620_v29  ;;  %v3622_v32 = vpop.eup %3621 }
0x11e9   :  { %3627 = vrcp.f32 %v872_v31 }
0x11eb   :  { %v3624_v33 = vpop.eup %3623 }
0x11ec   :  { %v701_v13 = vsel %vm3980_vm4, %v3622_v32, %v3624_v33  ;;  %v3626_v20 = vpop.eup %3625 }
0x11ed   :  { %707 = vrot.lane.b32.xlu0 %v701_v13, %s3852_s2  ;;  %v705_v44 = vmul.f32 %v703_v43, %v701_v13 }
0x11f3   :  { %v3628_v35 = vpop.eup %3627 }
0x11f4   :  { %v875_v36 = vsel %vm3980_vm4, %v3626_v20, %v3628_v35 }
0x11f5   :  { %878 = vrot.lane.b32.xlu1 %v875_v36, %s3852_s2  ;;  %v876_v2 = vmul.f32 0.0, %v875_v36 }
0x125f   :  { %v708_v38 = vpop.permute.xlu0 %707 }
0x1260   :  { %v710_v39 = vmul.f32 %v708_v38, %v701_v13 }
0x1262   :  { %712 = vrot.lane.b32.xlu0 %v710_v39, %s3853_s4 }
0x1267   :  { %v879_v40 = vpop.permute.xlu1 %878 }
0x1268   :  { %v881_v42 = vmul.f32 %v879_v40, %v875_v36 }
0x126a   :  { %883 = vrot.lane.b32.xlu1 %v881_v42, %s3853_s4 }
0x12d4   :  { %v713_v45 = vpop.permute.xlu0 %712 }
0x12d5   :  { %v4126_v46 = vadd.f32 %v713_v45, %v705_v44 }
0x12d7   :  { %3629 = vtanh.f32 %v4126_v46 }
0x12dc   :  { %v884_v47 = vpop.permute.xlu1 %883 }
0x12dd   :  { %v886_v48 = vadd.f32 %v884_v47, %v876_v2 }
0x12df   :  { %3631 = vtanh.f32 %v886_v48  ;;  %v960_v32 = vrot.slane %v886_v48, 2 }
0x12e1   :  { %v3630_v6 = vpop.eup %3629 }
0x12e2   :  { %718 = vrot.lane.b32.xlu0 %v3630_v6, %s3852_s2 }
0x12e9   :  { %v3632_v49 = vpop.eup %3631 }
0x12ea   :  { %889 = vrot.lane.b32.xlu1 %v3632_v49, %s3852_s2 }
0x1354   :  { %v719_v50 = vpop.permute.xlu0 %718 }
0x1355   :  { %v4131_v51 = vmul.f32 %v719_v50, %v701_v13 }
0x1357   :  { %v727_v52 = vpack.c.bf16 %v4131_v51, %v4131_v51 }
0x1359   :  { %v729_v53 = vrot.slane %v727_v52, 2 }
0x135b   :  { %730 = vrot.lane.b32.xlu0 %v729_v53, %s3853_s4 }
0x135c   :  { %v890_v54 = vpop.permute.xlu1 %889 }
0x135d   :  { %v4136_v55 = vmul.f32 %v890_v54, %v875_v36 }
0x135f   :  { %v899_v56 = vpack.c.bf16 %v4136_v55, %v4136_v55 }
0x1361   :  { %v901_v57 = vrot.slane %v899_v56, 3 }
0x1363   :  { %902 = vrot.lane.b32.xlu1 %v901_v57, %s3853_s4 }
0x13cd   :  { %v731_v58 = vpop.permute.xlu0 %730 }
0x13ce   :  { %3309 = vmatmul.mubr.msk.bf16.vlgmr.msra.gmra.mrb[16].mxu0 %vm143_vm5, %v731_v58 }
0x13cf   :  { %3321 = vmatpush3.bf16.msra.mxu0 %v4090_v59  ;;  %3324 = vmatprep.mubr.msk.bf16.mxu0 %vm3851_vm1, %v3849_v1 }
0x13d0   :  { %3322 = vmatprep.subr.bf16.mxu0 %v3849_v1 }
0x13d3   :  { %3323 = vmatpush3.bf16.msra.mxu0 %v4097_v62 }
0x13d4   :  { %3336 = vmatprep.subr.bf16.mxu0 %v3849_v1 }
0x13d5   :  { %v903_v60 = vpop.permute.xlu1 %902 }
0x13d6   :  { %3325 = vmatmul.mubr.msk.bf16.vlgmr.msra.gmra.mrb[20].mxu0 %vm143_vm5, %v903_v60 }
0x13d7   :  { %3337 = vmatpush3.bf16.msra.mxu0 %v4090_v59  ;;  %3340 = vmatprep.mubr.msk.bf16.mxu0 %vm3851_vm1, %v3849_v1 }
0x13d8   :  { %3338 = vmatprep.subr.bf16.mxu0 %v3849_v1 }
0x13db   :  { %3339 = vmatpush3.bf16.msra.mxu0 %v4097_v62 }
0x13dc   :  { %3352 = vmatprep.subr.bf16.mxu0 %v3849_v1 }
0x14a1   :  { %v4155_v63 = vpop.f32.mrb[16].mxu0 }
0x14a2   :  { %v3310_v4 = vpop.f32.mrb[17].mxu0 }
0x14a3   :  { %v772_v5 = vpop.f32.mrb[18].mxu0 }
0x14a4   :  { %v3311_v7 = vpop.f32.mrb[19].mxu0 }
0x14a9   :  { %v941_v10 = vpop.f32.mrb[20].mxu0 }
0x14aa   :  { %v948_v12 = vrot.slane %v941_v10, 4  ;;  %v3326_v14 = vpop.f32.mrb[21].mxu0 }
0x14ab   :  { %v944_v16 = vpop.f32.mrb[22].mxu0 }
0x14ac   :  { %v950_v21 = vadd.f32 %v948_v12, %v4114_v18  ;;  %v3327_v22 = vpop.f32.mrb[23].mxu0 }
0x14ae   :  { %v3083_v23 = vmul.f32 -1.442695, %v950_v21 }
0x14b0   :  { %3633 = vpow2.f32 %v3083_v23 }
0x14b1   :  { %3635 = vtanh.f32 %v950_v21 }
0x14ba   :  { %v3634_v24 = vpop.eup %3633 }
0x14bb   :  { %v955_v25 = vadd.f32 1.0, %v3634_v24  ;;  %v3636_v26 = vpop.eup %3635 }
0x14bd   :  { %3637 = vrcp.f32 %v955_v25 }
0x14c7   :  { %v3638_v27 = vpop.eup %3637 }
0x14c8   :  { %v958_v28 = vsel %vm3980_vm4, %v3636_v26, %v3638_v27 }
0x14c9   :  { %964 = vrot.lane.b32.xlu0 %v958_v28, %s3852_s2  ;;  %v962_v33 = vmul.f32 %v960_v32, %v958_v28 }
0x153b   :  { %v965_v29 = vpop.permute.xlu0 %964 }
0x153c   :  { %v967_v31 = vmul.f32 %v965_v29, %v958_v28 }
0x153e   :  { %969 = vrot.lane.b32.xlu1 %v967_v31, %s3853_s4 }
0x15b0   :  { %v970_v13 = vpop.permute.xlu1 %969 }
0x15b1   :  { %v972_v20 = vadd.f32 %v970_v13, %v962_v33 }
0x15b3   :  { %3639 = vtanh.f32 %v972_v20  ;;  %v1046_v58 = vrot.slane %v972_v20, 2 }
0x15bd   :  { %v3640_v35 = vpop.eup %3639 }
0x15be   :  { %975 = vrot.lane.b32.xlu0 %v3640_v35, %s3852_s2 }
0x1630   :  { %v976_v36 = vpop.permute.xlu0 %975 }
0x1631   :  { %v4163_v38 = vmul.f32 %v976_v36, %v958_v28 }
0x1633   :  { %v985_v39 = vpack.c.bf16 %v4163_v38, %v4163_v38 }
0x1635   :  { %v987_v40 = vrot.slane %v985_v39, 2 }
0x1637   :  { %988 = vrot.lane.b32.xlu1 %v987_v40, %s3853_s4 }
0x16a9   :  { %v989_v42 = vpop.permute.xlu1 %988 }
0x16aa   :  { %3333 = vmatmul.mubr.msk.bf16.vlgmr.msra.gmra.mrb[20].mxu1 %vm143_vm5, %v989_v42 }
0x16ab   :  { %3345 = vmatpush3.bf16.msra.mxu1 %v4090_v59  ;;  %3348 = vmatprep.mubr.msk.bf16.mxu1 %vm3851_vm1, %v3849_v1 }
0x16ac   :  { %3346 = vmatprep.subr.bf16.mxu1 %v3849_v1 }
0x16af   :  { %3347 = vmatpush3.bf16.msra.mxu1 %v4097_v62 }
0x16b0   :  { %3360 = vmatprep.subr.bf16.mxu1 %v3849_v1 }
0x177d   :  { %v1027_v43 = vpop.f32.mrb[20].mxu1 }
0x177e   :  { %v1034_v44 = vrot.slane %v1027_v43, 6  ;;  %v3334_v45 = vpop.f32.mrb[21].mxu1 }
0x177f   :  { %v1030_v2 = vpop.f32.mrb[22].mxu1 }
0x1780   :  { %v1036_v47 = vadd.f32 %v1034_v44, %v4114_v18  ;;  %v3335_v48 = vpop.f32.mrb[23].mxu1 }
0x1782   :  { %v3085_v6 = vmul.f32 -1.442695, %v1036_v47 }
0x1784   :  { %3641 = vpow2.f32 %v3085_v6 }
0x1785   :  { %3643 = vtanh.f32 %v1036_v47 }
0x178e   :  { %v3642_v49 = vpop.eup %3641 }
0x178f   :  { %v1041_v50 = vadd.f32 1.0, %v3642_v49  ;;  %v3644_v52 = vpop.eup %3643 }
0x1791   :  { %3645 = vrcp.f32 %v1041_v50 }
0x179b   :  { %v3646_v53 = vpop.eup %3645 }
0x179c   :  { %v1044_v54 = vsel %vm3980_vm4, %v3644_v52, %v3646_v53 }
0x179d   :  { %1050 = vrot.lane.b32.xlu0 %v1044_v54, %s3852_s2  ;;  %v1048_v60 = vmul.f32 %v1046_v58, %v1044_v54 }
0x180f   :  { %v1051_v56 = vpop.permute.xlu0 %1050 }
0x1810   :  { %v1053_v57 = vmul.f32 %v1051_v56, %v1044_v54 }
0x1812   :  { %1055 = vrot.lane.b32.xlu1 %v1053_v57, %s3853_s4 }
0x1884   :  { %v1056_v4 = vpop.permute.xlu1 %1055 }
0x1885   :  { %v1058_v5 = vadd.f32 %v1056_v4, %v1048_v60 }
0x1887   :  { %3647 = vtanh.f32 %v1058_v5 }
0x1891   :  { %v3648_v7 = vpop.eup %3647 }
0x1892   :  { %1061 = vrot.lane.b32.xlu0 %v3648_v7, %s3852_s2 }
0x1904   :  { %v1062_v10 = vpop.permute.xlu0 %1061 }
0x1905   :  { %v4181_v12 = vmul.f32 %v1062_v10, %v1044_v54 }
0x1907   :  { %v1071_v14 = vpack.c.bf16 %v4181_v12, %v4181_v12 }
0x1909   :  { %v1073_v16 = vrot.slane %v1071_v14, 1 }
0x190b   :  { %1074 = vrot.lane.b32.xlu1 %v1073_v16, %s3853_s4 }
0x197d   :  { %v1075_v21 = vpop.permute.xlu1 %1074 }
0x197e   :  { %3341 = vmatmul.mubr.msk.bf16.vlgmr.msra.gmra.mrb[24].mxu0 %vm143_vm5, %v1075_v21 }
0x197f   :  { %3353 = vmatpush3.bf16.msra.mxu0 %v4090_v59  ;;  %3356 = vmatprep.mubr.msk.bf16.mxu0 %vm3851_vm1, %v3849_v1 }
0x1980   :  { %3354 = vmatprep.subr.bf16.mxu0 %v3849_v1 }
0x1983   :  { %3355 = vmatpush3.bf16.msra.mxu0 %v4097_v62 }
0x1984   :  { %3368 = vmatprep.subr.bf16.mxu0 %v3849_v1 }
0x1a51   :  { %v1113_v22 = vpop.f32.mrb[24].mxu0 }
0x1a52   :  { %v1119_v23 = vadd.f32 %v1113_v22, %v4114_v18  ;;  %v3342_v24 = vpop.f32.mrb[25].mxu0  ;;  %v1129_v18 = vrot.slane %v1058_v5, 2 }
0x1a53   :  { %v1116_v25 = vpop.f32.mrb[26].mxu0 }
0x1a54   :  { %v3087_v26 = vmul.f32 -1.442695, %v1119_v23  ;;  %v3343_v27 = vpop.f32.mrb[27].mxu0 }
0x1a56   :  { %3649 = vpow2.f32 %v3087_v26 }
0x1a57   :  { %3651 = vtanh.f32 %v1119_v23 }
0x1a60   :  { %v3650_v28 = vpop.eup %3649 }
0x1a61   :  { %v1124_v29 = vadd.f32 1.0, %v3650_v28  ;;  %v3652_v31 = vpop.eup %3651 }
0x1a63   :  { %3653 = vrcp.f32 %v1124_v29 }
0x1a6d   :  { %v3654_v32 = vpop.eup %3653 }
0x1a6e   :  { %v1127_v33 = vsel %vm3980_vm4, %v3652_v31, %v3654_v32 }
0x1a6f   :  { %1133 = vrot.lane.b32.xlu0 %v1127_v33, %s3852_s2  ;;  %v1131_v35 = vmul.f32 %v1129_v18, %v1127_v33 }
0x1ae1   :  { %v1134_v13 = vpop.permute.xlu0 %1133 }
0x1ae2   :  { %v1136_v20 = vmul.f32 %v1134_v13, %v1127_v33 }
0x1ae4   :  { %1138 = vrot.lane.b32.xlu1 %v1136_v20, %s3853_s4 }
0x1b56   :  { %v1139_v36 = vpop.permute.xlu1 %1138 }
0x1b57   :  { %v1141_v39 = vadd.f32 %v1139_v36, %v1131_v35 }
0x1b59   :  { %3655 = vtanh.f32 %v1141_v39  ;;  %v1214_v5 = vrot.slane %v1141_v39, 2 }
0x1b63   :  { %v3656_v40 = vpop.eup %3655 }
0x1b64   :  { %1144 = vrot.lane.b32.xlu0 %v3656_v40, %s3852_s2 }
0x1bd6   :  { %v1145_v42 = vpop.permute.xlu0 %1144 }
0x1bd7   :  { %v4199_v43 = vmul.f32 %v1145_v42, %v1127_v33 }
0x1bd9   :  { %v1154_v44 = vpack.c.bf16 %v4199_v43, %v4199_v43 }
0x1bdb   :  { %1156 = vrot.lane.b32.xlu1 %v1154_v44, %s3853_s4 }
0x1c4d   :  { %v1157_v45 = vpop.permute.xlu1 %1156 }
0x1c4e   :  { %3349 = vmatmul.mubr.msk.bf16.vlgmr.msra.gmra.mrb[24].mxu1 %vm143_vm5, %v1157_v45 }
0x1c4f   :  { %3361 = vmatpush3.bf16.msra.mxu1 %v4090_v59  ;;  %3364 = vmatprep.mubr.msk.bf16.mxu1 %vm3851_vm1, %v3849_v1 }
0x1c50   :  { %3362 = vmatprep.subr.bf16.mxu1 %v3849_v1 }
0x1c53   :  { %3363 = vmatpush3.bf16.msra.mxu1 %v4097_v62 }
0x1d21   :  { %v1195_v2 = vpop.f32.mrb[24].mxu1 }
0x1d22   :  { %v1202_v47 = vrot.slane %v1195_v2, 2  ;;  %v3350_v48 = vpop.f32.mrb[25].mxu1 }
0x1d23   :  { %v1198_v6 = vpop.f32.mrb[26].mxu1 }
0x1d24   :  { %v1204_v49 = vadd.f32 %v1202_v47, %v3973_v17  ;;  %v3351_v50 = vpop.f32.mrb[27].mxu1 }
0x1d26   :  { %v3089_v52 = vmul.f32 -1.442695, %v1204_v49 }
0x1d28   :  { %3657 = vpow2.f32 %v3089_v52 }
0x1d29   :  { %3659 = vtanh.f32 %v1204_v49 }
0x1d32   :  { %v3658_v53 = vpop.eup %3657 }
0x1d33   :  { %v1209_v54 = vadd.f32 1.0, %v3658_v53  ;;  %v3660_v56 = vpop.eup %3659 }
0x1d35   :  { %3661 = vrcp.f32 %v1209_v54 }
0x1d3f   :  { %v3662_v57 = vpop.eup %3661 }
0x1d40   :  { %v1212_v58 = vsel %vm3980_vm4, %v3660_v56, %v3662_v57 }
0x1d41   :  { %1218 = vrot.lane.b32.xlu0 %v1212_v58, %s3852_s2  ;;  %v1216_v7 = vmul.f32 %v1214_v5, %v1212_v58 }
0x1db3   :  { %v1219_v60 = vpop.permute.xlu0 %1218 }
0x1db4   :  { %v1221_v4 = vmul.f32 %v1219_v60, %v1212_v58 }
0x1db6   :  { %1223 = vrot.lane.b32.xlu1 %v1221_v4, %s3853_s4 }
0x1e28   :  { %v1224_v10 = vpop.permute.xlu1 %1223 }
0x1e29   :  { %v1226_v14 = vadd.f32 %v1224_v10, %v1216_v7 }
0x1e2b   :  { %3663 = vtanh.f32 %v1226_v14  ;;  %v1299_v39 = vrot.slane %v1226_v14, 2 }
0x1e35   :  { %v3664_v16 = vpop.eup %3663 }
0x1e36   :  { %1229 = vrot.lane.b32.xlu0 %v3664_v16, %s3852_s2 }
0x1ea8   :  { %v1230_v21 = vpop.permute.xlu0 %1229 }
0x1ea9   :  { %v4216_v22 = vmul.f32 %v1230_v21, %v1212_v58  ;;  %v776_v21 = vrot.slane %v4155_v63, 2 }
0x1eab   :  { %v1238_v23 = vpack.c.bf16 %v4216_v22, %v4216_v22 }
0x1ead   :  { %v1240_v24 = vrot.slane %v1238_v23, 3  ;;  %v778_v23 = vadd.f32 %v776_v21, %v3975_v19  ;;  %v3561_v21 = vld [vmem:[%s4658_s5 + $0x24] ss:$8 sps:$4 sm:$0xff]  }
0x1eaf   :  { %1241 = vrot.lane.b32.xlu1 %v1240_v24, %s3853_s4  ;;  %v3078_v24 = vmul.f32 -1.442695, %v778_v23 }
0x1f21   :  { %v1242_v25 = vpop.permute.xlu1 %1241 }
0x1f22   :  { %3357 = vmatmul.mubr.msk.bf16.vlgmr.msra.gmra.mrb[28].mxu0 %vm143_vm5, %v1242_v25 }
0x1f23   :  { %3369 = vmatpush3.bf16.msra.mxu0 %v4090_v59  ;;  %3372 = vmatprep.mubr.msk.bf16.mxu0 %vm3851_vm1, %v3849_v1 }
0x1f24   :  { %3370 = vmatprep.subr.bf16.mxu0 %v3849_v1 }
0x1f27   :  { %3371 = vmatpush3.bf16.msra.mxu0 %v4097_v62 }
0x1f28   :  { %3376 = vmatprep.subr.bf16.mxu0 %v3849_v1 }
0x1ff5   :  { %v1280_v26 = vpop.f32.mrb[28].mxu0 }
0x1ff6   :  { %v1287_v27 = vrot.slane %v1280_v26, 4  ;;  %v3358_v28 = vpop.f32.mrb[29].mxu0 }
0x1ff7   :  { %v1283_v29 = vpop.f32.mrb[30].mxu0 }
0x1ff8   :  { %v1289_v31 = vadd.f32 %v1287_v27, %v3973_v17  ;;  %v3359_v32 = vpop.f32.mrb[31].mxu0 }
0x1ffa   :  { %v3091_v33 = vmul.f32 -1.442695, %v1289_v31 }
0x1ffc   :  { %3665 = vpow2.f32 %v3091_v33 }
0x1ffd   :  { %3667 = vtanh.f32 %v1289_v31 }
0x2006   :  { %v3666_v13 = vpop.eup %3665 }
0x2007   :  { %v1294_v59 = vadd.f32 1.0, %v3666_v13  ;;  %v3668_v20 = vpop.eup %3667 }
0x2009   :  { %3669 = vrcp.f32 %v1294_v59 }
0x2013   :  { %v3670_v18 = vpop.eup %3669 }
0x2014   :  { %v1297_v62 = vsel %vm3980_vm4, %v3668_v20, %v3670_v18 }
0x2015   :  { %1303 = vrot.lane.b32.xlu0 %v1297_v62, %s3852_s2  ;;  %v1301_v40 = vmul.f32 %v1299_v39, %v1297_v62 }
0x2087   :  { %v1304_v35 = vpop.permute.xlu0 %1303 }
0x2088   :  { %v1306_v36 = vmul.f32 %v1304_v35, %v1297_v62 }
0x208a   :  { %1308 = vrot.lane.b32.xlu1 %v1306_v36, %s3853_s4  ;;  %v788_v36 = vrot.slane %v4126_v46, 6 }
0x20fc   :  { %v1309_v42 = vpop.permute.xlu1 %1308 }
0x20fd   :  { %v1311_v44 = vadd.f32 %v1309_v42, %v1301_v40 }
0x20ff   :  { %3671 = vtanh.f32 %v1311_v44  ;;  %v1384_v26 = vrot.slane %v1311_v44, 2 }
0x2109   :  { %v3672_v45 = vpop.eup %3671 }
0x210a   :  { %1314 = vrot.lane.b32.xlu0 %v3672_v45, %s3852_s2 }
0x217c   :  { %v1315_v2 = vpop.permute.xlu0 %1314 }
0x217d   :  { %v4234_v47 = vmul.f32 %v1315_v2, %v1297_v62 }
0x217f   :  { %v1323_v48 = vpack.c.bf16 %v4234_v47, %v4234_v47 }
0x2181   :  { %v1325_v6 = vrot.slane %v1323_v48, 2 }
0x2183   :  { %1326 = vrot.lane.b32.xlu1 %v1325_v6, %s3853_s4 }
0x21f5   :  { %v1327_v49 = vpop.permute.xlu1 %1326 }
0x21f6   :  { %3365 = vmatmul.mubr.msk.bf16.vlgmr.msra.gmra.mrb[28].mxu1 %vm143_vm5, %v1327_v49 }
0x21f7   :  { %1597 = vmatprep.mubr.bf16.mxu1 %v3850_v3 }
0x22c9   :  { %v1365_v50 = vpop.f32.mrb[28].mxu1 }
0x22ca   :  { %v1372_v52 = vrot.slane %v1365_v50, 6  ;;  %v3366_v53 = vpop.f32.mrb[29].mxu1 }
0x22cb   :  { %v1368_v54 = vpop.f32.mrb[30].mxu1 }
0x22cc   :  { %v1374_v56 = vadd.f32 %v1372_v52, %v3973_v17  ;;  %v3367_v57 = vpop.f32.mrb[31].mxu1 }
0x22ce   :  { %v3093_v58 = vmul.f32 -1.442695, %v1374_v56 }
0x22d0   :  { %3673 = vpow2.f32 %v3093_v58 }
0x22d1   :  { %3675 = vtanh.f32 %v1374_v56 }
0x22da   :  { %v3674_v60 = vpop.eup %3673 }
0x22db   :  { %v1379_v4 = vadd.f32 1.0, %v3674_v60  ;;  %v3676_v5 = vpop.eup %3675 }
0x22dd   :  { %3677 = vrcp.f32 %v1379_v4 }
0x22de   :  { %3679 = vpow2.f32 %v3078_v24  ;;  %v3563_v24 = vld [vmem:[%s4658_s5 + $0x30] ss:$8 sps:$4 sm:$0xff]  }
0x22e7   :  { %v3678_v7 = vpop.eup %3677 }
0x22e8   :  { %v1382_v10 = vsel %vm3980_vm4, %v3676_v5, %v3678_v7  ;;  %v3680_v25 = vpop.eup %3679 }
0x22e9   :  { %1388 = vrot.lane.b32.xlu0 %v1382_v10, %s3852_s2  ;;  %v1386_v27 = vmul.f32 %v1384_v26, %v1382_v10  ;;  %v783_v28 = vadd.f32 1.0, %v3680_v25 }
0x235b   :  { %v1389_v14 = vpop.permute.xlu0 %1388 }
0x235c   :  { %v1391_v16 = vmul.f32 %v1389_v14, %v1382_v10  ;;  %v3555_v14 = vld [vmem:[%s4658_s5 + $0x4] ss:$8 sps:$4 sm:$0xff]  }
0x235d   :  { %1565 = vmatprep.subr.bf16.mxu1 %v3555_v14 }
0x235e   :  { %1393 = vrot.lane.b32.xlu1 %v1391_v16, %s3853_s4  ;;  %v3559_v16 = vld [vmem:[%s4658_s5 + $0x20] ss:$8 sps:$4 sm:$0xff]  }
0x23d0   :  { %v1394_v29 = vpop.permute.xlu1 %1393 }
0x23d1   :  { %v4248_v31 = vadd.f32 %v1394_v29, %v1386_v27 }
0x23d3   :  { %3681 = vtanh.f32 %v4248_v31 }
0x23d4   :  { %3683 = vrcp.f32 %v783_v28 }
0x23d5   :  { %3685 = vtanh.f32 %v778_v23 }
0x23dd   :  { %v3682_v32 = vpop.eup %3681 }
0x23de   :  { %v3684_v33 = vpop.eup %3683  ;;  %1399 = vrot.lane.b32.xlu0 %v3682_v32, %s3852_s2 }
0x23df   :  { %v3686_v63 = vpop.eup %3685 }
0x23e0   :  { %v4254_v19 = vsel %vm3980_vm4, %v3686_v63, %v3684_v33 }
0x23e1   :  { %v790_v39 = vmul.f32 %v788_v36, %v4254_v19 }
0x23e2   :  { %792 = vrot.lane.b32.xlu0 %v4254_v19, %s3852_s2 }
0x2450   :  { %v1400_v13 = vpop.permute.xlu0 %1399 }
0x2451   :  { %v1402_v59 = vmul.f32 %v1400_v13, %v1382_v10  ;;  %v3553_v10 = vld [vmem:[%s4658_s5] ss:$8 sps:$4 sm:$0xff]  }
0x2452   :  { %1566 = vmatpush1.bf16.msra.mxu1 %v3553_v10 }
0x2453   :  { %v1408_v20 = vpack.c.bf16 %v1402_v59, %v1402_v59 }
0x2454   :  { %v793_v18 = vpop.permute.xlu0 %792 }
0x2455   :  { %v1410_v62 = vrot.slane %v1408_v20, 1  ;;  %v795_v35 = vmul.f32 %v793_v18, %v4254_v19 }
0x2457   :  { %1411 = vrot.lane.b32.xlu1 %v1410_v62, %s3853_s4  ;;  %797 = vrot.lane.b32.xlu0 %v795_v35, %s3853_s4 }
0x24c9   :  { %v1412_v40 = vpop.permute.xlu1 %1411  ;;  %v798_v42 = vpop.permute.xlu0 %797 }
0x24ca   :  { %v800_v44 = vadd.f32 %v798_v42, %v790_v39  ;;  %3373 = vmatmul.mubr.msk.bf16.vlgmr.msra.gmra.mrb[32].mxu0 %vm143_vm5, %v1412_v40  ;;  %v1509_v42 = vld [vmem:[%s4661_s8] sm:$0x3] }
0x24cb   :  { %3380 = vmatprep.mubr.msk.bf16.mxu0 %vm3851_vm1, %v3849_v1 }
0x24cc   :  { %3687 = vtanh.f32 %v800_v44  ;;  %v1514_v44 = vrot.slane %v1509_v42, %v61_v9 }
0x24d6   :  { %v3688_v45 = vpop.eup %3687 }
0x24d7   :  { %803 = vrot.lane.b32.xlu0 %v3688_v45, %s3852_s2  ;;  %v4363_v45 = vrot.slane %v1509_v42, %v65_v11 }
0x24db   :  { %214 = vrot.lane.b32.xlu0 %v3989_v41, %s3853_s4 }
0x24df   :  { %385 = vrot.lane.b32.xlu0 %v4025_v37, %s3853_s4 }
0x24e3   :  { %554 = vrot.lane.b32.xlu0 %v4061_v34, %s3853_s4 }
0x24e7   :  { %723 = vrot.lane.b32.xlu0 %v4131_v51, %s3853_s4 }
0x24eb   :  { %894 = vrot.lane.b32.xlu0 %v4136_v55, %s3852_s2 }
0x24ef   :  { %1066 = vrot.lane.b32.xlu0 %v4181_v12, %s3852_s2 }
0x24f3   :  { %1234 = vrot.lane.b32.xlu0 %v4216_v22, %s3852_s2 }
0x24f7   :  { %1404 = vrot.lane.b32.xlu0 %v1402_v59, %s3852_s2 }
0x2549   :  { %v804_v41 = vpop.permute.xlu0 %803 }
0x254a   :  { %v806_v7 = vmul.f32 %v804_v41, %v4254_v19 }
0x254d   :  { %v215_v37 = vpop.permute.xlu0 %214 }
0x254e   :  { %218 = vst.msk [vmem:[#allocation2] sm:$0x3] %vm217_vm6, %v215_v37 }
0x2551   :  { %v386_v34 = vpop.permute.xlu0 %385 }
0x2552   :  { %389 = vst.msk [vmem:[#allocation2] sm:$0x30] %vm388_vm7, %v386_v34 }
0x2555   :  { %v555_v46 = vpop.permute.xlu0 %554 }
0x2556   :  { %557 = vst.msk [vmem:[#allocation2 + $0x8] sm:$0x3] %vm217_vm6, %v555_v46 }
0x2559   :  { %v724_v51 = vpop.permute.xlu0 %723 }
0x255a   :  { %726 = vst.msk [vmem:[#allocation2 + $0x8] sm:$0x30] %vm388_vm7, %v724_v51 }
0x259d   :  { %v1450_v55 = vpop.f32.mrb[32].mxu0 }
0x259e   :  { %v1456_v2 = vadd.f32 %v1450_v55, %v3973_v17  ;;  %v3374_v12 = vpop.f32.mrb[33].mxu0  ;;  %v1466_v17 = vrot.slane %v4248_v31, 2 }
0x259f   :  { %v1453_v48 = vpop.f32.mrb[34].mxu0 }
0x25a0   :  { %v3095_v6 = vmul.f32 -1.442695, %v1456_v2  ;;  %v3375_v22 = vpop.f32.mrb[35].mxu0 }
0x25a2   :  { %3689 = vpow2.f32 %v3095_v6 }
0x25a3   :  { %3691 = vtanh.f32 %v1456_v2 }
0x25ac   :  { %v3690_v49 = vpop.eup %3689 }
0x25ad   :  { %v1461_v50 = vadd.f32 1.0, %v3690_v49  ;;  %v3692_v52 = vpop.eup %3691 }
0x25af   :  { %3693 = vrcp.f32 %v1461_v50 }
0x25b9   :  { %v3694_v53 = vpop.eup %3693 }
0x25ba   :  { %v1464_v54 = vsel %vm3980_vm4, %v3692_v52, %v3694_v53 }
0x25bb   :  { %1470 = vrot.lane.b32.xlu1 %v1464_v54, %s3852_s2  ;;  %v1468_v58 = vmul.f32 %v1466_v17, %v1464_v54 }
0x262d   :  { %v1471_v56 = vpop.permute.xlu1 %1470 }
0x262e   :  { %v1473_v57 = vmul.f32 %v1471_v56, %v1464_v54 }
0x2630   :  { %1475 = vrot.lane.b32.xlu1 %v1473_v57, %s3853_s4 }
0x26a2   :  { %v1476_v60 = vpop.permute.xlu1 %1475 }
0x26a3   :  { %v1478_v4 = vadd.f32 %v1476_v60, %v1468_v58 }
0x26a5   :  { %3695 = vtanh.f32 %v1478_v4 }
0x26af   :  { %v3696_v5 = vpop.eup %3695 }
0x26b0   :  { %1481 = vrot.lane.b32.xlu1 %v3696_v5, %s3852_s2 }
0x26b4   :  { %299 = vrot.lane.b32.xlu1 %v4007_v0, %s3853_s4  ;;  %v3558_v0 = vld [vmem:[%s4658_s5 + $0x14] ss:$8 sps:$4 sm:$0xff]  }
0x26b5   :  { %1567 = vmatprep.subr.bf16.mxu1 %v3558_v0 }
0x26b8   :  { %471 = vrot.lane.b32.xlu1 %v4043_v61, %s3853_s4  ;;  %v3556_v61 = vld [vmem:[%s4658_s5 + $0x10] ss:$8 sps:$4 sm:$0xff]  }
0x26b9   :  { %1568 = vmatpush1.bf16.msra.mxu1 %v3556_v61 }
0x26ba   :  { %1569 = vmatprep.subr.bf16.mxu1 %v3561_v21 }
0x26bc   :  { %638 = vrot.lane.b32.xlu1 %v4082_v15, %s3853_s4  ;;  %v895_v15 = vpop.permute.xlu0 %894 }
0x26bd   :  { %1570 = vmatpush1.bf16.msra.mxu1 %v3559_v16 }
0x26c0   :  { %808 = vrot.lane.b32.xlu1 %v806_v7, %s3853_s4  ;;  %v1067_v23 = vpop.permute.xlu0 %1066 }
0x26c4   :  { %980 = vrot.lane.b32.xlu1 %v4163_v38, %s3852_s2  ;;  %v4324_v38 = vld [vmem:[%s4659_s6] sm:$0xff]   ;;  %v1235_v25 = vpop.permute.xlu0 %1234 }
0x26c5   :  { %3377 = vmatpush3.bf16.msra.mxu0 %v4324_v38 }
0x26c6   :  { %3378 = vmatprep.subr.bf16.mxu0 %v3849_v1 }
0x26c8   :  { %1149 = vrot.lane.b32.xlu1 %v4199_v43, %s3852_s2  ;;  %v3565_v43 = vld [vmem:[%s4658_s5 + $0x34] ss:$8 sps:$4 sm:$0xff]   ;;  %v1405_v29 = vpop.permute.xlu0 %1404 }
0x26c9   :  { %1571 = vmatprep.subr.bf16.mxu1 %v3565_v43 }
0x26ca   :  { %1572 = vmatpush1.bf16.msra.mxu1 %v3563_v24 }
0x26cb   :  { %3392 = vmatprep.subr.bf16.mxu1 %v3849_v1 }
0x26cc   :  { %1319 = vrot.lane.b32.xlu1 %v4234_v47, %s3852_s2  ;;  %v4333_v47 = vld [vmem:[%s4659_s6 + $0x8] sm:$0xff]  }
0x26cd   :  { %3379 = vmatpush3.bf16.msra.mxu0 %v4333_v47 }
0x26ce   :  { %3384 = vmatprep.subr.bf16.mxu0 %v3849_v1 }
0x26d0   :  { %3381 = vmatmul.mubr.bf16.vlgmr.msra.gmra.mrb[36].mxu0 %v3850_v3 }
0x26d1   :  { %3385 = vmatpush3.bf16.msra.mxu0 %v4324_v38  ;;  %3388 = vmatprep.mubr.msk.bf16.mxu0 %vm3851_vm1, %v3849_v1 }
0x26d2   :  { %3386 = vmatprep.subr.bf16.mxu0 %v3849_v1 }
0x26d5   :  { %3387 = vmatpush3.bf16.msra.mxu0 %v4333_v47 }
0x26d6   :  { %3400 = vmatprep.subr.bf16.mxu0 %v3849_v1 }
0x2722   :  { %v1482_v26 = vpop.permute.xlu1 %1481 }
0x2723   :  { %v1484_v27 = vmul.f32 %v1482_v26, %v1464_v54 }
0x2725   :  { %1486 = vrot.lane.b32.xlu1 %v1484_v27, %s3852_s2 }
0x2726   :  { %v300_v28 = vpop.permute.xlu1 %299 }
0x2727   :  { %303 = vst.msk [vmem:[#allocation2] sm:$0xc] %vm302_vm8, %v300_v28 }
0x2728   :  { %1407 = vst.msk [vmem:[#allocation2] sm:$0xc] %vm1069_vm9, %v1405_v29 }
0x272a   :  { %v472_v31 = vpop.permute.xlu1 %471 }
0x272b   :  { %475 = vst.msk [vmem:[#allocation2] sm:$0xc0] %vm474_vm10, %v472_v31 }
0x272c   :  { %1237 = vst.msk [vmem:[#allocation2] sm:$0xc0] %vm897_vm11, %v1235_v25 }
0x272e   :  { %v639_v32 = vpop.permute.xlu1 %638 }
0x272f   :  { %641 = vst.msk [vmem:[#allocation2 + $0x8] sm:$0xc] %vm302_vm8, %v639_v32 }
0x2730   :  { %1070 = vst.msk [vmem:[#allocation2 + $0x8] sm:$0xc] %vm1069_vm9, %v1067_v23 }
0x2732   :  { %v809_v33 = vpop.permute.xlu1 %808 }
0x2733   :  { %811 = vst.msk [vmem:[#allocation2 + $0x8] sm:$0xc0] %vm474_vm10, %v809_v33 }
0x2734   :  { %898 = vst.msk [vmem:[#allocation2 + $0x8] sm:$0xc0] %vm897_vm11, %v895_v15 }
0x2736   :  { %v981_v63 = vpop.permute.xlu1 %980 }
0x2737   :  { %984 = vst.msk [vmem:[#allocation2 + $0x8] sm:$0x30] %vm983_vm12, %v981_v63 }
0x273a   :  { %v1150_v19 = vpop.permute.xlu1 %1149 }
0x273b   :  { %1153 = vst.msk [vmem:[#allocation2 + $0x8] sm:$0x3] %vm1152_vm13, %v1150_v19 }
0x273e   :  { %v1320_v13 = vpop.permute.xlu1 %1319 }
0x273f   :  { %1322 = vst.msk [vmem:[#allocation2] sm:$0x30] %vm983_vm12, %v1320_v13 }
0x2742   :  { %v1491_v18 = vld [vmem:[#allocation2 + $0x8] sm:$0xff] }
0x2797   :  { %v1487_v59 = vpop.permute.xlu1 %1486 }
0x2798   :  { %1489 = vst.msk [vmem:[#allocation2] sm:$0x3] %vm1152_vm13, %v1487_v59 }
0x279f   :  { %v1490_v20 = vld [vmem:[#allocation2] sm:$0xff] }
0x27a0   :  { %v1492_v62 = vpack.c.bf16 %v1491_v18, %v1490_v20 }
0x27a2   :  { %3104 = vmatmul.mubr.msk.bf16.vlgmr.msra.gmra.mrb[32].mxu1 %vm1561_vm14, %v1492_v62 }
0x27a3   :  { %3393 = vmatpush3.bf16.msra.mxu1 %v4324_v38  ;;  %3396 = vmatprep.mubr.msk.bf16.mxu1 %vm3851_vm1, %v3849_v1  ;;  %v1654_v35 = vpop.f32.mrb[36].mxu0 }
0x27a4   :  { %3394 = vmatprep.subr.bf16.mxu1 %v3849_v1  ;;  %v3382_v36 = vpop.f32.mrb[37].mxu0 }
0x27a5   :  { %v1657_v39 = vpop.f32.mrb[38].mxu0 }
0x27a6   :  { %v3383_v40 = vpop.f32.mrb[39].mxu0 }
0x27a7   :  { %3395 = vmatpush3.bf16.msra.mxu1 %v4333_v47 }
0x27a8   :  { %3408 = vmatprep.subr.bf16.mxu1 %v3849_v1 }
0x2875   :  { %v1599_v41 = vpop.f32.mrb[32].mxu1 }
0x2876   :  { %v4365_v37 = vadd.f32 %v1599_v41, %v1514_v44  ;;  %v1601_v34 = vpop.f32.mrb[33].mxu1 }
0x2877   :  { %v4368_v46 = vadd.f32 %v1601_v34, %v4363_v45  ;;  %v1603_v51 = vpop.f32.mrb[34].mxu1 }
0x2878   :  { %v1660_v55 = vadd.f32 %v1654_v35, %v4365_v37  ;;  %v4371_v2 = vadd.f32 %v1603_v51, %v1514_v44  ;;  %v4373_v12 = vpop.f32.mrb[35].mxu1 }
0x287a   :  { %v3107_v48 = vmul.f32 -1.442695, %v1660_v55 }
0x287c   :  { %3697 = vpow2.f32 %v3107_v48 }
0x287d   :  { %3699 = vtanh.f32 %v1660_v55 }
0x2886   :  { %v3698_v9 = vpop.eup %3697 }
0x2887   :  { %v1665_v8 = vadd.f32 1.0, %v3698_v9  ;;  %v3700_v11 = vpop.eup %3699 }
0x2889   :  { %3701 = vrcp.f32 %v1665_v8 }
0x2893   :  { %v3702_v6 = vpop.eup %3701 }
0x2894   :  { %v1668_v22 = vsel %vm3980_vm4, %v3700_v11, %v3702_v6 }
0x2895   :  { %1671 = vrot.lane.b32.xlu0 %v1668_v22, %s3852_s2  ;;  %v1669_v52 = vmul.f32 0.0, %v1668_v22 }
0x2907   :  { %v1672_v49 = vpop.permute.xlu0 %1671 }
0x2908   :  { %v1674_v50 = vmul.f32 %v1672_v49, %v1668_v22 }
0x290a   :  { %1676 = vrot.lane.b32.xlu1 %v1674_v50, %s3853_s4 }
0x297c   :  { %v1677_v53 = vpop.permute.xlu1 %1676 }
0x297d   :  { %v1679_v54 = vadd.f32 %v1677_v53, %v1669_v52 }
0x297f   :  { %3703 = vtanh.f32 %v1679_v54  ;;  %v1746_v26 = vrot.slane %v1679_v54, 6 }
0x2989   :  { %v3704_v56 = vpop.eup %3703 }
0x298a   :  { %1682 = vrot.lane.b32.xlu0 %v3704_v56, %s3852_s2 }
0x29fc   :  { %v1683_v57 = vpop.permute.xlu0 %1682 }
0x29fd   :  { %v1685_v17 = vmul.f32 %v1683_v57, %v1668_v22 }
0x29ff   :  { %v1686_v58 = vpack.c.bf16 %v1685_v17, %v1685_v17 }
0x2a01   :  { %1688 = vrot.lane.b32.xlu1 %v1686_v58, %s3853_s4 }
0x2a73   :  { %v1689_v60 = vpop.permute.xlu1 %1688 }
0x2a74   :  { %3389 = vmatmul.mubr.msk.bf16.vlgmr.msra.gmra.mrb[40].mxu0 %vm143_vm5, %v1689_v60 }
0x2a75   :  { %3401 = vmatpush3.bf16.msra.mxu0 %v4324_v38  ;;  %3404 = vmatprep.mubr.msk.bf16.mxu0 %vm3851_vm1, %v3849_v1 }
0x2a76   :  { %3402 = vmatprep.subr.bf16.mxu0 %v3849_v1 }
0x2a79   :  { %3403 = vmatpush3.bf16.msra.mxu0 %v4333_v47 }
0x2a7a   :  { %3416 = vmatprep.subr.bf16.mxu0 %v3849_v1 }
0x2b47   :  { %v1727_v4 = vpop.f32.mrb[40].mxu0 }
0x2b48   :  { %v1734_v5 = vrot.slane %v1727_v4, 6  ;;  %v3390_v7 = vpop.f32.mrb[41].mxu0 }
0x2b49   :  { %v1730_v10 = vpop.f32.mrb[42].mxu0 }
0x2b4a   :  { %v1736_v14 = vadd.f32 %v1734_v5, %v4365_v37  ;;  %v3391_v0 = vpop.f32.mrb[43].mxu0 }
0x2b4c   :  { %v3109_v61 = vmul.f32 -1.442695, %v1736_v14 }
0x2b4e   :  { %3705 = vpow2.f32 %v3109_v61 }
0x2b4f   :  { %3707 = vtanh.f32 %v1736_v14 }
0x2b58   :  { %v3706_v15 = vpop.eup %3705 }
0x2b59   :  { %v1741_v16 = vadd.f32 1.0, %v3706_v15  ;;  %v3708_v21 = vpop.eup %3707 }
0x2b5b   :  { %3709 = vrcp.f32 %v1741_v16 }
0x2b65   :  { %v3710_v43 = vpop.eup %3709 }
0x2b66   :  { %v1744_v23 = vsel %vm3980_vm4, %v3708_v21, %v3710_v43 }
0x2b67   :  { %1750 = vrot.lane.b32.xlu0 %v1744_v23, %s3852_s2  ;;  %v1748_v27 = vmul.f32 %v1746_v26, %v1744_v23 }
0x2bd9   :  { %v1751_v24 = vpop.permute.xlu0 %1750 }
0x2bda   :  { %v1753_v25 = vmul.f32 %v1751_v24, %v1744_v23 }
0x2bdc   :  { %1755 = vrot.lane.b32.xlu1 %v1753_v25, %s3853_s4 }
0x2c4e   :  { %v1756_v28 = vpop.permute.xlu1 %1755 }
0x2c4f   :  { %v1758_v29 = vadd.f32 %v1756_v28, %v1748_v27 }
0x2c51   :  { %3711 = vtanh.f32 %v1758_v29  ;;  %v1826_v48 = vrot.slane %v1758_v29, 6 }
0x2c5b   :  { %v3712_v31 = vpop.eup %3711 }
0x2c5c   :  { %1761 = vrot.lane.b32.xlu0 %v3712_v31, %s3852_s2 }
0x2cce   :  { %v1762_v32 = vpop.permute.xlu0 %1761 }
0x2ccf   :  { %v1764_v33 = vmul.f32 %v1762_v32, %v1744_v23 }
0x2cd1   :  { %v1765_v63 = vpack.c.bf16 %v1764_v33, %v1764_v33 }
0x2cd3   :  { %v1767_v19 = vrot.slane %v1765_v63, 1 }
0x2cd5   :  { %1768 = vrot.lane.b32.xlu1 %v1767_v19, %s3853_s4 }
0x2d47   :  { %v1769_v13 = vpop.permute.xlu1 %1768 }
0x2d48   :  { %3397 = vmatmul.mubr.msk.bf16.vlgmr.msra.gmra.mrb[36].mxu1 %vm143_vm5, %v1769_v13 }
0x2d49   :  { %3409 = vmatpush3.bf16.msra.mxu1 %v4324_v38  ;;  %3412 = vmatprep.mubr.msk.bf16.mxu1 %vm3851_vm1, %v3849_v1 }
0x2d4a   :  { %3410 = vmatprep.subr.bf16.mxu1 %v3849_v1 }
0x2d4d   :  { %3411 = vmatpush3.bf16.msra.mxu1 %v4333_v47 }
0x2d4e   :  { %3424 = vmatprep.subr.bf16.mxu1 %v3849_v1 }
0x2e1b   :  { %v1807_v59 = vpop.f32.mrb[36].mxu1 }
0x2e1c   :  { %v1814_v20 = vrot.slane %v1807_v59, 4  ;;  %v3398_v18 = vpop.f32.mrb[37].mxu1 }
0x2e1d   :  { %v1810_v62 = vpop.f32.mrb[38].mxu1 }
0x2e1e   :  { %v1816_v35 = vadd.f32 %v1814_v20, %v4365_v37  ;;  %v3399_v36 = vpop.f32.mrb[39].mxu1 }
0x2e20   :  { %v3111_v39 = vmul.f32 -1.442695, %v1816_v35 }
0x2e22   :  { %3713 = vpow2.f32 %v3111_v39 }
0x2e23   :  { %3715 = vtanh.f32 %v1816_v35 }
0x2e2c   :  { %v3714_v40 = vpop.eup %3713 }
0x2e2d   :  { %v1821_v42 = vadd.f32 1.0, %v3714_v40  ;;  %v3716_v44 = vpop.eup %3715 }
0x2e2f   :  { %3717 = vrcp.f32 %v1821_v42 }
0x2e39   :  { %v3718_v41 = vpop.eup %3717 }
0x2e3a   :  { %v1824_v34 = vsel %vm3980_vm4, %v3716_v44, %v3718_v41 }
0x2e3b   :  { %1830 = vrot.lane.b32.xlu0 %v1824_v34, %s3852_s2  ;;  %v1828_v9 = vmul.f32 %v1826_v48, %v1824_v34 }
0x2ead   :  { %v1831_v51 = vpop.permute.xlu0 %1830 }
0x2eae   :  { %v1833_v55 = vmul.f32 %v1831_v51, %v1824_v34 }
0x2eb0   :  { %1835 = vrot.lane.b32.xlu1 %v1833_v55, %s3853_s4 }
0x2f22   :  { %v1836_v8 = vpop.permute.xlu1 %1835 }
0x2f23   :  { %v1838_v11 = vadd.f32 %v1836_v8, %v1828_v9 }
0x2f25   :  { %3719 = vtanh.f32 %v1838_v11  ;;  %v1906_v16 = vrot.slane %v1838_v11, 6 }
0x2f2f   :  { %v3720_v6 = vpop.eup %3719 }
0x2f30   :  { %1841 = vrot.lane.b32.xlu0 %v3720_v6, %s3852_s2 }
0x2fa2   :  { %v1842_v22 = vpop.permute.xlu0 %1841 }
0x2fa3   :  { %v1844_v49 = vmul.f32 %v1842_v22, %v1824_v34 }
0x2fa5   :  { %v1845_v50 = vpack.c.bf16 %v1844_v49, %v1844_v49 }
0x2fa7   :  { %v1847_v52 = vrot.slane %v1845_v50, 2 }
0x2fa9   :  { %1848 = vrot.lane.b32.xlu1 %v1847_v52, %s3853_s4 }
0x301b   :  { %v1849_v53 = vpop.permute.xlu1 %1848 }
0x301c   :  { %3405 = vmatmul.mubr.msk.bf16.vlgmr.msra.gmra.mrb[44].mxu0 %vm143_vm5, %v1849_v53 }
0x301d   :  { %3417 = vmatpush3.bf16.msra.mxu0 %v4324_v38  ;;  %3420 = vmatprep.mubr.msk.bf16.mxu0 %vm3851_vm1, %v3849_v1 }
0x301e   :  { %3418 = vmatprep.subr.bf16.mxu0 %v3849_v1 }
0x3021   :  { %3419 = vmatpush3.bf16.msra.mxu0 %v4333_v47 }
0x3022   :  { %3432 = vmatprep.subr.bf16.mxu0 %v3849_v1 }
0x30ef   :  { %v1887_v54 = vpop.f32.mrb[44].mxu0 }
0x30f0   :  { %v1894_v56 = vrot.slane %v1887_v54, 2  ;;  %v3406_v57 = vpop.f32.mrb[45].mxu0 }
0x30f1   :  { %v1890_v17 = vpop.f32.mrb[46].mxu0 }
0x30f2   :  { %v1896_v58 = vadd.f32 %v1894_v56, %v4365_v37  ;;  %v3407_v60 = vpop.f32.mrb[47].mxu0 }
0x30f4   :  { %v3113_v4 = vmul.f32 -1.442695, %v1896_v58 }
0x30f6   :  { %3721 = vpow2.f32 %v3113_v4 }
0x30f7   :  { %3723 = vtanh.f32 %v1896_v58 }
0x3100   :  { %v3722_v5 = vpop.eup %3721 }
0x3101   :  { %v1901_v7 = vadd.f32 1.0, %v3722_v5  ;;  %v3724_v10 = vpop.eup %3723 }
0x3103   :  { %3725 = vrcp.f32 %v1901_v7 }
0x310d   :  { %v3726_v14 = vpop.eup %3725 }
0x310e   :  { %v1904_v0 = vsel %vm3980_vm4, %v3724_v10, %v3726_v14 }
0x310f   :  { %1910 = vrot.lane.b32.xlu0 %v1904_v0, %s3852_s2  ;;  %v1908_v37 = vmul.f32 %v1906_v16, %v1904_v0  ;;  %v4464_v16 = vld [vmem:[%s4660_s7 + $0x8] sm:$0xff]  }
0x3181   :  { %v1911_v61 = vpop.permute.xlu0 %1910 }
0x3182   :  { %v1913_v15 = vmul.f32 %v1911_v61, %v1904_v0  ;;  %v4457_v61 = vld [vmem:[%s4660_s7] sm:$0xff]  }
0x3184   :  { %1915 = vrot.lane.b32.xlu1 %v1913_v15, %s3853_s4 }
0x31f6   :  { %v1916_v21 = vpop.permute.xlu1 %1915 }
0x31f7   :  { %v1918_v43 = vadd.f32 %v1916_v21, %v1908_v37 }
0x31f9   :  { %3727 = vtanh.f32 %v1918_v43  ;;  %v1983_v39 = vrot.slane %v1918_v43, 6 }
0x3203   :  { %v3728_v23 = vpop.eup %3727 }
0x3204   :  { %1921 = vrot.lane.b32.xlu0 %v3728_v23, %s3852_s2 }
0x3276   :  { %v1922_v24 = vpop.permute.xlu0 %1921 }
0x3277   :  { %v1924_v25 = vmul.f32 %v1922_v24, %v1904_v0 }
0x3279   :  { %v1925_v26 = vpack.c.bf16 %v1924_v25, %v1924_v25 }
0x327b   :  { %v1927_v27 = vrot.slane %v1925_v26, 3 }
0x327d   :  { %1928 = vrot.lane.b32.xlu1 %v1927_v27, %s3853_s4  ;;  %v4481_v27 = vadd.f32 %v4373_v12, %v4363_v45 }
0x32ef   :  { %v1929_v28 = vpop.permute.xlu1 %1928 }
0x32f0   :  { %3413 = vmatmul.mubr.msk.bf16.vlgmr.msra.gmra.mrb[40].mxu1 %vm143_vm5, %v1929_v28 }
0x32f1   :  { %3425 = vmatpush3.bf16.msra.mxu1 %v4324_v38  ;;  %3428 = vmatprep.mubr.msk.bf16.mxu1 %vm3851_vm1, %v3849_v1 }
0x32f2   :  { %3426 = vmatprep.subr.bf16.mxu1 %v3849_v1 }
0x32f5   :  { %3427 = vmatpush3.bf16.msra.mxu1 %v4333_v47 }
0x32f6   :  { %3440 = vmatprep.subr.bf16.mxu1 %v3849_v1 }
0x33c3   :  { %v1967_v29 = vpop.f32.mrb[40].mxu1 }
0x33c4   :  { %v1973_v31 = vadd.f32 %v1967_v29, %v4371_v2  ;;  %v3414_v32 = vpop.f32.mrb[41].mxu1 }
0x33c5   :  { %v1970_v33 = vpop.f32.mrb[42].mxu1 }
0x33c6   :  { %v3115_v63 = vmul.f32 -1.442695, %v1973_v31  ;;  %v3415_v19 = vpop.f32.mrb[43].mxu1 }
0x33c8   :  { %3729 = vpow2.f32 %v3115_v63 }
0x33c9   :  { %3731 = vtanh.f32 %v1973_v31 }
0x33d2   :  { %v3730_v13 = vpop.eup %3729 }
0x33d3   :  { %v1978_v59 = vadd.f32 1.0, %v3730_v13  ;;  %v3732_v20 = vpop.eup %3731 }
0x33d5   :  { %3733 = vrcp.f32 %v1978_v59 }
0x33df   :  { %v3734_v18 = vpop.eup %3733 }
0x33e0   :  { %v1981_v62 = vsel %vm3980_vm4, %v3732_v20, %v3734_v18 }
0x33e1   :  { %1987 = vrot.lane.b32.xlu0 %v1981_v62, %s3852_s2  ;;  %v1985_v40 = vmul.f32 %v1983_v39, %v1981_v62 }
0x3453   :  { %v1988_v35 = vpop.permute.xlu0 %1987 }
0x3454   :  { %v1990_v36 = vmul.f32 %v1988_v35, %v1981_v62 }
0x3456   :  { %1992 = vrot.lane.b32.xlu1 %v1990_v36, %s3853_s4 }
0x34c8   :  { %v1993_v42 = vpop.permute.xlu1 %1992 }
0x34c9   :  { %v1995_v44 = vadd.f32 %v1993_v42, %v1985_v40 }
0x34cb   :  { %3735 = vtanh.f32 %v1995_v44  ;;  %v2062_v17 = vrot.slane %v1995_v44, 6 }
0x34d5   :  { %v3736_v41 = vpop.eup %3735 }
0x34d6   :  { %1998 = vrot.lane.b32.xlu0 %v3736_v41, %s3852_s2 }
0x3548   :  { %v1999_v34 = vpop.permute.xlu0 %1998 }
0x3549   :  { %v2001_v51 = vmul.f32 %v1999_v34, %v1981_v62 }
0x354b   :  { %v2002_v55 = vpack.c.bf16 %v2001_v51, %v2001_v51 }
0x354d   :  { %2004 = vrot.lane.b32.xlu1 %v2002_v55, %s3853_s4 }
0x35bf   :  { %v2005_v48 = vpop.permute.xlu1 %2004 }
0x35c0   :  { %3421 = vmatmul.mubr.msk.bf16.vlgmr.msra.gmra.mrb[48].mxu0 %vm143_vm5, %v2005_v48 }
0x35c1   :  { %3433 = vmatpush3.bf16.msra.mxu0 %v4324_v38  ;;  %3436 = vmatprep.mubr.msk.bf16.mxu0 %vm3851_vm1, %v3849_v1 }
0x35c2   :  { %3434 = vmatprep.subr.bf16.mxu0 %v3849_v1 }
0x35c5   :  { %3435 = vmatpush3.bf16.msra.mxu0 %v4333_v47 }
0x35c6   :  { %3448 = vmatprep.subr.bf16.mxu0 %v3849_v1 }
0x3693   :  { %v2043_v9 = vpop.f32.mrb[48].mxu0 }
0x3694   :  { %v2050_v8 = vrot.slane %v2043_v9, 6  ;;  %v3422_v11 = vpop.f32.mrb[49].mxu0 }
0x3695   :  { %v2046_v6 = vpop.f32.mrb[50].mxu0 }
0x3696   :  { %v2052_v22 = vadd.f32 %v2050_v8, %v4371_v2  ;;  %v3423_v49 = vpop.f32.mrb[51].mxu0 }
0x3698   :  { %v3117_v50 = vmul.f32 -1.442695, %v2052_v22 }
0x369a   :  { %3737 = vpow2.f32 %v3117_v50 }
0x369b   :  { %3739 = vtanh.f32 %v2052_v22 }
0x36a4   :  { %v3738_v52 = vpop.eup %3737 }
0x36a5   :  { %v2057_v38 = vadd.f32 1.0, %v3738_v52  ;;  %v3740_v53 = vpop.eup %3739 }
0x36a7   :  { %3741 = vrcp.f32 %v2057_v38 }
0x36b1   :  { %v3742_v54 = vpop.eup %3741 }
0x36b2   :  { %v2060_v47 = vsel %vm3980_vm4, %v3740_v53, %v3742_v54 }
0x36b3   :  { %2066 = vrot.lane.b32.xlu0 %v2060_v47, %s3852_s2  ;;  %v2064_v58 = vmul.f32 %v2062_v17, %v2060_v47 }
0x3725   :  { %v2067_v56 = vpop.permute.xlu0 %2066 }
0x3726   :  { %v2069_v57 = vmul.f32 %v2067_v56, %v2060_v47 }
0x3728   :  { %2071 = vrot.lane.b32.xlu1 %v2069_v57, %s3853_s4 }
0x379a   :  { %v2072_v60 = vpop.permute.xlu1 %2071 }
0x379b   :  { %v4449_v4 = vadd.f32 %v2072_v60, %v2064_v58 }
0x379d   :  { %3743 = vtanh.f32 %v4449_v4  ;;  %v2142_v41 = vrot.slane %v4449_v4, 6 }
0x37a7   :  { %v3744_v5 = vpop.eup %3743 }
0x37a8   :  { %2077 = vrot.lane.b32.xlu0 %v3744_v5, %s3852_s2 }
0x381a   :  { %v2078_v7 = vpop.permute.xlu0 %2077 }
0x381b   :  { %v2080_v10 = vmul.f32 %v2078_v7, %v2060_v47 }
0x381d   :  { %v2081_v14 = vpack.c.bf16 %v2080_v10, %v2080_v10 }
0x381f   :  { %v2083_v0 = vrot.slane %v2081_v14, 1 }
0x3821   :  { %2084 = vrot.lane.b32.xlu1 %v2083_v0, %s3853_s4 }
0x3893   :  { %v2085_v15 = vpop.permute.xlu1 %2084 }
0x3894   :  { %3429 = vmatmul.mubr.msk.bf16.vlgmr.msra.gmra.mrb[44].mxu1 %vm143_vm5, %v2085_v15 }
0x3895   :  { %3441 = vmatpush3.bf16.msra.mxu1 %v4457_v61  ;;  %3444 = vmatprep.mubr.msk.bf16.mxu1 %vm3851_vm1, %v3849_v1 }
0x3896   :  { %3442 = vmatprep.subr.bf16.mxu1 %v3849_v1 }
0x3899   :  { %3443 = vmatpush3.bf16.msra.mxu1 %v4464_v16 }
0x389a   :  { %3456 = vmatprep.subr.bf16.mxu1 %v3849_v1 }
0x389c   :  { %3445 = vmatmul.mubr.bf16.vlgmr.msra.gmra.mrb[48].mxu1 %v3850_v3 }
0x389d   :  { %3457 = vmatpush3.bf16.msra.mxu1 %v4457_v61  ;;  %3460 = vmatprep.mubr.msk.bf16.mxu1 %vm3851_vm1, %v3849_v1 }
0x389e   :  { %3458 = vmatprep.subr.bf16.mxu1 %v3849_v1 }
0x38a1   :  { %3459 = vmatpush3.bf16.msra.mxu1 %v4464_v16 }
0x38a2   :  { %3472 = vmatprep.subr.bf16.mxu1 %v3849_v1 }
0x3967   :  { %v2123_v37 = vpop.f32.mrb[44].mxu1 }
0x3968   :  { %v2130_v21 = vrot.slane %v2123_v37, 4  ;;  %v3430_v43 = vpop.f32.mrb[45].mxu1 }
0x3969   :  { %v2126_v23 = vpop.f32.mrb[46].mxu1 }
0x396a   :  { %v2132_v24 = vadd.f32 %v2130_v21, %v4371_v2  ;;  %v3431_v25 = vpop.f32.mrb[47].mxu1 }
0x396c   :  { %v3119_v26 = vmul.f32 -1.442695, %v2132_v24 }
0x396e   :  { %3745 = vpow2.f32 %v3119_v26 }
0x396f   :  { %v2287_v3 = vpop.f32.mrb[48].mxu1 }
0x3970   :  { %v2294_v28 = vrot.slane %v2287_v3, 2  ;;  %v3446_v29 = vpop.f32.mrb[49].mxu1 }
0x3971   :  { %v2290_v31 = vpop.f32.mrb[50].mxu1 }
0x3972   :  { %v2296_v32 = vadd.f32 %v2294_v28, %v4481_v27  ;;  %v3447_v33 = vpop.f32.mrb[51].mxu1 }
0x3974   :  { %v3124_v63 = vmul.f32 -1.442695, %v2296_v32 }
0x3976   :  { %3747 = vpow2.f32 %v3124_v63 }
0x3977   :  { %3749 = vtanh.f32 %v2132_v24 }
0x3978   :  { %v3746_v19 = vpop.eup %3745 }
0x3979   :  { %v2137_v13 = vadd.f32 1.0, %v3746_v19 }
0x397b   :  { %3751 = vrcp.f32 %v2137_v13 }
0x397c   :  { %3753 = vtanh.f32 %v2296_v32 }
0x3980   :  { %v3748_v59 = vpop.eup %3747 }
0x3981   :  { %v2301_v20 = vadd.f32 1.0, %v3748_v59  ;;  %v3750_v18 = vpop.eup %3749 }
0x3983   :  { %3755 = vrcp.f32 %v2301_v20 }
0x3985   :  { %v3752_v62 = vpop.eup %3751 }
0x3986   :  { %v2140_v45 = vsel %vm3980_vm4, %v3750_v18, %v3752_v62  ;;  %v3754_v12 = vpop.eup %3753 }
0x3987   :  { %2146 = vrot.lane.b32.xlu0 %v2140_v45, %s3852_s2  ;;  %v2144_v34 = vmul.f32 %v2142_v41, %v2140_v45 }
0x398d   :  { %v3756_v35 = vpop.eup %3755 }
0x398e   :  { %v2304_v36 = vsel %vm3980_vm4, %v3754_v12, %v3756_v35 }
0x398f   :  { %2307 = vrot.lane.b32.xlu1 %v2304_v36, %s3852_s2  ;;  %v2305_v48 = vmul.f32 0.0, %v2304_v36 }
0x39f9   :  { %v2147_v39 = vpop.permute.xlu0 %2146 }
0x39fa   :  { %v2149_v40 = vmul.f32 %v2147_v39, %v2140_v45 }
0x39fc   :  { %2151 = vrot.lane.b32.xlu0 %v2149_v40, %s3853_s4 }
0x3a01   :  { %v2308_v42 = vpop.permute.xlu1 %2307 }
0x3a02   :  { %v2310_v44 = vmul.f32 %v2308_v42, %v2304_v36 }
0x3a04   :  { %2312 = vrot.lane.b32.xlu1 %v2310_v44, %s3853_s4 }
0x3a6e   :  { %v2152_v51 = vpop.permute.xlu0 %2151 }
0x3a6f   :  { %v4493_v55 = vadd.f32 %v2152_v51, %v2144_v34 }
0x3a71   :  { %3757 = vtanh.f32 %v4493_v55 }
0x3a76   :  { %v2313_v9 = vpop.permute.xlu1 %2312 }
0x3a77   :  { %v2315_v8 = vadd.f32 %v2313_v9, %v2305_v48 }
0x3a79   :  { %3759 = vtanh.f32 %v2315_v8  ;;  %v2383_v28 = vrot.slane %v2315_v8, 2 }
0x3a7b   :  { %v3758_v11 = vpop.eup %3757 }
0x3a7c   :  { %2157 = vrot.lane.b32.xlu0 %v3758_v11, %s3852_s2 }
0x3a83   :  { %v3760_v6 = vpop.eup %3759 }
0x3a84   :  { %2318 = vrot.lane.b32.xlu1 %v3760_v6, %s3852_s2 }
0x3aee   :  { %v2158_v22 = vpop.permute.xlu0 %2157 }
0x3aef   :  { %v2160_v49 = vmul.f32 %v2158_v22, %v2140_v45 }
0x3af1   :  { %v2161_v50 = vpack.c.bf16 %v2160_v49, %v2160_v49 }
0x3af3   :  { %v2163_v52 = vrot.slane %v2161_v50, 2 }
0x3af5   :  { %2164 = vrot.lane.b32.xlu0 %v2163_v52, %s3853_s4 }
0x3af6   :  { %v2319_v38 = vpop.permute.xlu1 %2318 }
0x3af7   :  { %v2321_v53 = vmul.f32 %v2319_v38, %v2304_v36 }
0x3af9   :  { %v2322_v54 = vpack.c.bf16 %v2321_v53, %v2321_v53 }
0x3afb   :  { %v2324_v47 = vrot.slane %v2322_v54, 3 }
0x3afd   :  { %2325 = vrot.lane.b32.xlu1 %v2324_v47, %s3853_s4 }
0x3b67   :  { %v2165_v56 = vpop.permute.xlu0 %2164 }
0x3b68   :  { %3437 = vmatmul.mubr.msk.bf16.vlgmr.msra.gmra.mrb[52].mxu0 %vm143_vm5, %v2165_v56 }
0x3b69   :  { %3449 = vmatpush3.bf16.msra.mxu0 %v4457_v61  ;;  %3452 = vmatprep.mubr.msk.bf16.mxu0 %vm3851_vm1, %v3849_v1 }
0x3b6a   :  { %3450 = vmatprep.subr.bf16.mxu0 %v3849_v1 }
0x3b6d   :  { %3451 = vmatpush3.bf16.msra.mxu0 %v4464_v16 }
0x3b6e   :  { %3464 = vmatprep.subr.bf16.mxu0 %v3849_v1 }
0x3b6f   :  { %v2326_v57 = vpop.permute.xlu1 %2325 }
0x3b70   :  { %3453 = vmatmul.mubr.msk.bf16.vlgmr.msra.gmra.mrb[56].mxu0 %vm143_vm5, %v2326_v57 }
0x3b71   :  { %3465 = vmatpush3.bf16.msra.mxu0 %v4457_v61  ;;  %3468 = vmatprep.mubr.msk.bf16.mxu0 %vm3851_vm1, %v3849_v1 }
0x3b72   :  { %3466 = vmatprep.subr.bf16.mxu0 %v3849_v1 }
0x3b75   :  { %3467 = vmatpush3.bf16.msra.mxu0 %v4464_v16 }
0x3b76   :  { %3480 = vmatprep.subr.bf16.mxu0 %v3849_v1 }
0x3c3b   :  { %v4514_v17 = vpop.f32.mrb[52].mxu0 }
0x3c3c   :  { %v3438_v58 = vpop.f32.mrb[53].mxu0 }
0x3c3d   :  { %v2206_v60 = vpop.f32.mrb[54].mxu0 }
0x3c3e   :  { %v3439_v4 = vpop.f32.mrb[55].mxu0 }
0x3c43   :  { %v2364_v5 = vpop.f32.mrb[56].mxu0 }
0x3c44   :  { %v2371_v7 = vrot.slane %v2364_v5, 4  ;;  %v3454_v10 = vpop.f32.mrb[57].mxu0 }
0x3c45   :  { %v2367_v14 = vpop.f32.mrb[58].mxu0 }
0x3c46   :  { %v2373_v0 = vadd.f32 %v2371_v7, %v4481_v27  ;;  %v3455_v15 = vpop.f32.mrb[59].mxu0 }
0x3c48   :  { %v3126_v37 = vmul.f32 -1.442695, %v2373_v0 }
0x3c4a   :  { %3761 = vpow2.f32 %v3126_v37 }
0x3c4b   :  { %3763 = vtanh.f32 %v2373_v0 }
0x3c54   :  { %v3762_v21 = vpop.eup %3761 }
0x3c55   :  { %v2378_v43 = vadd.f32 1.0, %v3762_v21  ;;  %v3764_v23 = vpop.eup %3763 }
0x3c57   :  { %3765 = vrcp.f32 %v2378_v43 }
0x3c61   :  { %v3766_v24 = vpop.eup %3765 }
0x3c62   :  { %v2381_v25 = vsel %vm3980_vm4, %v3764_v23, %v3766_v24 }
0x3c63   :  { %2387 = vrot.lane.b32.xlu0 %v2381_v25, %s3852_s2  ;;  %v2385_v29 = vmul.f32 %v2383_v28, %v2381_v25 }
0x3cd5   :  { %v2388_v26 = vpop.permute.xlu0 %2387 }
0x3cd6   :  { %v2390_v3 = vmul.f32 %v2388_v26, %v2381_v25 }
0x3cd8   :  { %2392 = vrot.lane.b32.xlu1 %v2390_v3, %s3853_s4 }
0x3d4a   :  { %v2393_v31 = vpop.permute.xlu1 %2392 }
0x3d4b   :  { %v2395_v32 = vadd.f32 %v2393_v31, %v2385_v29 }
0x3d4d   :  { %3767 = vtanh.f32 %v2395_v32  ;;  %v2463_v9 = vrot.slane %v2395_v32, 2 }
0x3d57   :  { %v3768_v33 = vpop.eup %3767 }
0x3d58   :  { %2398 = vrot.lane.b32.xlu0 %v3768_v33, %s3852_s2 }
0x3dca   :  { %v2399_v63 = vpop.permute.xlu0 %2398 }
0x3dcb   :  { %v2401_v19 = vmul.f32 %v2399_v63, %v2381_v25 }
0x3dcd   :  { %v2402_v13 = vpack.c.bf16 %v2401_v19, %v2401_v19 }
0x3dcf   :  { %v2404_v59 = vrot.slane %v2402_v13, 2 }
0x3dd1   :  { %2405 = vrot.lane.b32.xlu1 %v2404_v59, %s3853_s4 }
0x3e43   :  { %v2406_v20 = vpop.permute.xlu1 %2405 }
0x3e44   :  { %3461 = vmatmul.mubr.msk.bf16.vlgmr.msra.gmra.mrb[52].mxu1 %vm143_vm5, %v2406_v20 }
0x3e45   :  { %3473 = vmatpush3.bf16.msra.mxu1 %v4457_v61  ;;  %3476 = vmatprep.mubr.msk.bf16.mxu1 %vm3851_vm1, %v3849_v1 }
0x3e46   :  { %3474 = vmatprep.subr.bf16.mxu1 %v3849_v1 }
0x3e49   :  { %3475 = vmatpush3.bf16.msra.mxu1 %v4464_v16 }
0x3e4a   :  { %3488 = vmatprep.subr.bf16.mxu1 %v3849_v1 }
0x3f17   :  { %v2444_v18 = vpop.f32.mrb[52].mxu1 }
0x3f18   :  { %v2451_v62 = vrot.slane %v2444_v18, 6  ;;  %v3462_v45 = vpop.f32.mrb[53].mxu1 }
0x3f19   :  { %v2447_v12 = vpop.f32.mrb[54].mxu1 }
0x3f1a   :  { %v2453_v35 = vadd.f32 %v2451_v62, %v4481_v27  ;;  %v3463_v36 = vpop.f32.mrb[55].mxu1 }
0x3f1c   :  { %v3128_v39 = vmul.f32 -1.442695, %v2453_v35 }
0x3f1e   :  { %3769 = vpow2.f32 %v3128_v39 }
0x3f1f   :  { %3771 = vtanh.f32 %v2453_v35 }
0x3f28   :  { %v3770_v40 = vpop.eup %3769 }
0x3f29   :  { %v2458_v42 = vadd.f32 1.0, %v3770_v40  ;;  %v3772_v44 = vpop.eup %3771 }
0x3f2b   :  { %3773 = vrcp.f32 %v2458_v42 }
0x3f35   :  { %v3774_v41 = vpop.eup %3773 }
0x3f36   :  { %v2461_v34 = vsel %vm3980_vm4, %v3772_v44, %v3774_v41 }
0x3f37   :  { %2467 = vrot.lane.b32.xlu0 %v2461_v34, %s3852_s2  ;;  %v2465_v8 = vmul.f32 %v2463_v9, %v2461_v34 }
0x3fa9   :  { %v2468_v51 = vpop.permute.xlu0 %2467 }
0x3faa   :  { %v2470_v48 = vmul.f32 %v2468_v51, %v2461_v34 }
0x3fac   :  { %2472 = vrot.lane.b32.xlu1 %v2470_v48, %s3853_s4 }
0x401e   :  { %v2473_v11 = vpop.permute.xlu1 %2472 }
0x401f   :  { %v2475_v6 = vadd.f32 %v2473_v11, %v2465_v8 }
0x4021   :  { %3775 = vtanh.f32 %v2475_v6 }
0x402b   :  { %v3776_v22 = vpop.eup %3775 }
0x402c   :  { %2478 = vrot.lane.b32.xlu0 %v3776_v22, %s3852_s2 }
0x409e   :  { %v2479_v49 = vpop.permute.xlu0 %2478 }
0x409f   :  { %v2481_v50 = vmul.f32 %v2479_v49, %v2461_v34 }
0x40a1   :  { %v2482_v52 = vpack.c.bf16 %v2481_v50, %v2481_v50 }
0x40a3   :  { %v2484_v38 = vrot.slane %v2482_v52, 1 }
0x40a5   :  { %2485 = vrot.lane.b32.xlu1 %v2484_v38, %s3853_s4 }
0x4117   :  { %v2486_v53 = vpop.permute.xlu1 %2485 }
0x4118   :  { %3469 = vmatmul.mubr.msk.bf16.vlgmr.msra.gmra.mrb[60].mxu0 %vm143_vm5, %v2486_v53 }
0x4119   :  { %3481 = vmatpush3.bf16.msra.mxu0 %v4457_v61  ;;  %3484 = vmatprep.mubr.msk.bf16.mxu0 %vm3851_vm1, %v3849_v1 }
0x411a   :  { %3482 = vmatprep.subr.bf16.mxu0 %v3849_v1 }
0x411d   :  { %3483 = vmatpush3.bf16.msra.mxu0 %v4464_v16 }
0x411e   :  { %3496 = vmatprep.subr.bf16.mxu0 %v3849_v1 }
0x41eb   :  { %v2524_v54 = vpop.f32.mrb[60].mxu0 }
0x41ec   :  { %v2530_v47 = vadd.f32 %v2524_v54, %v4481_v27  ;;  %v3470_v56 = vpop.f32.mrb[61].mxu0  ;;  %v2540_v27 = vrot.slane %v2475_v6, 2 }
0x41ed   :  { %v2527_v57 = vpop.f32.mrb[62].mxu0 }
0x41ee   :  { %v3130_v58 = vmul.f32 -1.442695, %v2530_v47  ;;  %v3471_v60 = vpop.f32.mrb[63].mxu0 }
0x41f0   :  { %3777 = vpow2.f32 %v3130_v58 }
0x41f1   :  { %3779 = vtanh.f32 %v2530_v47 }
0x41fa   :  { %v3778_v4 = vpop.eup %3777 }
0x41fb   :  { %v2535_v5 = vadd.f32 1.0, %v3778_v4  ;;  %v3780_v7 = vpop.eup %3779 }
0x41fd   :  { %3781 = vrcp.f32 %v2535_v5 }
0x4207   :  { %v3782_v10 = vpop.eup %3781 }
0x4208   :  { %v2538_v14 = vsel %vm3980_vm4, %v3780_v7, %v3782_v10 }
0x4209   :  { %2544 = vrot.lane.b32.xlu0 %v2538_v14, %s3852_s2  ;;  %v2542_v37 = vmul.f32 %v2540_v27, %v2538_v14 }
0x427b   :  { %v2545_v0 = vpop.permute.xlu0 %2544 }
0x427c   :  { %v2547_v15 = vmul.f32 %v2545_v0, %v2538_v14 }
0x427e   :  { %2549 = vrot.lane.b32.xlu1 %v2547_v15, %s3853_s4 }
0x42f0   :  { %v2550_v21 = vpop.permute.xlu1 %2549 }
0x42f1   :  { %v2552_v43 = vadd.f32 %v2550_v21, %v2542_v37 }
0x42f3   :  { %3783 = vtanh.f32 %v2552_v43  ;;  %v2619_v35 = vrot.slane %v2552_v43, 2 }
0x42fd   :  { %v3784_v23 = vpop.eup %3783 }
0x42fe   :  { %2555 = vrot.lane.b32.xlu0 %v3784_v23, %s3852_s2 }
0x4370   :  { %v2556_v24 = vpop.permute.xlu0 %2555 }
0x4371   :  { %v2558_v25 = vmul.f32 %v2556_v24, %v2538_v14 }
0x4373   :  { %v2559_v26 = vpack.c.bf16 %v2558_v25, %v2558_v25 }
0x4375   :  { %2561 = vrot.lane.b32.xlu1 %v2559_v26, %s3853_s4 }
0x43e7   :  { %v2562_v3 = vpop.permute.xlu1 %2561 }
0x43e8   :  { %3477 = vmatmul.mubr.msk.bf16.vlgmr.msra.gmra.mrb[56].mxu1 %vm143_vm5, %v2562_v3 }
0x43e9   :  { %3489 = vmatpush3.bf16.msra.mxu1 %v4457_v61  ;;  %3492 = vmatprep.mubr.msk.bf16.mxu1 %vm3851_vm1, %v3849_v1 }
0x43ea   :  { %3490 = vmatprep.subr.bf16.mxu1 %v3849_v1 }
0x43ed   :  { %3491 = vmatpush3.bf16.msra.mxu1 %v4464_v16 }
0x44bb   :  { %v2600_v28 = vpop.f32.mrb[56].mxu1 }
0x44bc   :  { %v2607_v29 = vrot.slane %v2600_v28, 2  ;;  %v3478_v31 = vpop.f32.mrb[57].mxu1 }
0x44bd   :  { %v2603_v32 = vpop.f32.mrb[58].mxu1 }
0x44be   :  { %v2609_v33 = vadd.f32 %v2607_v29, %v4368_v46  ;;  %v3479_v63 = vpop.f32.mrb[59].mxu1 }
0x44c0   :  { %v3132_v19 = vmul.f32 -1.442695, %v2609_v33 }
0x44c2   :  { %3785 = vpow2.f32 %v3132_v19 }
0x44c3   :  { %3787 = vtanh.f32 %v2609_v33  ;;  %v2210_v33 = vrot.slane %v4514_v17, 2 }
0x44c5   :  { %v2212_v63 = vadd.f32 %v2210_v33, %v4371_v2 }
0x44c7   :  { %v3121_v19 = vmul.f32 -1.442695, %v2212_v63 }
0x44cc   :  { %v3786_v13 = vpop.eup %3785 }
0x44cd   :  { %v2614_v59 = vadd.f32 1.0, %v3786_v13  ;;  %v3788_v20 = vpop.eup %3787 }
0x44cf   :  { %3789 = vrcp.f32 %v2614_v59 }
0x44d9   :  { %v3790_v18 = vpop.eup %3789 }
0x44da   :  { %v2617_v62 = vsel %vm3980_vm4, %v3788_v20, %v3790_v18 }
0x44db   :  { %2623 = vrot.lane.b32.xlu0 %v2617_v62, %s3852_s2  ;;  %v2621_v36 = vmul.f32 %v2619_v35, %v2617_v62 }
0x454d   :  { %v2624_v45 = vpop.permute.xlu0 %2623 }
0x454e   :  { %v2626_v12 = vmul.f32 %v2624_v45, %v2617_v62 }
0x4550   :  { %2628 = vrot.lane.b32.xlu1 %v2626_v12, %s3853_s4 }
0x45c2   :  { %v2629_v39 = vpop.permute.xlu1 %2628 }
0x45c3   :  { %v2631_v40 = vadd.f32 %v2629_v39, %v2621_v36 }
0x45c5   :  { %3791 = vtanh.f32 %v2631_v40  ;;  %v2699_v56 = vrot.slane %v2631_v40, 2 }
0x45cf   :  { %v3792_v42 = vpop.eup %3791 }
0x45d0   :  { %2634 = vrot.lane.b32.xlu0 %v3792_v42, %s3852_s2 }
0x4642   :  { %v2635_v44 = vpop.permute.xlu0 %2634 }
0x4643   :  { %v2637_v41 = vmul.f32 %v2635_v44, %v2617_v62 }
0x4645   :  { %v2638_v34 = vpack.c.bf16 %v2637_v41, %v2637_v41 }
0x4647   :  { %v2640_v51 = vrot.slane %v2638_v34, 3  ;;  %v2222_v34 = vrot.slane %v4493_v55, 6 }
0x4649   :  { %2641 = vrot.lane.b32.xlu1 %v2640_v51, %s3853_s4 }
0x46bb   :  { %v2642_v48 = vpop.permute.xlu1 %2641 }
0x46bc   :  { %3485 = vmatmul.mubr.msk.bf16.vlgmr.msra.gmra.mrb[64].mxu0 %vm143_vm5, %v2642_v48 }
0x46bd   :  { %3497 = vmatpush3.bf16.msra.mxu0 %v4457_v61  ;;  %3500 = vmatprep.mubr.msk.bf16.mxu0 %vm3851_vm1, %v3849_v1 }
0x46be   :  { %3498 = vmatprep.subr.bf16.mxu0 %v3849_v1 }
0x46c1   :  { %3499 = vmatpush3.bf16.msra.mxu0 %v4464_v16 }
0x478f   :  { %v2680_v9 = vpop.f32.mrb[64].mxu0 }
0x4790   :  { %v2687_v8 = vrot.slane %v2680_v9, 4  ;;  %v3486_v11 = vpop.f32.mrb[65].mxu0 }
0x4791   :  { %v2683_v6 = vpop.f32.mrb[66].mxu0 }
0x4792   :  { %v2689_v22 = vadd.f32 %v2687_v8, %v4368_v46  ;;  %v3487_v49 = vpop.f32.mrb[67].mxu0 }
0x4794   :  { %v3134_v50 = vmul.f32 -1.442695, %v2689_v22 }
0x4796   :  { %3793 = vpow2.f32 %v3134_v50 }
0x4797   :  { %3795 = vtanh.f32 %v2689_v22 }
0x47a0   :  { %v3794_v52 = vpop.eup %3793 }
0x47a1   :  { %v2694_v38 = vadd.f32 1.0, %v3794_v52  ;;  %v3796_v61 = vpop.eup %3795 }
0x47a3   :  { %3797 = vrcp.f32 %v2694_v38 }
0x47ad   :  { %v3798_v53 = vpop.eup %3797 }
0x47ae   :  { %v2697_v54 = vsel %vm3980_vm4, %v3796_v61, %v3798_v53 }
0x47af   :  { %2703 = vrot.lane.b32.xlu0 %v2697_v54, %s3852_s2  ;;  %v2701_v57 = vmul.f32 %v2699_v56, %v2697_v54  ;;  %v2876_v56 = vld [vmem:[%s4662_s9 + $0x8] sm:$0xff] }
0x4821   :  { %v2704_v16 = vpop.permute.xlu0 %2703 }
0x4822   :  { %v2706_v47 = vmul.f32 %v2704_v16, %v2697_v54 }
0x4824   :  { %2708 = vrot.lane.b32.xlu1 %v2706_v47, %s3853_s4 }
0x4896   :  { %v2709_v58 = vpop.permute.xlu1 %2708 }
0x4897   :  { %v2711_v60 = vadd.f32 %v2709_v58, %v2701_v57  ;;  %v3854_v57 = vmov 0.0|0.0  }
0x4898   :  { %3532 = vmatprep.subr.bf16.mxu0 %v3854_v57  ;;  %3526 = vmatprep.subr.bf16.mxu1 %v3854_v57 }
0x4899   :  { %3799 = vtanh.f32 %v2711_v60  ;;  %v2779_v59 = vrot.slane %v2711_v60, 2 }
0x48a3   :  { %v3800_v4 = vpop.eup %3799 }
0x48a4   :  { %2714 = vrot.lane.b32.xlu0 %v3800_v4, %s3852_s2  ;;  %v2877_v4 = vld [vmem:[%s4662_s9 + $0x10] sm:$0xff] }
0x4916   :  { %v2715_v5 = vpop.permute.xlu0 %2714 }
0x4917   :  { %v2717_v7 = vmul.f32 %v2715_v5, %v2697_v54  ;;  %v2878_v5 = vld [vmem:[%s4662_s9 + $0x18] sm:$0xff] }
0x4919   :  { %v2718_v10 = vpack.c.bf16 %v2717_v7, %v2717_v7 }
0x491b   :  { %v2720_v14 = vrot.slane %v2718_v10, 2  ;;  %v3536_v10 = vpack.c.bf16 %v2878_v5, %v2877_v4 }
0x491d   :  { %2721 = vrot.lane.b32.xlu1 %v2720_v14, %s3853_s4 }
0x498f   :  { %v2722_v0 = vpop.permute.xlu1 %2721 }
0x4990   :  { %3493 = vmatmul.mubr.msk.bf16.vlgmr.msra.gmra.mrb[60].mxu1 %vm143_vm5, %v2722_v0  ;;  %v2879_v0 = vld [vmem:[%s4662_s9 + $0x20] sm:$0xff] }
0x4991   :  { %3512 = vmatprep.mubr.msk.f32.mxu1 %vm3851_vm1, %v3849_v1 }
0x4a63   :  { %v2760_v15 = vpop.f32.mrb[60].mxu1 }
0x4a64   :  { %v2767_v27 = vrot.slane %v2760_v15, 6  ;;  %v3494_v37 = vpop.f32.mrb[61].mxu1  ;;  %v2880_v15 = vld [vmem:[%s4662_s9 + $0x28] sm:$0xff] }
0x4a65   :  { %v2763_v21 = vpop.f32.mrb[62].mxu1  ;;  %v3527_v37 = vpack.c.bf16 %v2880_v15, %v2879_v0 }
0x4a66   :  { %v2769_v43 = vadd.f32 %v2767_v27, %v4368_v46  ;;  %v3495_v23 = vpop.f32.mrb[63].mxu1  ;;  %v2881_v27 = vld [vmem:[%s4662_s9 + $0x30] sm:$0xff]  ;;  %v2882_v21 = vld [vmem:[%s4662_s9 + $0x38] sm:$0xff] }
0x4a67   :  { %3528 = vmatpush3.bf16.msra.mxu1 %v3527_v37 }
0x4a68   :  { %v3136_v24 = vmul.f32 -1.442695, %v2769_v43  ;;  %3529 = vmatprep.subr.bf16.mxu1 %v3854_v57 }
0x4a6a   :  { %3801 = vpow2.f32 %v3136_v24 }
0x4a6b   :  { %3803 = vtanh.f32 %v2769_v43  ;;  %v3530_v43 = vpack.c.bf16 %v2882_v21, %v2881_v27 }
0x4a6d   :  { %3531 = vmatpush3.bf16.msra.mxu1 %v3530_v43 }
0x4a74   :  { %v3802_v25 = vpop.eup %3801 }
0x4a75   :  { %v2774_v26 = vadd.f32 1.0, %v3802_v25  ;;  %v3804_v3 = vpop.eup %3803 }
0x4a77   :  { %3805 = vrcp.f32 %v2774_v26 }
0x4a78   :  { %3807 = vpow2.f32 %v3121_v19  ;;  %v3141_v19 = vld [vmem:[%s4663_s10] ss:$0 sm:$0xff] }
0x4a81   :  { %v3806_v28 = vpop.eup %3805 }
0x4a82   :  { %v2777_v29 = vsel %vm3980_vm4, %v3804_v3, %v3806_v28  ;;  %v3808_v13 = vpop.eup %3807 }
0x4a83   :  { %2783 = vrot.lane.b32.xlu0 %v2777_v29, %s3852_s2  ;;  %v2781_v20 = vmul.f32 %v2779_v59, %v2777_v29  ;;  %v2217_v18 = vadd.f32 1.0, %v3808_v13 }
0x4af5   :  { %v2784_v31 = vpop.permute.xlu0 %2783 }
0x4af6   :  { %v2786_v32 = vmul.f32 %v2784_v31, %v2777_v29 }
0x4af8   :  { %2788 = vrot.lane.b32.xlu1 %v2786_v32, %s3853_s4 }
0x4b6a   :  { %v2789_v62 = vpop.permute.xlu1 %2788 }
0x4b6b   :  { %v2791_v45 = vadd.f32 %v2789_v62, %v2781_v20 }
0x4b6d   :  { %3809 = vtanh.f32 %v2791_v45  ;;  %v2856_v30 = vrot.slane %v2791_v45, 2 }
0x4b6e   :  { %3811 = vrcp.f32 %v2217_v18 }
0x4b6f   :  { %3813 = vtanh.f32 %v2212_v63 }
0x4b77   :  { %v3810_v12 = vpop.eup %3809 }
0x4b78   :  { %v3812_v35 = vpop.eup %3811  ;;  %2794 = vrot.lane.b32.xlu0 %v3810_v12, %s3852_s2 }
0x4b79   :  { %v3814_v36 = vpop.eup %3813 }
0x4b7a   :  { %v4590_v17 = vsel %vm3980_vm4, %v3814_v36, %v3812_v35 }
0x4b7b   :  { %v2224_v51 = vmul.f32 %v2222_v34, %v4590_v17 }
0x4b7c   :  { %2226 = vrot.lane.b32.xlu0 %v4590_v17, %s3852_s2 }
0x4bea   :  { %v2795_v2 = vpop.permute.xlu0 %2794 }
0x4beb   :  { %v2797_v39 = vmul.f32 %v2795_v2, %v2777_v29 }
0x4bed   :  { %v2798_v40 = vpack.c.bf16 %v2797_v39, %v2797_v39 }
0x4bee   :  { %v2227_v42 = vpop.permute.xlu0 %2226 }
0x4bef   :  { %v2800_v44 = vrot.slane %v2798_v40, 1  ;;  %v2229_v41 = vmul.f32 %v2227_v42, %v4590_v17 }
0x4bf1   :  { %2801 = vrot.lane.b32.xlu1 %v2800_v44, %s3853_s4  ;;  %2231 = vrot.lane.b32.xlu0 %v2229_v41, %s3853_s4 }
0x4c63   :  { %v2802_v48 = vpop.permute.xlu1 %2801  ;;  %v2232_v9 = vpop.permute.xlu0 %2231 }
0x4c64   :  { %v2234_v8 = vadd.f32 %v2232_v9, %v2224_v51  ;;  %3501 = vmatmul.mubr.msk.bf16.vlgmr.msra.gmra.mrb[68].mxu0 %vm143_vm5, %v2802_v48 }
0x4c65   :  { %3523 = vmatprep.mubr.msk.f32.mxu0 %vm3851_vm1, %v3849_v1 }
0x4c66   :  { %3815 = vtanh.f32 %v2234_v8 }
0x4c70   :  { %v3816_v11 = vpop.eup %3815 }
0x4c71   :  { %2237 = vrot.lane.b32.xlu0 %v3816_v11, %s3852_s2 }
0x4ce3   :  { %v2238_v23 = vpop.permute.xlu0 %2237 }
0x4ce4   :  { %v2240_v24 = vmul.f32 %v2238_v23, %v4590_v17 }
0x4ce6   :  { %v2959_v26 = vrot.slane %v2240_v24, 6 }
0x4d37   :  { %v2840_v6 = vpop.f32.mrb[68].mxu0 }
0x4d38   :  { %v2846_v22 = vadd.f32 %v2840_v6, %v4368_v46  ;;  %v3502_v49 = vpop.f32.mrb[69].mxu0  ;;  %v2875_v46 = vld [vmem:[%s4662_s9] sm:$0xff] }
0x4d39   :  { %v2843_v50 = vpop.f32.mrb[70].mxu0  ;;  %v3533_v58 = vpack.c.bf16 %v2876_v56, %v2875_v46 }
0x4d3a   :  { %v3138_v55 = vmul.f32 -1.442695, %v2846_v22  ;;  %v3503_v52 = vpop.f32.mrb[71].mxu0 }
0x4d3b   :  { %3534 = vmatpush3.bf16.msra.mxu0 %v3533_v58 }
0x4d3c   :  { %3817 = vpow2.f32 %v3138_v55  ;;  %3535 = vmatprep.subr.bf16.mxu0 %v3854_v57 }
0x4d3d   :  { %3819 = vtanh.f32 %v2846_v22 }
0x4d3f   :  { %3537 = vmatpush3.bf16.msra.mxu0 %v3536_v10 }
0x4d46   :  { %v3818_v38 = vpop.eup %3817 }
0x4d47   :  { %v2851_v61 = vadd.f32 1.0, %v3818_v38  ;;  %v3820_v53 = vpop.eup %3819 }
0x4d49   :  { %3821 = vrcp.f32 %v2851_v61 }
0x4d53   :  { %v3822_v54 = vpop.eup %3821 }
0x4d54   :  { %v2854_v1 = vsel %vm3980_vm4, %v3820_v53, %v3822_v54 }
0x4d55   :  { %2860 = vrot.lane.b32.xlu1 %v2854_v1, %s3852_s2  ;;  %v2858_v60 = vmul.f32 %v2856_v30, %v2854_v1 }
0x4dc7   :  { %v2861_v16 = vpop.permute.xlu1 %2860 }
0x4dc8   :  { %v2863_v47 = vmul.f32 %v2861_v16, %v2854_v1 }
0x4dca   :  { %2865 = vrot.lane.b32.xlu1 %v2863_v47, %s3853_s4 }
0x4e3c   :  { %v2866_v7 = vpop.permute.xlu1 %2865 }
0x4e3d   :  { %v2868_v14 = vadd.f32 %v2866_v7, %v2858_v60 }
0x4e3f   :  { %3823 = vtanh.f32 %v2868_v14 }
0x4e49   :  { %v3824_v25 = vpop.eup %3823 }
0x4e4a   :  { %2871 = vrot.lane.b32.xlu1 %v3824_v25, %s3852_s2  ;;  %s3855_s2 = smov [#allocation3]  }
0x4e4b   :  { %s3050_s1 = sshll.u32 %s3855_s2, 4  ;;  %s3051_s1 = int_to_ptr.vmem [resolvable:$true] %s3050_s1 }
0x4e4c   :  { %p3830_p1 = scmp.lt.s32.totalorder %s3051_s1, %s3051_s1 }
0x4e4e   :  { %2960 = vrot.lane.b32.xlu1 %v2959_v26, %s3853_s4 }
0x4ebc   :  { %v2872_v3 = vpop.permute.xlu1 %2871 }
0x4ebd   :  { %v2874_v28 = vmul.f32 %v2872_v3, %v2854_v1 }
0x4ebf   :  { %2884 = vrot.lane.b32.xlu0 %v2874_v28, %s3853_s4  ;;  %s3825_s4 = scalar_lea.vmem %s3051_s1, 32 }
0x4ec0   :  { %v2961_v29 = vpop.permute.xlu1 %2960  ;;  %p3826_p0 = scmp.ne.s32.totalorder %s3051_s1, %s3825_s4  ;;  %p3831_p2 = scmp.lt.s32.totalorder %s3825_s4, %s3825_s4 }
0x4ec1   :  { %3524 = vmatmul.mubr.msk.f32.vlgmr.msra.gmra.mrb[72].mxu0 %vm143_vm5, %v2961_v29 }
0x4ec2   :  { %p3832_p3 = por %p3831_p2, %p3830_p1 }
0x4ec4   :  { %p3833_p4 = pnand %p3832_p3, %p3826_p0 }
0x4f31   :  { %v2885_v31 = vpop.permute.xlu0 %2884 }
0x4f32   :  { %3513 = vmatmul.mubr.msk.f32.vlgmr.msra.gmra.mrb[64].mxu1 %vm143_vm5, %v2885_v31 }
0x4f94   :  { %v3030_v32 = vpop.f32.mrb[72].mxu0 }
0x4f95   :  { %v3525_v33 = vpop.f32.mrb[73].mxu0 }
0x5005   :  { %v2954_v63 = vpop.f32.mrb[64].mxu1 }
0x5006   :  { %v3031_v13 = vadd.f32 %v3030_v32, %v2954_v63  ;;  %v3514_v59 = vpop.f32.mrb[65].mxu1 }
0x5008   :  { %v3041_v20 = vadd.f32 %v3141_v19, %v3031_v13 }
0x500a   :  { %3043 = vst.msk [vmem:[#allocation3] sm:$0x3] %vm3042_vm15, %v3041_v20 }
0x500b   :  { %3836 = shalt.err (!%p3833_p4)
}
0x500c   :  { %s3837_s5 = scalar_lea.hbm %s4664_s11, 32 }
0x500d   :  { %p3838_p5 = scmp.ne.s32.totalorder %s4664_s11, %s3837_s5  ;;  %p3841_p6 = scmp.lt.u32.totalorder %s3837_s5, %s4664_s11 }
0x500f   :  { %p3843_p7 = pnand %p3841_p6, %p3838_p5 }
0x5011   :  { %3846 = shalt.err (!%p3843_p7)
}
0x5012   :  { %3053 = dma.vmem_to_hbm [thread:$0]  %s3051_s1, 32, %s4664_s11, [#allocation4]  }
0x5013   :  { %3847 = dma.done.wait [#allocation4], 32  }
0x5014   :  { %3848 = vsyncadd [#allocation4], 4294967264 }
0x5015   :  { %3057 = vsyncpa [#allocation4], 1 }

</bundles_post_ra>
